<compile_context>
chip_gen: v5e
topology: v5e:2x2
jax: 0.10.0
libtpu: 0.0.40
codegen_flags: <defaults>
</compile_context>

<pallas_src>
import math
from functools import partial

import jax
import jax.numpy as jnp
from jax.experimental import pallas as pl

# ----------------------- config (cfg.model / cfg.data) -----------------------
B = 2                      # batch
L = 8                      # sequence length == cfg.data.shape[0] == max_len
S = 8                      # cfg.data.S  (state-space size)
D_MODEL = 32               # cfg.model.d_model
NUM_HEADS = 4              # cfg.model.num_heads
DIM_FF = 64                # cfg.model.dim_feedforward
NUM_LAYERS = 2             # cfg.model.num_layers
NUM_OUT_RESID = 2          # cfg.model.num_output_FFresiduals
TEMB_DIM = 16              # cfg.model.temb_dim
TEMB4 = 4 * TEMB_DIM
TIME_SCALE = 1000          # cfg.model.time_scale_factor
HEAD_DIM = D_MODEL // NUM_HEADS
BL = B * L
NUM_FILM = NUM_LAYERS + NUM_OUT_RESID
TEMB_ROWS = 8              # temb MLP rows (B padded to a full sublane group)
OUT_PAD = 128              # lane-dense output width (first S lanes are real)
NEG_INF = -1e30


# ------------------------------ in-kernel helpers -----------------------------
def _layernorm(x, g, b, eps=1e-5):
    mu = jnp.mean(x, axis=-1, keepdims=True)
    xc = x - mu
    var = jnp.mean(xc * xc, axis=-1, keepdims=True)
    return xc * jax.lax.rsqrt(var + eps) * g + b


# ------------------------- single fused forward kernel -------------------------
def make_fused_kernel(lay):
    """lay: name -> (row, col, height, width) static offsets in the param slab."""
    D, H = D_MODEL, NUM_HEADS
    f32 = jnp.float32

    def kernel(tok_ref, e_ref, slab_ref, o_ref):
        def blk(name):
            r, c, hh, ww = lay[name]
            return slab_ref[r:r + hh, c:c + ww]

        # ---- token one-hots built in-kernel (no wrapper one_hot / reshape) ----
        tok = tok_ref[...]                                               # (BL, 1) int32
        oh = (jax.lax.broadcasted_iota(jnp.int32, (BL, S), 1) == tok).astype(f32)
        oh_pad = (jax.lax.broadcasted_iota(jnp.int32, (BL, OUT_PAD), 1) == tok).astype(f32)

        # ---- time-embedding MLP on 8 rows, replicated to BL via selector matmul ----
        th = jnp.maximum(
            jnp.dot(e_ref[...], blk("temb_w1"), preferred_element_type=f32)
            + blk("temb_b1"), 0.0)
        temb_b = (jnp.dot(th, blk("temb_w2"), preferred_element_type=f32)
                  + blk("temb_b2"))                                      # (8, TEMB4)
        temb = jnp.dot(blk("sel"), temb_b, preferred_element_type=f32)   # (BL, TEMB4)

        # ---- FiLM hoisted: all scales / shifts in two lane-dense matmuls ----
        film_scale = (jnp.dot(temb, blk("fw_scale"), preferred_element_type=f32)
                      + blk("fb_scale"))                                 # (BL, 128)
        film_shift = (jnp.dot(temb, blk("fw_shift"), preferred_element_type=f32)
                      + blk("fb_shift"))                                 # (BL, 128)

        # ---- input embedding + positional encoding (emb bias folded into pe) ----
        x = jnp.dot(oh, blk("emb_w"), preferred_element_type=f32) + blk("pe_b")   # (BL, D)

        bias = blk("attn_bias")            # (BL, BL) block-diag: 0 same batch, -1e30 else

        # -------------------- encoder layers (statically unrolled) --------------------
        for l in range(NUM_LAYERS):
            fs = film_scale[:, l * D:(l + 1) * D]
            fh = film_shift[:, l * D:(l + 1) * D]

            heads = []
            for h in range(H):     # per-head weight matmuls: no activation lane slices
                q = jnp.dot(x, blk(f"wq_{l}_{h}"),
                            preferred_element_type=f32) + blk(f"bq_{l}_{h}")
                k = jnp.dot(x, blk(f"wk_{l}_{h}"),
                            preferred_element_type=f32) + blk(f"bk_{l}_{h}")
                v = jnp.dot(x, blk(f"wv_{l}_{h}"),
                            preferred_element_type=f32) + blk(f"bv_{l}_{h}")
                s = jax.lax.dot_general(q, k, (((1,), (1,)), ((), ())),
                                        preferred_element_type=f32) + bias
                s = s - jnp.max(s, axis=-1, keepdims=True)
                p = jnp.exp(s)
                p = p * pl.reciprocal(jnp.sum(p, axis=-1, keepdims=True), approx=True)
                heads.append(jnp.dot(p, v, preferred_element_type=f32))
            attn = (jnp.dot(jnp.concatenate(heads, axis=1), blk(f"wo_{l}"),
                            preferred_element_type=f32) + blk(f"bo_{l}"))

            # residual + LayerNorm1 + FiLM
            x = _layernorm(x + attn, blk(f"g1_{l}"), blk(f"be1_{l}"))
            x = fs * x + fh

            # feed-forward block
            h1 = jnp.maximum(jnp.dot(x, blk(f"w1_{l}"), preferred_element_type=f32)
                             + blk(f"b1_{l}"), 0.0)
            ff = jnp.dot(h1, blk(f"w2_{l}"), preferred_element_type=f32) + blk(f"b2_{l}")

            # residual + LayerNorm2 + FiLM
            x = _layernorm(x + ff, blk(f"g2_{l}"), blk(f"be2_{l}"))
            x = fs * x + fh

        # ----------------------------- output FFResidual blocks -----------------------------
        for r in range(NUM_OUT_RESID):
            li = NUM_LAYERS + r
            fs = film_scale[:, li * D:(li + 1) * D]
            fh = film_shift[:, li * D:(li + 1) * D]
            h1 = jnp.maximum(jnp.dot(x, blk(f"rw1_{r}"), preferred_element_type=f32)
                             + blk(f"rb1_{r}"), 0.0)
            ff = jnp.dot(h1, blk(f"rw2_{r}"), preferred_element_type=f32) + blk(f"rb2_{r}")
            x = _layernorm(x + ff, blk(f"rg_{r}"), blk(f"rbe_{r}"))
            x = fs * x + fh

        # -------- output projection + one-hot skip, lane-dense padded softmax --------
        # lanes >= S carry -1e30 (from out_b pad) -> exp underflows to exactly 0.
        logits = (jnp.dot(x, blk("out_w"), preferred_element_type=f32)
                  + blk("out_b") + oh_pad)                               # (BL, 128)
        m = jnp.max(logits, axis=-1, keepdims=True)
        ez = jnp.exp(logits - m)
        o_ref[...] = ez / jnp.sum(ez, axis=-1, keepdims=True)

    return kernel


# --------------------------- parameter slab packing ---------------------------
class _SlabBuilder:
    """Packs many small 2-D f32 arrays into one lane-dense (rows, 128) slab."""

    WIDTH = 128

    def __init__(self):
        self._layout = {}
        self._items = []
        self._row = 0

    def block(self, items):
        """Place items [(name, arr), ...] side by side along lanes, sharing one
        row range (rounded up to a multiple of 8 sublanes)."""
        col, height = 0, 0
        for name, arr in items:
            arr = jnp.asarray(arr, jnp.float32)
            assert arr.ndim == 2
            hgt, wid = arr.shape
            assert col + wid <= self.WIDTH, (name, col, wid)
            self._layout[name] = (self._row, col, hgt, wid)
            self._items.append((name, arr))
            col += wid
            height = max(height, hgt)
        self._row += ((height + 7) // 8) * 8

    def finalize(self):
        rows = max(8, ((self._row + 7) // 8) * 8)
        slab = jnp.zeros((rows, self.WIDTH), jnp.float32)
        for name, arr in self._items:
            r, c, hgt, wid = self._layout[name]
            slab = slab.at[r:r + hgt, c:c + wid].set(arr)
        return slab, dict(self._layout)


def timestep_embedding(timesteps, embedding_dim, max_positions=10000):
    half_dim = embedding_dim // 2
    emb = math.log(max_positions) / (half_dim - 1)
    freqs = jnp.exp(jnp.arange(half_dim, dtype=jnp.float32) * -emb)
    args = timesteps.astype(jnp.float32)[:, None] * freqs[None, :]
    return jnp.concatenate([jnp.sin(args), jnp.cos(args)], axis=1)


def make_positional_encoding(max_len, d_model):
    # matches PositionalEncoding: pe[:, 0::2] = sin, pe[:, 1::2] = cos
    position = jnp.arange(max_len, dtype=jnp.float32)[:, None]
    div_term = jnp.exp(jnp.arange(0, d_model, 2, dtype=jnp.float32)
                       * (-math.log(10000.0) / d_model))
    pe = jnp.zeros((max_len, d_model), jnp.float32)
    pe = pe.at[:, 0::2].set(jnp.sin(position * div_term))
    pe = pe.at[:, 1::2].set(jnp.cos(position * div_term))
    return pe                                                    # (L, D)


def build_slab(key):
    keys = iter(jax.random.split(key, 256))

    def lin(din, dout):
        w = jax.random.normal(next(keys), (din, dout), jnp.float32) / math.sqrt(din)
        bb = 0.01 * jax.random.normal(next(keys), (1, dout), jnp.float32)
        return w, bb

    temb_w1, temb_b1 = lin(TEMB_DIM, DIM_FF)
    temb_w2, temb_b2 = lin(DIM_FF, TEMB4)

    emb_w, emb_b = lin(S, D_MODEL)
    # positional encoding with the embedding bias pre-folded in, tiled over batch rows
    pe_b = jnp.tile(make_positional_encoding(L, D_MODEL) + emb_b, (B, 1))     # (BL, D)

    row_batch = jnp.arange(BL, dtype=jnp.int32) // L
    attn_bias = jnp.where(row_batch[:, None] == row_batch[None, :],
                          0.0, NEG_INF).astype(jnp.float32)                   # (BL, BL)
    # selector matrix that replicates per-batch temb rows to per-token rows
    sel = (row_batch[:, None] == jnp.arange(TEMB_ROWS, dtype=jnp.int32)[None, :]
           ).astype(jnp.float32)                                              # (BL, 8)

    inv_sqrt_dh = 1.0 / math.sqrt(HEAD_DIM)

    enc, res, film_w, film_b = [], [], [], []
    for _ in range(NUM_LAYERS):
        wqkv, bqkv = lin(D_MODEL, 3 * D_MODEL)
        wq = wqkv[:, :D_MODEL] * inv_sqrt_dh        # fold 1/sqrt(head_dim) into Q
        bq = bqkv[:, :D_MODEL] * inv_sqrt_dh
        wk, bk = wqkv[:, D_MODEL:2 * D_MODEL], bqkv[:, D_MODEL:2 * D_MODEL]
        wv, bv = wqkv[:, 2 * D_MODEL:], bqkv[:, 2 * D_MODEL:]
        wo, bo = lin(D_MODEL, D_MODEL)
        w1, b1 = lin(D_MODEL, DIM_FF)
        w2, b2 = lin(DIM_FF, D_MODEL)
        enc.append(dict(wq=wq, bq=bq, wk=wk, bk=bk, wv=wv, bv=bv, wo=wo, bo=bo,
                        w1=w1, b1=b1, w2=w2, b2=b2,
                        g1=jnp.ones((1, D_MODEL)), be1=jnp.zeros((1, D_MODEL)),
                        g2=jnp.ones((1, D_MODEL)), be2=jnp.zeros((1, D_MODEL))))
        fw, fb = lin(TEMB4, 2 * D_MODEL)
        film_w.append(fw); film_b.append(fb)

    for _ in range(NUM_OUT_RESID):
        w1, b1 = lin(D_MODEL, DIM_FF)
        w2, b2 = lin(DIM_FF, D_MODEL)
        res.append(dict(w1=w1, b1=b1, w2=w2, b2=b2,
                        g=jnp.ones((1, D_MODEL)), be=jnp.zeros((1, D_MODEL))))
        fw, fb = lin(TEMB4, 2 * D_MODEL)
        film_w.append(fw); film_b.append(fb)

    # FiLM fused along lanes: all scales / all shifts (each NUM_FILM*D = 128 wide)
    fw_scale = jnp.concatenate([w[:, :D_MODEL] for w in film_w], axis=1)      # (64, 128)
    fw_shift = jnp.concatenate([w[:, D_MODEL:] for w in film_w], axis=1)      # (64, 128)
    fb_scale = jnp.concatenate([b[:, :D_MODEL] for b in film_b], axis=1)      # (1, 128)
    fb_shift = jnp.concatenate([b[:, D_MODEL:] for b in film_b], axis=1)      # (1, 128)

    out_w, out_b = lin(D_MODEL, S)
    out_w_pad = jnp.zeros((D_MODEL, OUT_PAD), jnp.float32).at[:, :S].set(out_w)
    out_b_pad = jnp.full((1, OUT_PAD), NEG_INF, jnp.float32).at[:, :S].set(out_b)

    Dh = HEAD_DIM
    sb = _SlabBuilder()
    sb.block([("temb_w1", temb_w1)])
    sb.block([("temb_b1", temb_b1), ("temb_b2", temb_b2)])
    sb.block([("temb_w2", temb_w2)])
    sb.block([("fw_scale", fw_scale)])
    sb.block([("fw_shift", fw_shift)])
    sb.block([("fb_scale", fb_scale)])
    sb.block([("fb_shift", fb_shift)])
    sb.block([("emb_w", emb_w)])
    sb.block([("pe_b", pe_b), ("attn_bias", attn_bias), ("sel", sel)])
    for l, p in enumerate(enc):
        witems, bitems = [], []
        for h in range(NUM_HEADS):
            c0, c1 = h * Dh, (h + 1) * Dh
            witems += [(f"wq_{l}_{h}", p["wq"][:, c0:c1]),
                       (f"wk_{l}_{h}", p["wk"][:, c0:c1]),
                       (f"wv_{l}_{h}", p["wv"][:, c0:c1])]
            bitems += [(f"bq_{l}_{h}", p["bq"][:, c0:c1]),
                       (f"bk_{l}_{h}", p["bk"][:, c0:c1]),
                       (f"bv_{l}_{h}", p["bv"][:, c0:c1])]
        sb.block(witems)          # 12 x (32,8) -> 96 lanes, 32 rows
        sb.block(bitems)          # 12 x (1,8)  -> 96 lanes, 8 rows
    sb.block([(f"wo_{l}", enc[l]["wo"]) for l in range(NUM_LAYERS)])
    sb.block([(f"bo_{l}", enc[l]["bo"]) for l in range(NUM_LAYERS)]
             + [(f"b2_{l}", enc[l]["b2"]) for l in range(NUM_LAYERS)])
    sb.block([(f"b1_{l}", enc[l]["b1"]) for l in range(NUM_LAYERS)])
    for l in range(NUM_LAYERS):
        sb.block([(f"g1_{l}", enc[l]["g1"]), (f"be1_{l}", enc[l]["be1"]),
                  (f"g2_{l}", enc[l]["g2"]), (f"be2_{l}", enc[l]["be2"])])
    sb.block([(f"w1_{l}", enc[l]["w1"]) for l in range(NUM_LAYERS)])
    sb.block([(f"w2_{l}", enc[l]["w2"]) for l in range(NUM_LAYERS)])
    sb.block([(f"rw1_{r}", res[r]["w1"]) for r in range(NUM_OUT_RESID)])
    sb.block([(f"rw2_{r}", res[r]["w2"]) for r in range(NUM_OUT_RESID)])
    sb.block([(f"rb1_{r}", res[r]["b1"]) for r in range(NUM_OUT_RESID)])
    sb.block([(f"rb2_{r}", res[r]["b2"]) for r in range(NUM_OUT_RESID)]
             + [(f"rg_{r}", res[r]["g"]) for r in range(NUM_OUT_RESID)])
    sb.block([(f"rbe_{r}", res[r]["be"]) for r in range(NUM_OUT_RESID)])
    sb.block([("out_w", out_w_pad)])
    sb.block([("out_b", out_b_pad)])

    return sb.finalize()


# --------------------------------- plain-JAX glue -------------------------------
def sequence_transformer_forward(layout, slab, x_tokens, t):
    # TODO(synk): sin/cos timestep table still built in the wrapper (tiny, 8x16).
    e = jnp.zeros((TEMB_ROWS, TEMB_DIM), jnp.float32).at[:B, :].set(
        timestep_embedding(t * TIME_SCALE, TEMB_DIM))
    tok = x_tokens.reshape(BL, 1).astype(jnp.int32)

    out = pl.pallas_call(
        make_fused_kernel(layout),
        out_shape=jax.ShapeDtypeStruct((BL, OUT_PAD), jnp.float32),
    )(tok, e, slab)
    return out[:, :S].reshape(B, L, S)


if __name__ == "__main__":
    key = jax.random.PRNGKey(0)
    pkey, xkey, tkey = jax.random.split(key, 3)
    slab, layout = build_slab(pkey)

    x_tokens = jax.random.randint(xkey, (B, L), 0, S, dtype=jnp.int32)
    t = jax.random.randint(tkey, (B,), 1, 100, dtype=jnp.int32)

    fwd = jax.jit(partial(sequence_transformer_forward, layout))
    out = jax.block_until_ready(fwd(slab, x_tokens, t))

    assert out.shape == (B, L, S), out.shape
    assert bool(jnp.all(jnp.isfinite(out)))
    # output softmax rows sum to 1 (exact division kept on the output softmax)
    assert bool(jnp.allclose(jnp.sum(out, axis=-1), 1.0, atol=1e-5))
    print("KERNEL_OK")
</pallas_src>

<mosaic_0001>
module attributes {stable_mosaic.version = 11 : i64} {
  func.func @kernel(%arg0: memref<16x1xi32, #tpu.memory_space<vmem>>, %arg1: memref<8x16xf32, #tpu.memory_space<vmem>>, %arg2: memref<656x128xf32, #tpu.memory_space<vmem>>, %arg3: memref<16x128xf32, #tpu.memory_space<vmem>>) attributes {dimension_semantics = [], scalar_prefetch = 0 : i64, scratch_operands = 0 : i64, tpu.core_type = #tpu.core_type<tc>} {
    %c0 = arith.constant 0 : index
    %c0_0 = arith.constant 0 : index
    %0 = vector.load %arg0[%c0, %c0_0] : memref<16x1xi32, #tpu.memory_space<vmem>>, vector<16x1xi32>
    %1 = tpu.iota {dimensions = array<i32: 1>} : vector<16x8xi32>
    %2 = vector.broadcast %0 : vector<16x1xi32> to vector<16x8xi32>
    %3 = arith.cmpi eq, %1, %2 : vector<16x8xi32>
    %4 = arith.extui %3 : vector<16x8xi1> to vector<16x8xi32>
    %5 = arith.sitofp %4 : vector<16x8xi32> to vector<16x8xf32>
    %6 = tpu.iota {dimensions = array<i32: 1>} : vector<16x128xi32>
    %7 = vector.broadcast %0 : vector<16x1xi32> to vector<16x128xi32>
    %8 = arith.cmpi eq, %6, %7 : vector<16x128xi32>
    %9 = arith.extui %8 : vector<16x128xi1> to vector<16x128xi32>
    %10 = arith.sitofp %9 : vector<16x128xi32> to vector<16x128xf32>
    %c0_1 = arith.constant 0 : index
    %c0_2 = arith.constant 0 : index
    %11 = vector.load %arg1[%c0_1, %c0_2] : memref<8x16xf32, #tpu.memory_space<vmem>>, vector<8x16xf32>
    %c0_3 = arith.constant 0 : index
    %c0_4 = arith.constant 0 : index
    %12 = vector.load %arg2[%c0_3, %c0_4] : memref<656x128xf32, #tpu.memory_space<vmem>>, vector<16x64xf32>
    %cst = arith.constant dense<0.000000e+00> : vector<8x64xf32>
    %13 = tpu.matmul %11, %12, %cst {dimension_numbers = #tpu.dot_dimension_numbers<[1], [0], [0], [1], [0, 0, 1, 1], [], []>} : vector<8x16xf32>, vector<16x64xf32>, vector<8x64xf32> -> vector<8x64xf32>
    %c16 = arith.constant 16 : index
    %c0_5 = arith.constant 0 : index
    %14 = vector.load %arg2[%c16, %c0_5] : memref<656x128xf32, #tpu.memory_space<vmem>>, vector<1x64xf32>
    %15 = vector.broadcast %14 : vector<1x64xf32> to vector<8x64xf32>
    %16 = arith.addf %13, %15 : vector<8x64xf32>
    %cst_6 = arith.constant 0.000000e+00 : f32
    %17 = vector.broadcast %cst_6 : f32 to vector<8x64xf32>
    %18 = arith.maximumf %16, %17 : vector<8x64xf32>
    %c24 = arith.constant 24 : index
    %c0_7 = arith.constant 0 : index
    %19 = vector.load %arg2[%c24, %c0_7] : memref<656x128xf32, #tpu.memory_space<vmem>>, vector<64x64xf32>
    %cst_8 = arith.constant dense<0.000000e+00> : vector<8x64xf32>
    %20 = tpu.matmul %18, %19, %cst_8 {dimension_numbers = #tpu.dot_dimension_numbers<[1], [0], [0], [1], [0, 0, 1, 1], [], []>} : vector<8x64xf32>, vector<64x64xf32>, vector<8x64xf32> -> vector<8x64xf32>
    %c16_9 = arith.constant 16 : index
    %c64 = arith.constant 64 : index
    %21 = vector.load %arg2[%c16_9, %c64] : memref<656x128xf32, #tpu.memory_space<vmem>>, vector<1x64xf32>
    %22 = vector.broadcast %21 : vector<1x64xf32> to vector<8x64xf32>
    %23 = arith.addf %20, %22 : vector<8x64xf32>
    %c240 = arith.constant 240 : index
    %c48 = arith.constant 48 : index
    %24 = vector.load %arg2[%c240, %c48] : memref<656x128xf32, #tpu.memory_space<vmem>>, vector<16x8xf32>
    %cst_10 = arith.constant dense<0.000000e+00> : vector<16x64xf32>
    %25 = tpu.matmul %24, %23, %cst_10 {dimension_numbers = #tpu.dot_dimension_numbers<[1], [0], [0], [1], [0, 0, 1, 1], [], []>} : vector<16x8xf32>, vector<8x64xf32>, vector<16x64xf32> -> vector<16x64xf32>
    %c88 = arith.constant 88 : index
    %c0_11 = arith.constant 0 : index
    %26 = vector.load %arg2[%c88, %c0_11] : memref<656x128xf32, #tpu.memory_space<vmem>>, vector<64x128xf32>
    %cst_12 = arith.constant dense<0.000000e+00> : vector<16x128xf32>
    %27 = tpu.matmul %25, %26, %cst_12 {dimension_numbers = #tpu.dot_dimension_numbers<[1], [0], [0], [1], [0, 0, 1, 1], [], []>} : vector<16x64xf32>, vector<64x128xf32>, vector<16x128xf32> -> vector<16x128xf32>
    %c216 = arith.constant 216 : index
    %c0_13 = arith.constant 0 : index
    %28 = vector.load %arg2[%c216, %c0_13] : memref<656x128xf32, #tpu.memory_space<vmem>>, vector<1x128xf32>
    %29 = vector.broadcast %28 : vector<1x128xf32> to vector<16x128xf32>
    %30 = arith.addf %27, %29 : vector<16x128xf32>
    %c152 = arith.constant 152 : index
    %c0_14 = arith.constant 0 : index
    %31 = vector.load %arg2[%c152, %c0_14] : memref<656x128xf32, #tpu.memory_space<vmem>>, vector<64x128xf32>
    %cst_15 = arith.constant dense<0.000000e+00> : vector<16x128xf32>
    %32 = tpu.matmul %25, %31, %cst_15 {dimension_numbers = #tpu.dot_dimension_numbers<[1], [0], [0], [1], [0, 0, 1, 1], [], []>} : vector<16x64xf32>, vector<64x128xf32>, vector<16x128xf32> -> vector<16x128xf32>
    %c224 = arith.constant 224 : index
    %c0_16 = arith.constant 0 : index
    %33 = vector.load %arg2[%c224, %c0_16] : memref<656x128xf32, #tpu.memory_space<vmem>>, vector<1x128xf32>
    %34 = vector.broadcast %33 : vector<1x128xf32> to vector<16x128xf32>
    %35 = arith.addf %32, %34 : vector<16x128xf32>
    %c232 = arith.constant 232 : index
    %c0_17 = arith.constant 0 : index
    %36 = vector.load %arg2[%c232, %c0_17] : memref<656x128xf32, #tpu.memory_space<vmem>>, vector<8x32xf32>
    %cst_18 = arith.constant dense<0.000000e+00> : vector<16x32xf32>
    %37 = tpu.matmul %5, %36, %cst_18 {dimension_numbers = #tpu.dot_dimension_numbers<[1], [0], [0], [1], [0, 0, 1, 1], [], []>} : vector<16x8xf32>, vector<8x32xf32>, vector<16x32xf32> -> vector<16x32xf32>
    %c240_19 = arith.constant 240 : index
    %c0_20 = arith.constant 0 : index
    %38 = vector.load %arg2[%c240_19, %c0_20] : memref<656x128xf32, #tpu.memory_space<vmem>>, vector<16x32xf32>
    %39 = arith.addf %37, %38 : vector<16x32xf32>
    %c240_21 = arith.constant 240 : index
    %c32 = arith.constant 32 : index
    %40 = vector.load %arg2[%c240_21, %c32] : memref<656x128xf32, #tpu.memory_space<vmem>>, vector<16x16xf32>
    %41 = vector.extract_strided_slice %30 {offsets = [0, 0], sizes = [16, 32], strides = [1, 1]} : vector<16x128xf32> to vector<16x32xf32>
    %42 = vector.extract_strided_slice %35 {offsets = [0, 0], sizes = [16, 32], strides = [1, 1]} : vector<16x128xf32> to vector<16x32xf32>
    %c256 = arith.constant 256 : index
    %c0_22 = arith.constant 0 : index
    %43 = vector.load %arg2[%c256, %c0_22] : memref<656x128xf32, #tpu.memory_space<vmem>>, vector<32x8xf32>
    %cst_23 = arith.constant dense<0.000000e+00> : vector<16x8xf32>
    %44 = tpu.matmul %39, %43, %cst_23 {dimension_numbers = #tpu.dot_dimension_numbers<[1], [0], [0], [1], [0, 0, 1, 1], [], []>} : vector<16x32xf32>, vector<32x8xf32>, vector<16x8xf32> -> vector<16x8xf32>
    %c288 = arith.constant 288 : index
    %c0_24 = arith.constant 0 : index
    %45 = vector.load %arg2[%c288, %c0_24] : memref<656x128xf32, #tpu.memory_space<vmem>>, vector<1x8xf32>
    %46 = vector.broadcast %45 : vector<1x8xf32> to vector<16x8xf32>
    %47 = arith.addf %44, %46 : vector<16x8xf32>
    %c256_25 = arith.constant 256 : index
    %c8 = arith.constant 8 : index
    %48 = vector.load %arg2[%c256_25, %c8] : memref<656x128xf32, #tpu.memory_space<vmem>>, vector<32x8xf32>
    %cst_26 = arith.constant dense<0.000000e+00> : vector<16x8xf32>
    %49 = tpu.matmul %39, %48, %cst_26 {dimension_numbers = #tpu.dot_dimension_numbers<[1], [0], [0], [1], [0, 0, 1, 1], [], []>} : vector<16x32xf32>, vector<32x8xf32>, vector<16x8xf32> -> vector<16x8xf32>
    %c288_27 = arith.constant 288 : index
    %c8_28 = arith.constant 8 : index
    %50 = vector.load %arg2[%c288_27, %c8_28] : memref<656x128xf32, #tpu.memory_space<vmem>>, vector<1x8xf32>
    %51 = vector.broadcast %50 : vector<1x8xf32> to vector<16x8xf32>
    %52 = arith.addf %49, %51 : vector<16x8xf32>
    %c256_29 = arith.constant 256 : index
    %c16_30 = arith.constant 16 : index
    %53 = vector.load %arg2[%c256_29, %c16_30] : memref<656x128xf32, #tpu.memory_space<vmem>>, vector<32x8xf32>
    %cst_31 = arith.constant dense<0.000000e+00> : vector<16x8xf32>
    %54 = tpu.matmul %39, %53, %cst_31 {dimension_numbers = #tpu.dot_dimension_numbers<[1], [0], [0], [1], [0, 0, 1, 1], [], []>} : vector<16x32xf32>, vector<32x8xf32>, vector<16x8xf32> -> vector<16x8xf32>
    %c288_32 = arith.constant 288 : index
    %c16_33 = arith.constant 16 : index
    %55 = vector.load %arg2[%c288_32, %c16_33] : memref<656x128xf32, #tpu.memory_space<vmem>>, vector<1x8xf32>
    %56 = vector.broadcast %55 : vector<1x8xf32> to vector<16x8xf32>
    %57 = arith.addf %54, %56 : vector<16x8xf32>
    %cst_34 = arith.constant dense<0.000000e+00> : vector<16x16xf32>
    %58 = tpu.matmul %47, %52, %cst_34 {dimension_numbers = #tpu.dot_dimension_numbers<[1], [1], [0], [0], [0, 0, 1, 0], [], []>} : vector<16x8xf32>, vector<16x8xf32>, vector<16x16xf32> -> vector<16x16xf32>
    %59 = arith.addf %58, %40 : vector<16x16xf32>
    %cst_35 = arith.constant dense<0xFF800000> : vector<16xf32>
    %60 = vector.multi_reduction <maximumf>, %59, %cst_35 [1] : vector<16x16xf32> to vector<16xf32>
    %61 = vector.shape_cast %60 : vector<16xf32> to vector<16x1xf32>
    %62 = vector.broadcast %61 : vector<16x1xf32> to vector<16x16xf32>
    %63 = arith.subf %59, %62 : vector<16x16xf32>
    %64 = math.exp %63 : vector<16x16xf32>
    %cst_36 = arith.constant dense<0.000000e+00> : vector<16xf32>
    %65 = vector.multi_reduction <add>, %64, %cst_36 [1] : vector<16x16xf32> to vector<16xf32>
    %66 = vector.shape_cast %65 : vector<16xf32> to vector<16x1xf32>
    %67 = tpu.reciprocal %66 {approx = true} : vector<16x1xf32> -> vector<16x1xf32>
    %68 = vector.broadcast %67 : vector<16x1xf32> to vector<16x16xf32>
    %69 = arith.mulf %64, %68 : vector<16x16xf32>
    %cst_37 = arith.constant dense<0.000000e+00> : vector<16x8xf32>
    %70 = tpu.matmul %69, %57, %cst_37 {dimension_numbers = #tpu.dot_dimension_numbers<[1], [0], [0], [1], [0, 0, 1, 1], [], []>} : vector<16x16xf32>, vector<16x8xf32>, vector<16x8xf32> -> vector<16x8xf32>
    %c256_38 = arith.constant 256 : index
    %c24_39 = arith.constant 24 : index
    %71 = vector.load %arg2[%c256_38, %c24_39] : memref<656x128xf32, #tpu.memory_space<vmem>>, vector<32x8xf32>
    %cst_40 = arith.constant dense<0.000000e+00> : vector<16x8xf32>
    %72 = tpu.matmul %39, %71, %cst_40 {dimension_numbers = #tpu.dot_dimension_numbers<[1], [0], [0], [1], [0, 0, 1, 1], [], []>} : vector<16x32xf32>, vector<32x8xf32>, vector<16x8xf32> -> vector<16x8xf32>
    %c288_41 = arith.constant 288 : index
    %c24_42 = arith.constant 24 : index
    %73 = vector.load %arg2[%c288_41, %c24_42] : memref<656x128xf32, #tpu.memory_space<vmem>>, vector<1x8xf32>
    %74 = vector.broadcast %73 : vector<1x8xf32> to vector<16x8xf32>
    %75 = arith.addf %72, %74 : vector<16x8xf32>
    %c256_43 = arith.constant 256 : index
    %c32_44 = arith.constant 32 : index
    %76 = vector.load %arg2[%c256_43, %c32_44] : memref<656x128xf32, #tpu.memory_space<vmem>>, vector<32x8xf32>
    %cst_45 = arith.constant dense<0.000000e+00> : vector<16x8xf32>
    %77 = tpu.matmul %39, %76, %cst_45 {dimension_numbers = #tpu.dot_dimension_numbers<[1], [0], [0], [1], [0, 0, 1, 1], [], []>} : vector<16x32xf32>, vector<32x8xf32>, vector<16x8xf32> -> vector<16x8xf32>
    %c288_46 = arith.constant 288 : index
    %c32_47 = arith.constant 32 : index
    %78 = vector.load %arg2[%c288_46, %c32_47] : memref<656x128xf32, #tpu.memory_space<vmem>>, vector<1x8xf32>
    %79 = vector.broadcast %78 : vector<1x8xf32> to vector<16x8xf32>
    %80 = arith.addf %77, %79 : vector<16x8xf32>
    %c256_48 = arith.constant 256 : index
    %c40 = arith.constant 40 : index
    %81 = vector.load %arg2[%c256_48, %c40] : memref<656x128xf32, #tpu.memory_space<vmem>>, vector<32x8xf32>
    %cst_49 = arith.constant dense<0.000000e+00> : vector<16x8xf32>
    %82 = tpu.matmul %39, %81, %cst_49 {dimension_numbers = #tpu.dot_dimension_numbers<[1], [0], [0], [1], [0, 0, 1, 1], [], []>} : vector<16x32xf32>, vector<32x8xf32>, vector<16x8xf32> -> vector<16x8xf32>
    %c288_50 = arith.constant 288 : index
    %c40_51 = arith.constant 40 : index
    %83 = vector.load %arg2[%c288_50, %c40_51] : memref<656x128xf32, #tpu.memory_space<vmem>>, vector<1x8xf32>
    %84 = vector.broadcast %83 : vector<1x8xf32> to vector<16x8xf32>
    %85 = arith.addf %82, %84 : vector<16x8xf32>
    %cst_52 = arith.constant dense<0.000000e+00> : vector<16x16xf32>
    %86 = tpu.matmul %75, %80, %cst_52 {dimension_numbers = #tpu.dot_dimension_numbers<[1], [1], [0], [0], [0, 0, 1, 0], [], []>} : vector<16x8xf32>, vector<16x8xf32>, vector<16x16xf32> -> vector<16x16xf32>
    %87 = arith.addf %86, %40 : vector<16x16xf32>
    %cst_53 = arith.constant dense<0xFF800000> : vector<16xf32>
    %88 = vector.multi_reduction <maximumf>, %87, %cst_53 [1] : vector<16x16xf32> to vector<16xf32>
    %89 = vector.shape_cast %88 : vector<16xf32> to vector<16x1xf32>
    %90 = vector.broadcast %89 : vector<16x1xf32> to vector<16x16xf32>
    %91 = arith.subf %87, %90 : vector<16x16xf32>
    %92 = math.exp %91 : vector<16x16xf32>
    %cst_54 = arith.constant dense<0.000000e+00> : vector<16xf32>
    %93 = vector.multi_reduction <add>, %92, %cst_54 [1] : vector<16x16xf32> to vector<16xf32>
    %94 = vector.shape_cast %93 : vector<16xf32> to vector<16x1xf32>
    %95 = tpu.reciprocal %94 {approx = true} : vector<16x1xf32> -> vector<16x1xf32>
    %96 = vector.broadcast %95 : vector<16x1xf32> to vector<16x16xf32>
    %97 = arith.mulf %92, %96 : vector<16x16xf32>
    %cst_55 = arith.constant dense<0.000000e+00> : vector<16x8xf32>
    %98 = tpu.matmul %97, %85, %cst_55 {dimension_numbers = #tpu.dot_dimension_numbers<[1], [0], [0], [1], [0, 0, 1, 1], [], []>} : vector<16x16xf32>, vector<16x8xf32>, vector<16x8xf32> -> vector<16x8xf32>
    %c256_56 = arith.constant 256 : index
    %c48_57 = arith.constant 48 : index
    %99 = vector.load %arg2[%c256_56, %c48_57] : memref<656x128xf32, #tpu.memory_space<vmem>>, vector<32x8xf32>
    %cst_58 = arith.constant dense<0.000000e+00> : vector<16x8xf32>
    %100 = tpu.matmul %39, %99, %cst_58 {dimension_numbers = #tpu.dot_dimension_numbers<[1], [0], [0], [1], [0, 0, 1, 1], [], []>} : vector<16x32xf32>, vector<32x8xf32>, vector<16x8xf32> -> vector<16x8xf32>
    %c288_59 = arith.constant 288 : index
    %c48_60 = arith.constant 48 : index
    %101 = vector.load %arg2[%c288_59, %c48_60] : memref<656x128xf32, #tpu.memory_space<vmem>>, vector<1x8xf32>
    %102 = vector.broadcast %101 : vector<1x8xf32> to vector<16x8xf32>
    %103 = arith.addf %100, %102 : vector<16x8xf32>
    %c256_61 = arith.constant 256 : index
    %c56 = arith.constant 56 : index
    %104 = vector.load %arg2[%c256_61, %c56] : memref<656x128xf32, #tpu.memory_space<vmem>>, vector<32x8xf32>
    %cst_62 = arith.constant dense<0.000000e+00> : vector<16x8xf32>
    %105 = tpu.matmul %39, %104, %cst_62 {dimension_numbers = #tpu.dot_dimension_numbers<[1], [0], [0], [1], [0, 0, 1, 1], [], []>} : vector<16x32xf32>, vector<32x8xf32>, vector<16x8xf32> -> vector<16x8xf32>
    %c288_63 = arith.constant 288 : index
    %c56_64 = arith.constant 56 : index
    %106 = vector.load %arg2[%c288_63, %c56_64] : memref<656x128xf32, #tpu.memory_space<vmem>>, vector<1x8xf32>
    %107 = vector.broadcast %106 : vector<1x8xf32> to vector<16x8xf32>
    %108 = arith.addf %105, %107 : vector<16x8xf32>
    %c256_65 = arith.constant 256 : index
    %c64_66 = arith.constant 64 : index
    %109 = vector.load %arg2[%c256_65, %c64_66] : memref<656x128xf32, #tpu.memory_space<vmem>>, vector<32x8xf32>
    %cst_67 = arith.constant dense<0.000000e+00> : vector<16x8xf32>
    %110 = tpu.matmul %39, %109, %cst_67 {dimension_numbers = #tpu.dot_dimension_numbers<[1], [0], [0], [1], [0, 0, 1, 1], [], []>} : vector<16x32xf32>, vector<32x8xf32>, vector<16x8xf32> -> vector<16x8xf32>
    %c288_68 = arith.constant 288 : index
    %c64_69 = arith.constant 64 : index
    %111 = vector.load %arg2[%c288_68, %c64_69] : memref<656x128xf32, #tpu.memory_space<vmem>>, vector<1x8xf32>
    %112 = vector.broadcast %111 : vector<1x8xf32> to vector<16x8xf32>
    %113 = arith.addf %110, %112 : vector<16x8xf32>
    %cst_70 = arith.constant dense<0.000000e+00> : vector<16x16xf32>
    %114 = tpu.matmul %103, %108, %cst_70 {dimension_numbers = #tpu.dot_dimension_numbers<[1], [1], [0], [0], [0, 0, 1, 0], [], []>} : vector<16x8xf32>, vector<16x8xf32>, vector<16x16xf32> -> vector<16x16xf32>
    %115 = arith.addf %114, %40 : vector<16x16xf32>
    %cst_71 = arith.constant dense<0xFF800000> : vector<16xf32>
    %116 = vector.multi_reduction <maximumf>, %115, %cst_71 [1] : vector<16x16xf32> to vector<16xf32>
    %117 = vector.shape_cast %116 : vector<16xf32> to vector<16x1xf32>
    %118 = vector.broadcast %117 : vector<16x1xf32> to vector<16x16xf32>
    %119 = arith.subf %115, %118 : vector<16x16xf32>
    %120 = math.exp %119 : vector<16x16xf32>
    %cst_72 = arith.constant dense<0.000000e+00> : vector<16xf32>
    %121 = vector.multi_reduction <add>, %120, %cst_72 [1] : vector<16x16xf32> to vector<16xf32>
    %122 = vector.shape_cast %121 : vector<16xf32> to vector<16x1xf32>
    %123 = tpu.reciprocal %122 {approx = true} : vector<16x1xf32> -> vector<16x1xf32>
    %124 = vector.broadcast %123 : vector<16x1xf32> to vector<16x16xf32>
    %125 = arith.mulf %120, %124 : vector<16x16xf32>
    %cst_73 = arith.constant dense<0.000000e+00> : vector<16x8xf32>
    %126 = tpu.matmul %125, %113, %cst_73 {dimension_numbers = #tpu.dot_dimension_numbers<[1], [0], [0], [1], [0, 0, 1, 1], [], []>} : vector<16x16xf32>, vector<16x8xf32>, vector<16x8xf32> -> vector<16x8xf32>
    %c256_74 = arith.constant 256 : index
    %c72 = arith.constant 72 : index
    %127 = vector.load %arg2[%c256_74, %c72] : memref<656x128xf32, #tpu.memory_space<vmem>>, vector<32x8xf32>
    %cst_75 = arith.constant dense<0.000000e+00> : vector<16x8xf32>
    %128 = tpu.matmul %39, %127, %cst_75 {dimension_numbers = #tpu.dot_dimension_numbers<[1], [0], [0], [1], [0, 0, 1, 1], [], []>} : vector<16x32xf32>, vector<32x8xf32>, vector<16x8xf32> -> vector<16x8xf32>
    %c288_76 = arith.constant 288 : index
    %c72_77 = arith.constant 72 : index
    %129 = vector.load %arg2[%c288_76, %c72_77] : memref<656x128xf32, #tpu.memory_space<vmem>>, vector<1x8xf32>
    %130 = vector.broadcast %129 : vector<1x8xf32> to vector<16x8xf32>
    %131 = arith.addf %128, %130 : vector<16x8xf32>
    %c256_78 = arith.constant 256 : index
    %c80 = arith.constant 80 : index
    %132 = vector.load %arg2[%c256_78, %c80] : memref<656x128xf32, #tpu.memory_space<vmem>>, vector<32x8xf32>
    %cst_79 = arith.constant dense<0.000000e+00> : vector<16x8xf32>
    %133 = tpu.matmul %39, %132, %cst_79 {dimension_numbers = #tpu.dot_dimension_numbers<[1], [0], [0], [1], [0, 0, 1, 1], [], []>} : vector<16x32xf32>, vector<32x8xf32>, vector<16x8xf32> -> vector<16x8xf32>
    %c288_80 = arith.constant 288 : index
    %c80_81 = arith.constant 80 : index
    %134 = vector.load %arg2[%c288_80, %c80_81] : memref<656x128xf32, #tpu.memory_space<vmem>>, vector<1x8xf32>
    %135 = vector.broadcast %134 : vector<1x8xf32> to vector<16x8xf32>
    %136 = arith.addf %133, %135 : vector<16x8xf32>
    %c256_82 = arith.constant 256 : index
    %c88_83 = arith.constant 88 : index
    %137 = vector.load %arg2[%c256_82, %c88_83] : memref<656x128xf32, #tpu.memory_space<vmem>>, vector<32x8xf32>
    %cst_84 = arith.constant dense<0.000000e+00> : vector<16x8xf32>
    %138 = tpu.matmul %39, %137, %cst_84 {dimension_numbers = #tpu.dot_dimension_numbers<[1], [0], [0], [1], [0, 0, 1, 1], [], []>} : vector<16x32xf32>, vector<32x8xf32>, vector<16x8xf32> -> vector<16x8xf32>
    %c288_85 = arith.constant 288 : index
    %c88_86 = arith.constant 88 : index
    %139 = vector.load %arg2[%c288_85, %c88_86] : memref<656x128xf32, #tpu.memory_space<vmem>>, vector<1x8xf32>
    %140 = vector.broadcast %139 : vector<1x8xf32> to vector<16x8xf32>
    %141 = arith.addf %138, %140 : vector<16x8xf32>
    %cst_87 = arith.constant dense<0.000000e+00> : vector<16x16xf32>
    %142 = tpu.matmul %131, %136, %cst_87 {dimension_numbers = #tpu.dot_dimension_numbers<[1], [1], [0], [0], [0, 0, 1, 0], [], []>} : vector<16x8xf32>, vector<16x8xf32>, vector<16x16xf32> -> vector<16x16xf32>
    %143 = arith.addf %142, %40 : vector<16x16xf32>
    %cst_88 = arith.constant dense<0xFF800000> : vector<16xf32>
    %144 = vector.multi_reduction <maximumf>, %143, %cst_88 [1] : vector<16x16xf32> to vector<16xf32>
    %145 = vector.shape_cast %144 : vector<16xf32> to vector<16x1xf32>
    %146 = vector.broadcast %145 : vector<16x1xf32> to vector<16x16xf32>
    %147 = arith.subf %143, %146 : vector<16x16xf32>
    %148 = math.exp %147 : vector<16x16xf32>
    %cst_89 = arith.constant dense<0.000000e+00> : vector<16xf32>
    %149 = vector.multi_reduction <add>, %148, %cst_89 [1] : vector<16x16xf32> to vector<16xf32>
    %150 = vector.shape_cast %149 : vector<16xf32> to vector<16x1xf32>
    %151 = tpu.reciprocal %150 {approx = true} : vector<16x1xf32> -> vector<16x1xf32>
    %152 = vector.broadcast %151 : vector<16x1xf32> to vector<16x16xf32>
    %153 = arith.mulf %148, %152 : vector<16x16xf32>
    %cst_90 = arith.constant dense<0.000000e+00> : vector<16x8xf32>
    %154 = tpu.matmul %153, %141, %cst_90 {dimension_numbers = #tpu.dot_dimension_numbers<[1], [0], [0], [1], [0, 0, 1, 1], [], []>} : vector<16x16xf32>, vector<16x8xf32>, vector<16x8xf32> -> vector<16x8xf32>
    %155 = tpu.concatenate %70, %98, %126, %154 in 1 : vector<16x8xf32>, vector<16x8xf32>, vector<16x8xf32>, vector<16x8xf32> -> vector<16x32xf32>
    %c336 = arith.constant 336 : index
    %c0_91 = arith.constant 0 : index
    %156 = vector.load %arg2[%c336, %c0_91] : memref<656x128xf32, #tpu.memory_space<vmem>>, vector<32x32xf32>
    %cst_92 = arith.constant dense<0.000000e+00> : vector<16x32xf32>
    %157 = tpu.matmul %155, %156, %cst_92 {dimension_numbers = #tpu.dot_dimension_numbers<[1], [0], [0], [1], [0, 0, 1, 1], [], []>} : vector<16x32xf32>, vector<32x32xf32>, vector<16x32xf32> -> vector<16x32xf32>
    %c368 = arith.constant 368 : index
    %c0_93 = arith.constant 0 : index
    %158 = vector.load %arg2[%c368, %c0_93] : memref<656x128xf32, #tpu.memory_space<vmem>>, vector<1x32xf32>
    %159 = vector.broadcast %158 : vector<1x32xf32> to vector<16x32xf32>
    %160 = arith.addf %157, %159 : vector<16x32xf32>
    %161 = arith.addf %39, %160 : vector<16x32xf32>
    %c384 = arith.constant 384 : index
    %c0_94 = arith.constant 0 : index
    %162 = vector.load %arg2[%c384, %c0_94] : memref<656x128xf32, #tpu.memory_space<vmem>>, vector<1x32xf32>
    %c384_95 = arith.constant 384 : index
    %c32_96 = arith.constant 32 : index
    %163 = vector.load %arg2[%c384_95, %c32_96] : memref<656x128xf32, #tpu.memory_space<vmem>>, vector<1x32xf32>
    %cst_97 = arith.constant dense<0.000000e+00> : vector<16xf32>
    %164 = vector.multi_reduction <add>, %161, %cst_97 [1] : vector<16x32xf32> to vector<16xf32>
    %165 = vector.shape_cast %164 : vector<16xf32> to vector<16x1xf32>
    %cst_98 = arith.constant 3.200000e+01 : f32
    %166 = vector.broadcast %cst_98 : f32 to vector<16x1xf32>
    %167 = arith.divf %165, %166 : vector<16x1xf32>
    %168 = vector.broadcast %167 : vector<16x1xf32> to vector<16x32xf32>
    %169 = arith.subf %161, %168 : vector<16x32xf32>
    %170 = arith.mulf %169, %169 : vector<16x32xf32>
    %cst_99 = arith.constant dense<0.000000e+00> : vector<16xf32>
    %171 = vector.multi_reduction <add>, %170, %cst_99 [1] : vector<16x32xf32> to vector<16xf32>
    %172 = vector.shape_cast %171 : vector<16xf32> to vector<16x1xf32>
    %cst_100 = arith.constant 3.200000e+01 : f32
    %173 = vector.broadcast %cst_100 : f32 to vector<16x1xf32>
    %174 = arith.divf %172, %173 : vector<16x1xf32>
    %cst_101 = arith.constant 9.99999974E-6 : f32
    %175 = vector.broadcast %cst_101 : f32 to vector<16x1xf32>
    %176 = arith.addf %174, %175 : vector<16x1xf32>
    %177 = math.rsqrt %176 : vector<16x1xf32>
    %178 = vector.broadcast %177 : vector<16x1xf32> to vector<16x32xf32>
    %179 = arith.mulf %169, %178 : vector<16x32xf32>
    %180 = vector.broadcast %162 : vector<1x32xf32> to vector<16x32xf32>
    %181 = arith.mulf %179, %180 : vector<16x32xf32>
    %182 = vector.broadcast %163 : vector<1x32xf32> to vector<16x32xf32>
    %183 = arith.addf %181, %182 : vector<16x32xf32>
    %184 = arith.mulf %41, %183 : vector<16x32xf32>
    %185 = arith.addf %184, %42 : vector<16x32xf32>
    %c400 = arith.constant 400 : index
    %c0_102 = arith.constant 0 : index
    %186 = vector.load %arg2[%c400, %c0_102] : memref<656x128xf32, #tpu.memory_space<vmem>>, vector<32x64xf32>
    %cst_103 = arith.constant dense<0.000000e+00> : vector<16x64xf32>
    %187 = tpu.matmul %185, %186, %cst_103 {dimension_numbers = #tpu.dot_dimension_numbers<[1], [0], [0], [1], [0, 0, 1, 1], [], []>} : vector<16x32xf32>, vector<32x64xf32>, vector<16x64xf32> -> vector<16x64xf32>
    %c376 = arith.constant 376 : index
    %c0_104 = arith.constant 0 : index
    %188 = vector.load %arg2[%c376, %c0_104] : memref<656x128xf32, #tpu.memory_space<vmem>>, vector<1x64xf32>
    %189 = vector.broadcast %188 : vector<1x64xf32> to vector<16x64xf32>
    %190 = arith.addf %187, %189 : vector<16x64xf32>
    %cst_105 = arith.constant 0.000000e+00 : f32
    %191 = vector.broadcast %cst_105 : f32 to vector<16x64xf32>
    %192 = arith.maximumf %190, %191 : vector<16x64xf32>
    %c432 = arith.constant 432 : index
    %c0_106 = arith.constant 0 : index
    %193 = vector.load %arg2[%c432, %c0_106] : memref<656x128xf32, #tpu.memory_space<vmem>>, vector<64x32xf32>
    %cst_107 = arith.constant dense<0.000000e+00> : vector<16x32xf32>
    %194 = tpu.matmul %192, %193, %cst_107 {dimension_numbers = #tpu.dot_dimension_numbers<[1], [0], [0], [1], [0, 0, 1, 1], [], []>} : vector<16x64xf32>, vector<64x32xf32>, vector<16x32xf32> -> vector<16x32xf32>
    %c368_108 = arith.constant 368 : index
    %c64_109 = arith.constant 64 : index
    %195 = vector.load %arg2[%c368_108, %c64_109] : memref<656x128xf32, #tpu.memory_space<vmem>>, vector<1x32xf32>
    %196 = vector.broadcast %195 : vector<1x32xf32> to vector<16x32xf32>
    %197 = arith.addf %194, %196 : vector<16x32xf32>
    %198 = arith.addf %185, %197 : vector<16x32xf32>
    %c384_110 = arith.constant 384 : index
    %c64_111 = arith.constant 64 : index
    %199 = vector.load %arg2[%c384_110, %c64_111] : memref<656x128xf32, #tpu.memory_space<vmem>>, vector<1x32xf32>
    %c384_112 = arith.constant 384 : index
    %c96 = arith.constant 96 : index
    %200 = vector.load %arg2[%c384_112, %c96] : memref<656x128xf32, #tpu.memory_space<vmem>>, vector<1x32xf32>
    %cst_113 = arith.constant dense<0.000000e+00> : vector<16xf32>
    %201 = vector.multi_reduction <add>, %198, %cst_113 [1] : vector<16x32xf32> to vector<16xf32>
    %202 = vector.shape_cast %201 : vector<16xf32> to vector<16x1xf32>
    %cst_114 = arith.constant 3.200000e+01 : f32
    %203 = vector.broadcast %cst_114 : f32 to vector<16x1xf32>
    %204 = arith.divf %202, %203 : vector<16x1xf32>
    %205 = vector.broadcast %204 : vector<16x1xf32> to vector<16x32xf32>
    %206 = arith.subf %198, %205 : vector<16x32xf32>
    %207 = arith.mulf %206, %206 : vector<16x32xf32>
    %cst_115 = arith.constant dense<0.000000e+00> : vector<16xf32>
    %208 = vector.multi_reduction <add>, %207, %cst_115 [1] : vector<16x32xf32> to vector<16xf32>
    %209 = vector.shape_cast %208 : vector<16xf32> to vector<16x1xf32>
    %cst_116 = arith.constant 3.200000e+01 : f32
    %210 = vector.broadcast %cst_116 : f32 to vector<16x1xf32>
    %211 = arith.divf %209, %210 : vector<16x1xf32>
    %cst_117 = arith.constant 9.99999974E-6 : f32
    %212 = vector.broadcast %cst_117 : f32 to vector<16x1xf32>
    %213 = arith.addf %211, %212 : vector<16x1xf32>
    %214 = math.rsqrt %213 : vector<16x1xf32>
    %215 = vector.broadcast %214 : vector<16x1xf32> to vector<16x32xf32>
    %216 = arith.mulf %206, %215 : vector<16x32xf32>
    %217 = vector.broadcast %199 : vector<1x32xf32> to vector<16x32xf32>
    %218 = arith.mulf %216, %217 : vector<16x32xf32>
    %219 = vector.broadcast %200 : vector<1x32xf32> to vector<16x32xf32>
    %220 = arith.addf %218, %219 : vector<16x32xf32>
    %221 = arith.mulf %41, %220 : vector<16x32xf32>
    %222 = arith.addf %221, %42 : vector<16x32xf32>
    %223 = vector.extract_strided_slice %30 {offsets = [0, 32], sizes = [16, 32], strides = [1, 1]} : vector<16x128xf32> to vector<16x32xf32>
    %224 = vector.extract_strided_slice %35 {offsets = [0, 32], sizes = [16, 32], strides = [1, 1]} : vector<16x128xf32> to vector<16x32xf32>
    %c296 = arith.constant 296 : index
    %c0_118 = arith.constant 0 : index
    %225 = vector.load %arg2[%c296, %c0_118] : memref<656x128xf32, #tpu.memory_space<vmem>>, vector<32x8xf32>
    %cst_119 = arith.constant dense<0.000000e+00> : vector<16x8xf32>
    %226 = tpu.matmul %222, %225, %cst_119 {dimension_numbers = #tpu.dot_dimension_numbers<[1], [0], [0], [1], [0, 0, 1, 1], [], []>} : vector<16x32xf32>, vector<32x8xf32>, vector<16x8xf32> -> vector<16x8xf32>
    %c328 = arith.constant 328 : index
    %c0_120 = arith.constant 0 : index
    %227 = vector.load %arg2[%c328, %c0_120] : memref<656x128xf32, #tpu.memory_space<vmem>>, vector<1x8xf32>
    %228 = vector.broadcast %227 : vector<1x8xf32> to vector<16x8xf32>
    %229 = arith.addf %226, %228 : vector<16x8xf32>
    %c296_121 = arith.constant 296 : index
    %c8_122 = arith.constant 8 : index
    %230 = vector.load %arg2[%c296_121, %c8_122] : memref<656x128xf32, #tpu.memory_space<vmem>>, vector<32x8xf32>
    %cst_123 = arith.constant dense<0.000000e+00> : vector<16x8xf32>
    %231 = tpu.matmul %222, %230, %cst_123 {dimension_numbers = #tpu.dot_dimension_numbers<[1], [0], [0], [1], [0, 0, 1, 1], [], []>} : vector<16x32xf32>, vector<32x8xf32>, vector<16x8xf32> -> vector<16x8xf32>
    %c328_124 = arith.constant 328 : index
    %c8_125 = arith.constant 8 : index
    %232 = vector.load %arg2[%c328_124, %c8_125] : memref<656x128xf32, #tpu.memory_space<vmem>>, vector<1x8xf32>
    %233 = vector.broadcast %232 : vector<1x8xf32> to vector<16x8xf32>
    %234 = arith.addf %231, %233 : vector<16x8xf32>
    %c296_126 = arith.constant 296 : index
    %c16_127 = arith.constant 16 : index
    %235 = vector.load %arg2[%c296_126, %c16_127] : memref<656x128xf32, #tpu.memory_space<vmem>>, vector<32x8xf32>
    %cst_128 = arith.constant dense<0.000000e+00> : vector<16x8xf32>
    %236 = tpu.matmul %222, %235, %cst_128 {dimension_numbers = #tpu.dot_dimension_numbers<[1], [0], [0], [1], [0, 0, 1, 1], [], []>} : vector<16x32xf32>, vector<32x8xf32>, vector<16x8xf32> -> vector<16x8xf32>
    %c328_129 = arith.constant 328 : index
    %c16_130 = arith.constant 16 : index
    %237 = vector.load %arg2[%c328_129, %c16_130] : memref<656x128xf32, #tpu.memory_space<vmem>>, vector<1x8xf32>
    %238 = vector.broadcast %237 : vector<1x8xf32> to vector<16x8xf32>
    %239 = arith.addf %236, %238 : vector<16x8xf32>
    %cst_131 = arith.constant dense<0.000000e+00> : vector<16x16xf32>
    %240 = tpu.matmul %229, %234, %cst_131 {dimension_numbers = #tpu.dot_dimension_numbers<[1], [1], [0], [0], [0, 0, 1, 0], [], []>} : vector<16x8xf32>, vector<16x8xf32>, vector<16x16xf32> -> vector<16x16xf32>
    %241 = arith.addf %240, %40 : vector<16x16xf32>
    %cst_132 = arith.constant dense<0xFF800000> : vector<16xf32>
    %242 = vector.multi_reduction <maximumf>, %241, %cst_132 [1] : vector<16x16xf32> to vector<16xf32>
    %243 = vector.shape_cast %242 : vector<16xf32> to vector<16x1xf32>
    %244 = vector.broadcast %243 : vector<16x1xf32> to vector<16x16xf32>
    %245 = arith.subf %241, %244 : vector<16x16xf32>
    %246 = math.exp %245 : vector<16x16xf32>
    %cst_133 = arith.constant dense<0.000000e+00> : vector<16xf32>
    %247 = vector.multi_reduction <add>, %246, %cst_133 [1] : vector<16x16xf32> to vector<16xf32>
    %248 = vector.shape_cast %247 : vector<16xf32> to vector<16x1xf32>
    %249 = tpu.reciprocal %248 {approx = true} : vector<16x1xf32> -> vector<16x1xf32>
    %250 = vector.broadcast %249 : vector<16x1xf32> to vector<16x16xf32>
    %251 = arith.mulf %246, %250 : vector<16x16xf32>
    %cst_134 = arith.constant dense<0.000000e+00> : vector<16x8xf32>
    %252 = tpu.matmul %251, %239, %cst_134 {dimension_numbers = #tpu.dot_dimension_numbers<[1], [0], [0], [1], [0, 0, 1, 1], [], []>} : vector<16x16xf32>, vector<16x8xf32>, vector<16x8xf32> -> vector<16x8xf32>
    %c296_135 = arith.constant 296 : index
    %c24_136 = arith.constant 24 : index
    %253 = vector.load %arg2[%c296_135, %c24_136] : memref<656x128xf32, #tpu.memory_space<vmem>>, vector<32x8xf32>
    %cst_137 = arith.constant dense<0.000000e+00> : vector<16x8xf32>
    %254 = tpu.matmul %222, %253, %cst_137 {dimension_numbers = #tpu.dot_dimension_numbers<[1], [0], [0], [1], [0, 0, 1, 1], [], []>} : vector<16x32xf32>, vector<32x8xf32>, vector<16x8xf32> -> vector<16x8xf32>
    %c328_138 = arith.constant 328 : index
    %c24_139 = arith.constant 24 : index
    %255 = vector.load %arg2[%c328_138, %c24_139] : memref<656x128xf32, #tpu.memory_space<vmem>>, vector<1x8xf32>
    %256 = vector.broadcast %255 : vector<1x8xf32> to vector<16x8xf32>
    %257 = arith.addf %254, %256 : vector<16x8xf32>
    %c296_140 = arith.constant 296 : index
    %c32_141 = arith.constant 32 : index
    %258 = vector.load %arg2[%c296_140, %c32_141] : memref<656x128xf32, #tpu.memory_space<vmem>>, vector<32x8xf32>
    %cst_142 = arith.constant dense<0.000000e+00> : vector<16x8xf32>
    %259 = tpu.matmul %222, %258, %cst_142 {dimension_numbers = #tpu.dot_dimension_numbers<[1], [0], [0], [1], [0, 0, 1, 1], [], []>} : vector<16x32xf32>, vector<32x8xf32>, vector<16x8xf32> -> vector<16x8xf32>
    %c328_143 = arith.constant 328 : index
    %c32_144 = arith.constant 32 : index
    %260 = vector.load %arg2[%c328_143, %c32_144] : memref<656x128xf32, #tpu.memory_space<vmem>>, vector<1x8xf32>
    %261 = vector.broadcast %260 : vector<1x8xf32> to vector<16x8xf32>
    %262 = arith.addf %259, %261 : vector<16x8xf32>
    %c296_145 = arith.constant 296 : index
    %c40_146 = arith.constant 40 : index
    %263 = vector.load %arg2[%c296_145, %c40_146] : memref<656x128xf32, #tpu.memory_space<vmem>>, vector<32x8xf32>
    %cst_147 = arith.constant dense<0.000000e+00> : vector<16x8xf32>
    %264 = tpu.matmul %222, %263, %cst_147 {dimension_numbers = #tpu.dot_dimension_numbers<[1], [0], [0], [1], [0, 0, 1, 1], [], []>} : vector<16x32xf32>, vector<32x8xf32>, vector<16x8xf32> -> vector<16x8xf32>
    %c328_148 = arith.constant 328 : index
    %c40_149 = arith.constant 40 : index
    %265 = vector.load %arg2[%c328_148, %c40_149] : memref<656x128xf32, #tpu.memory_space<vmem>>, vector<1x8xf32>
    %266 = vector.broadcast %265 : vector<1x8xf32> to vector<16x8xf32>
    %267 = arith.addf %264, %266 : vector<16x8xf32>
    %cst_150 = arith.constant dense<0.000000e+00> : vector<16x16xf32>
    %268 = tpu.matmul %257, %262, %cst_150 {dimension_numbers = #tpu.dot_dimension_numbers<[1], [1], [0], [0], [0, 0, 1, 0], [], []>} : vector<16x8xf32>, vector<16x8xf32>, vector<16x16xf32> -> vector<16x16xf32>
    %269 = arith.addf %268, %40 : vector<16x16xf32>
    %cst_151 = arith.constant dense<0xFF800000> : vector<16xf32>
    %270 = vector.multi_reduction <maximumf>, %269, %cst_151 [1] : vector<16x16xf32> to vector<16xf32>
    %271 = vector.shape_cast %270 : vector<16xf32> to vector<16x1xf32>
    %272 = vector.broadcast %271 : vector<16x1xf32> to vector<16x16xf32>
    %273 = arith.subf %269, %272 : vector<16x16xf32>
    %274 = math.exp %273 : vector<16x16xf32>
    %cst_152 = arith.constant dense<0.000000e+00> : vector<16xf32>
    %275 = vector.multi_reduction <add>, %274, %cst_152 [1] : vector<16x16xf32> to vector<16xf32>
    %276 = vector.shape_cast %275 : vector<16xf32> to vector<16x1xf32>
    %277 = tpu.reciprocal %276 {approx = true} : vector<16x1xf32> -> vector<16x1xf32>
    %278 = vector.broadcast %277 : vector<16x1xf32> to vector<16x16xf32>
    %279 = arith.mulf %274, %278 : vector<16x16xf32>
    %cst_153 = arith.constant dense<0.000000e+00> : vector<16x8xf32>
    %280 = tpu.matmul %279, %267, %cst_153 {dimension_numbers = #tpu.dot_dimension_numbers<[1], [0], [0], [1], [0, 0, 1, 1], [], []>} : vector<16x16xf32>, vector<16x8xf32>, vector<16x8xf32> -> vector<16x8xf32>
    %c296_154 = arith.constant 296 : index
    %c48_155 = arith.constant 48 : index
    %281 = vector.load %arg2[%c296_154, %c48_155] : memref<656x128xf32, #tpu.memory_space<vmem>>, vector<32x8xf32>
    %cst_156 = arith.constant dense<0.000000e+00> : vector<16x8xf32>
    %282 = tpu.matmul %222, %281, %cst_156 {dimension_numbers = #tpu.dot_dimension_numbers<[1], [0], [0], [1], [0, 0, 1, 1], [], []>} : vector<16x32xf32>, vector<32x8xf32>, vector<16x8xf32> -> vector<16x8xf32>
    %c328_157 = arith.constant 328 : index
    %c48_158 = arith.constant 48 : index
    %283 = vector.load %arg2[%c328_157, %c48_158] : memref<656x128xf32, #tpu.memory_space<vmem>>, vector<1x8xf32>
    %284 = vector.broadcast %283 : vector<1x8xf32> to vector<16x8xf32>
    %285 = arith.addf %282, %284 : vector<16x8xf32>
    %c296_159 = arith.constant 296 : index
    %c56_160 = arith.constant 56 : index
    %286 = vector.load %arg2[%c296_159, %c56_160] : memref<656x128xf32, #tpu.memory_space<vmem>>, vector<32x8xf32>
    %cst_161 = arith.constant dense<0.000000e+00> : vector<16x8xf32>
    %287 = tpu.matmul %222, %286, %cst_161 {dimension_numbers = #tpu.dot_dimension_numbers<[1], [0], [0], [1], [0, 0, 1, 1], [], []>} : vector<16x32xf32>, vector<32x8xf32>, vector<16x8xf32> -> vector<16x8xf32>
    %c328_162 = arith.constant 328 : index
    %c56_163 = arith.constant 56 : index
    %288 = vector.load %arg2[%c328_162, %c56_163] : memref<656x128xf32, #tpu.memory_space<vmem>>, vector<1x8xf32>
    %289 = vector.broadcast %288 : vector<1x8xf32> to vector<16x8xf32>
    %290 = arith.addf %287, %289 : vector<16x8xf32>
    %c296_164 = arith.constant 296 : index
    %c64_165 = arith.constant 64 : index
    %291 = vector.load %arg2[%c296_164, %c64_165] : memref<656x128xf32, #tpu.memory_space<vmem>>, vector<32x8xf32>
    %cst_166 = arith.constant dense<0.000000e+00> : vector<16x8xf32>
    %292 = tpu.matmul %222, %291, %cst_166 {dimension_numbers = #tpu.dot_dimension_numbers<[1], [0], [0], [1], [0, 0, 1, 1], [], []>} : vector<16x32xf32>, vector<32x8xf32>, vector<16x8xf32> -> vector<16x8xf32>
    %c328_167 = arith.constant 328 : index
    %c64_168 = arith.constant 64 : index
    %293 = vector.load %arg2[%c328_167, %c64_168] : memref<656x128xf32, #tpu.memory_space<vmem>>, vector<1x8xf32>
    %294 = vector.broadcast %293 : vector<1x8xf32> to vector<16x8xf32>
    %295 = arith.addf %292, %294 : vector<16x8xf32>
    %cst_169 = arith.constant dense<0.000000e+00> : vector<16x16xf32>
    %296 = tpu.matmul %285, %290, %cst_169 {dimension_numbers = #tpu.dot_dimension_numbers<[1], [1], [0], [0], [0, 0, 1, 0], [], []>} : vector<16x8xf32>, vector<16x8xf32>, vector<16x16xf32> -> vector<16x16xf32>
    %297 = arith.addf %296, %40 : vector<16x16xf32>
    %cst_170 = arith.constant dense<0xFF800000> : vector<16xf32>
    %298 = vector.multi_reduction <maximumf>, %297, %cst_170 [1] : vector<16x16xf32> to vector<16xf32>
    %299 = vector.shape_cast %298 : vector<16xf32> to vector<16x1xf32>
    %300 = vector.broadcast %299 : vector<16x1xf32> to vector<16x16xf32>
    %301 = arith.subf %297, %300 : vector<16x16xf32>
    %302 = math.exp %301 : vector<16x16xf32>
    %cst_171 = arith.constant dense<0.000000e+00> : vector<16xf32>
    %303 = vector.multi_reduction <add>, %302, %cst_171 [1] : vector<16x16xf32> to vector<16xf32>
    %304 = vector.shape_cast %303 : vector<16xf32> to vector<16x1xf32>
    %305 = tpu.reciprocal %304 {approx = true} : vector<16x1xf32> -> vector<16x1xf32>
    %306 = vector.broadcast %305 : vector<16x1xf32> to vector<16x16xf32>
    %307 = arith.mulf %302, %306 : vector<16x16xf32>
    %cst_172 = arith.constant dense<0.000000e+00> : vector<16x8xf32>
    %308 = tpu.matmul %307, %295, %cst_172 {dimension_numbers = #tpu.dot_dimension_numbers<[1], [0], [0], [1], [0, 0, 1, 1], [], []>} : vector<16x16xf32>, vector<16x8xf32>, vector<16x8xf32> -> vector<16x8xf32>
    %c296_173 = arith.constant 296 : index
    %c72_174 = arith.constant 72 : index
    %309 = vector.load %arg2[%c296_173, %c72_174] : memref<656x128xf32, #tpu.memory_space<vmem>>, vector<32x8xf32>
    %cst_175 = arith.constant dense<0.000000e+00> : vector<16x8xf32>
    %310 = tpu.matmul %222, %309, %cst_175 {dimension_numbers = #tpu.dot_dimension_numbers<[1], [0], [0], [1], [0, 0, 1, 1], [], []>} : vector<16x32xf32>, vector<32x8xf32>, vector<16x8xf32> -> vector<16x8xf32>
    %c328_176 = arith.constant 328 : index
    %c72_177 = arith.constant 72 : index
    %311 = vector.load %arg2[%c328_176, %c72_177] : memref<656x128xf32, #tpu.memory_space<vmem>>, vector<1x8xf32>
    %312 = vector.broadcast %311 : vector<1x8xf32> to vector<16x8xf32>
    %313 = arith.addf %310, %312 : vector<16x8xf32>
    %c296_178 = arith.constant 296 : index
    %c80_179 = arith.constant 80 : index
    %314 = vector.load %arg2[%c296_178, %c80_179] : memref<656x128xf32, #tpu.memory_space<vmem>>, vector<32x8xf32>
    %cst_180 = arith.constant dense<0.000000e+00> : vector<16x8xf32>
    %315 = tpu.matmul %222, %314, %cst_180 {dimension_numbers = #tpu.dot_dimension_numbers<[1], [0], [0], [1], [0, 0, 1, 1], [], []>} : vector<16x32xf32>, vector<32x8xf32>, vector<16x8xf32> -> vector<16x8xf32>
    %c328_181 = arith.constant 328 : index
    %c80_182 = arith.constant 80 : index
    %316 = vector.load %arg2[%c328_181, %c80_182] : memref<656x128xf32, #tpu.memory_space<vmem>>, vector<1x8xf32>
    %317 = vector.broadcast %316 : vector<1x8xf32> to vector<16x8xf32>
    %318 = arith.addf %315, %317 : vector<16x8xf32>
    %c296_183 = arith.constant 296 : index
    %c88_184 = arith.constant 88 : index
    %319 = vector.load %arg2[%c296_183, %c88_184] : memref<656x128xf32, #tpu.memory_space<vmem>>, vector<32x8xf32>
    %cst_185 = arith.constant dense<0.000000e+00> : vector<16x8xf32>
    %320 = tpu.matmul %222, %319, %cst_185 {dimension_numbers = #tpu.dot_dimension_numbers<[1], [0], [0], [1], [0, 0, 1, 1], [], []>} : vector<16x32xf32>, vector<32x8xf32>, vector<16x8xf32> -> vector<16x8xf32>
    %c328_186 = arith.constant 328 : index
    %c88_187 = arith.constant 88 : index
    %321 = vector.load %arg2[%c328_186, %c88_187] : memref<656x128xf32, #tpu.memory_space<vmem>>, vector<1x8xf32>
    %322 = vector.broadcast %321 : vector<1x8xf32> to vector<16x8xf32>
    %323 = arith.addf %320, %322 : vector<16x8xf32>
    %cst_188 = arith.constant dense<0.000000e+00> : vector<16x16xf32>
    %324 = tpu.matmul %313, %318, %cst_188 {dimension_numbers = #tpu.dot_dimension_numbers<[1], [1], [0], [0], [0, 0, 1, 0], [], []>} : vector<16x8xf32>, vector<16x8xf32>, vector<16x16xf32> -> vector<16x16xf32>
    %325 = arith.addf %324, %40 : vector<16x16xf32>
    %cst_189 = arith.constant dense<0xFF800000> : vector<16xf32>
    %326 = vector.multi_reduction <maximumf>, %325, %cst_189 [1] : vector<16x16xf32> to vector<16xf32>
    %327 = vector.shape_cast %326 : vector<16xf32> to vector<16x1xf32>
    %328 = vector.broadcast %327 : vector<16x1xf32> to vector<16x16xf32>
    %329 = arith.subf %325, %328 : vector<16x16xf32>
    %330 = math.exp %329 : vector<16x16xf32>
    %cst_190 = arith.constant dense<0.000000e+00> : vector<16xf32>
    %331 = vector.multi_reduction <add>, %330, %cst_190 [1] : vector<16x16xf32> to vector<16xf32>
    %332 = vector.shape_cast %331 : vector<16xf32> to vector<16x1xf32>
    %333 = tpu.reciprocal %332 {approx = true} : vector<16x1xf32> -> vector<16x1xf32>
    %334 = vector.broadcast %333 : vector<16x1xf32> to vector<16x16xf32>
    %335 = arith.mulf %330, %334 : vector<16x16xf32>
    %cst_191 = arith.constant dense<0.000000e+00> : vector<16x8xf32>
    %336 = tpu.matmul %335, %323, %cst_191 {dimension_numbers = #tpu.dot_dimension_numbers<[1], [0], [0], [1], [0, 0, 1, 1], [], []>} : vector<16x16xf32>, vector<16x8xf32>, vector<16x8xf32> -> vector<16x8xf32>
    %337 = tpu.concatenate %252, %280, %308, %336 in 1 : vector<16x8xf32>, vector<16x8xf32>, vector<16x8xf32>, vector<16x8xf32> -> vector<16x32xf32>
    %c336_192 = arith.constant 336 : index
    %c32_193 = arith.constant 32 : index
    %338 = vector.load %arg2[%c336_192, %c32_193] : memref<656x128xf32, #tpu.memory_space<vmem>>, vector<32x32xf32>
    %cst_194 = arith.constant dense<0.000000e+00> : vector<16x32xf32>
    %339 = tpu.matmul %337, %338, %cst_194 {dimension_numbers = #tpu.dot_dimension_numbers<[1], [0], [0], [1], [0, 0, 1, 1], [], []>} : vector<16x32xf32>, vector<32x32xf32>, vector<16x32xf32> -> vector<16x32xf32>
    %c368_195 = arith.constant 368 : index
    %c32_196 = arith.constant 32 : index
    %340 = vector.load %arg2[%c368_195, %c32_196] : memref<656x128xf32, #tpu.memory_space<vmem>>, vector<1x32xf32>
    %341 = vector.broadcast %340 : vector<1x32xf32> to vector<16x32xf32>
    %342 = arith.addf %339, %341 : vector<16x32xf32>
    %343 = arith.addf %222, %342 : vector<16x32xf32>
    %c392 = arith.constant 392 : index
    %c0_197 = arith.constant 0 : index
    %344 = vector.load %arg2[%c392, %c0_197] : memref<656x128xf32, #tpu.memory_space<vmem>>, vector<1x32xf32>
    %c392_198 = arith.constant 392 : index
    %c32_199 = arith.constant 32 : index
    %345 = vector.load %arg2[%c392_198, %c32_199] : memref<656x128xf32, #tpu.memory_space<vmem>>, vector<1x32xf32>
    %cst_200 = arith.constant dense<0.000000e+00> : vector<16xf32>
    %346 = vector.multi_reduction <add>, %343, %cst_200 [1] : vector<16x32xf32> to vector<16xf32>
    %347 = vector.shape_cast %346 : vector<16xf32> to vector<16x1xf32>
    %cst_201 = arith.constant 3.200000e+01 : f32
    %348 = vector.broadcast %cst_201 : f32 to vector<16x1xf32>
    %349 = arith.divf %347, %348 : vector<16x1xf32>
    %350 = vector.broadcast %349 : vector<16x1xf32> to vector<16x32xf32>
    %351 = arith.subf %343, %350 : vector<16x32xf32>
    %352 = arith.mulf %351, %351 : vector<16x32xf32>
    %cst_202 = arith.constant dense<0.000000e+00> : vector<16xf32>
    %353 = vector.multi_reduction <add>, %352, %cst_202 [1] : vector<16x32xf32> to vector<16xf32>
    %354 = vector.shape_cast %353 : vector<16xf32> to vector<16x1xf32>
    %cst_203 = arith.constant 3.200000e+01 : f32
    %355 = vector.broadcast %cst_203 : f32 to vector<16x1xf32>
    %356 = arith.divf %354, %355 : vector<16x1xf32>
    %cst_204 = arith.constant 9.99999974E-6 : f32
    %357 = vector.broadcast %cst_204 : f32 to vector<16x1xf32>
    %358 = arith.addf %356, %357 : vector<16x1xf32>
    %359 = math.rsqrt %358 : vector<16x1xf32>
    %360 = vector.broadcast %359 : vector<16x1xf32> to vector<16x32xf32>
    %361 = arith.mulf %351, %360 : vector<16x32xf32>
    %362 = vector.broadcast %344 : vector<1x32xf32> to vector<16x32xf32>
    %363 = arith.mulf %361, %362 : vector<16x32xf32>
    %364 = vector.broadcast %345 : vector<1x32xf32> to vector<16x32xf32>
    %365 = arith.addf %363, %364 : vector<16x32xf32>
    %366 = arith.mulf %223, %365 : vector<16x32xf32>
    %367 = arith.addf %366, %224 : vector<16x32xf32>
    %c400_205 = arith.constant 400 : index
    %c64_206 = arith.constant 64 : index
    %368 = vector.load %arg2[%c400_205, %c64_206] : memref<656x128xf32, #tpu.memory_space<vmem>>, vector<32x64xf32>
    %cst_207 = arith.constant dense<0.000000e+00> : vector<16x64xf32>
    %369 = tpu.matmul %367, %368, %cst_207 {dimension_numbers = #tpu.dot_dimension_numbers<[1], [0], [0], [1], [0, 0, 1, 1], [], []>} : vector<16x32xf32>, vector<32x64xf32>, vector<16x64xf32> -> vector<16x64xf32>
    %c376_208 = arith.constant 376 : index
    %c64_209 = arith.constant 64 : index
    %370 = vector.load %arg2[%c376_208, %c64_209] : memref<656x128xf32, #tpu.memory_space<vmem>>, vector<1x64xf32>
    %371 = vector.broadcast %370 : vector<1x64xf32> to vector<16x64xf32>
    %372 = arith.addf %369, %371 : vector<16x64xf32>
    %cst_210 = arith.constant 0.000000e+00 : f32
    %373 = vector.broadcast %cst_210 : f32 to vector<16x64xf32>
    %374 = arith.maximumf %372, %373 : vector<16x64xf32>
    %c432_211 = arith.constant 432 : index
    %c32_212 = arith.constant 32 : index
    %375 = vector.load %arg2[%c432_211, %c32_212] : memref<656x128xf32, #tpu.memory_space<vmem>>, vector<64x32xf32>
    %cst_213 = arith.constant dense<0.000000e+00> : vector<16x32xf32>
    %376 = tpu.matmul %374, %375, %cst_213 {dimension_numbers = #tpu.dot_dimension_numbers<[1], [0], [0], [1], [0, 0, 1, 1], [], []>} : vector<16x64xf32>, vector<64x32xf32>, vector<16x32xf32> -> vector<16x32xf32>
    %c368_214 = arith.constant 368 : index
    %c96_215 = arith.constant 96 : index
    %377 = vector.load %arg2[%c368_214, %c96_215] : memref<656x128xf32, #tpu.memory_space<vmem>>, vector<1x32xf32>
    %378 = vector.broadcast %377 : vector<1x32xf32> to vector<16x32xf32>
    %379 = arith.addf %376, %378 : vector<16x32xf32>
    %380 = arith.addf %367, %379 : vector<16x32xf32>
    %c392_216 = arith.constant 392 : index
    %c64_217 = arith.constant 64 : index
    %381 = vector.load %arg2[%c392_216, %c64_217] : memref<656x128xf32, #tpu.memory_space<vmem>>, vector<1x32xf32>
    %c392_218 = arith.constant 392 : index
    %c96_219 = arith.constant 96 : index
    %382 = vector.load %arg2[%c392_218, %c96_219] : memref<656x128xf32, #tpu.memory_space<vmem>>, vector<1x32xf32>
    %cst_220 = arith.constant dense<0.000000e+00> : vector<16xf32>
    %383 = vector.multi_reduction <add>, %380, %cst_220 [1] : vector<16x32xf32> to vector<16xf32>
    %384 = vector.shape_cast %383 : vector<16xf32> to vector<16x1xf32>
    %cst_221 = arith.constant 3.200000e+01 : f32
    %385 = vector.broadcast %cst_221 : f32 to vector<16x1xf32>
    %386 = arith.divf %384, %385 : vector<16x1xf32>
    %387 = vector.broadcast %386 : vector<16x1xf32> to vector<16x32xf32>
    %388 = arith.subf %380, %387 : vector<16x32xf32>
    %389 = arith.mulf %388, %388 : vector<16x32xf32>
    %cst_222 = arith.constant dense<0.000000e+00> : vector<16xf32>
    %390 = vector.multi_reduction <add>, %389, %cst_222 [1] : vector<16x32xf32> to vector<16xf32>
    %391 = vector.shape_cast %390 : vector<16xf32> to vector<16x1xf32>
    %cst_223 = arith.constant 3.200000e+01 : f32
    %392 = vector.broadcast %cst_223 : f32 to vector<16x1xf32>
    %393 = arith.divf %391, %392 : vector<16x1xf32>
    %cst_224 = arith.constant 9.99999974E-6 : f32
    %394 = vector.broadcast %cst_224 : f32 to vector<16x1xf32>
    %395 = arith.addf %393, %394 : vector<16x1xf32>
    %396 = math.rsqrt %395 : vector<16x1xf32>
    %397 = vector.broadcast %396 : vector<16x1xf32> to vector<16x32xf32>
    %398 = arith.mulf %388, %397 : vector<16x32xf32>
    %399 = vector.broadcast %381 : vector<1x32xf32> to vector<16x32xf32>
    %400 = arith.mulf %398, %399 : vector<16x32xf32>
    %401 = vector.broadcast %382 : vector<1x32xf32> to vector<16x32xf32>
    %402 = arith.addf %400, %401 : vector<16x32xf32>
    %403 = arith.mulf %223, %402 : vector<16x32xf32>
    %404 = arith.addf %403, %224 : vector<16x32xf32>
    %405 = vector.extract_strided_slice %30 {offsets = [0, 64], sizes = [16, 32], strides = [1, 1]} : vector<16x128xf32> to vector<16x32xf32>
    %406 = vector.extract_strided_slice %35 {offsets = [0, 64], sizes = [16, 32], strides = [1, 1]} : vector<16x128xf32> to vector<16x32xf32>
    %c496 = arith.constant 496 : index
    %c0_225 = arith.constant 0 : index
    %407 = vector.load %arg2[%c496, %c0_225] : memref<656x128xf32, #tpu.memory_space<vmem>>, vector<32x64xf32>
    %cst_226 = arith.constant dense<0.000000e+00> : vector<16x64xf32>
    %408 = tpu.matmul %404, %407, %cst_226 {dimension_numbers = #tpu.dot_dimension_numbers<[1], [0], [0], [1], [0, 0, 1, 1], [], []>} : vector<16x32xf32>, vector<32x64xf32>, vector<16x64xf32> -> vector<16x64xf32>
    %c592 = arith.constant 592 : index
    %c0_227 = arith.constant 0 : index
    %409 = vector.load %arg2[%c592, %c0_227] : memref<656x128xf32, #tpu.memory_space<vmem>>, vector<1x64xf32>
    %410 = vector.broadcast %409 : vector<1x64xf32> to vector<16x64xf32>
    %411 = arith.addf %408, %410 : vector<16x64xf32>
    %cst_228 = arith.constant 0.000000e+00 : f32
    %412 = vector.broadcast %cst_228 : f32 to vector<16x64xf32>
    %413 = arith.maximumf %411, %412 : vector<16x64xf32>
    %c528 = arith.constant 528 : index
    %c0_229 = arith.constant 0 : index
    %414 = vector.load %arg2[%c528, %c0_229] : memref<656x128xf32, #tpu.memory_space<vmem>>, vector<64x32xf32>
    %cst_230 = arith.constant dense<0.000000e+00> : vector<16x32xf32>
    %415 = tpu.matmul %413, %414, %cst_230 {dimension_numbers = #tpu.dot_dimension_numbers<[1], [0], [0], [1], [0, 0, 1, 1], [], []>} : vector<16x64xf32>, vector<64x32xf32>, vector<16x32xf32> -> vector<16x32xf32>
    %c600 = arith.constant 600 : index
    %c0_231 = arith.constant 0 : index
    %416 = vector.load %arg2[%c600, %c0_231] : memref<656x128xf32, #tpu.memory_space<vmem>>, vector<1x32xf32>
    %417 = vector.broadcast %416 : vector<1x32xf32> to vector<16x32xf32>
    %418 = arith.addf %415, %417 : vector<16x32xf32>
    %419 = arith.addf %404, %418 : vector<16x32xf32>
    %c600_232 = arith.constant 600 : index
    %c64_233 = arith.constant 64 : index
    %420 = vector.load %arg2[%c600_232, %c64_233] : memref<656x128xf32, #tpu.memory_space<vmem>>, vector<1x32xf32>
    %c608 = arith.constant 608 : index
    %c0_234 = arith.constant 0 : index
    %421 = vector.load %arg2[%c608, %c0_234] : memref<656x128xf32, #tpu.memory_space<vmem>>, vector<1x32xf32>
    %cst_235 = arith.constant dense<0.000000e+00> : vector<16xf32>
    %422 = vector.multi_reduction <add>, %419, %cst_235 [1] : vector<16x32xf32> to vector<16xf32>
    %423 = vector.shape_cast %422 : vector<16xf32> to vector<16x1xf32>
    %cst_236 = arith.constant 3.200000e+01 : f32
    %424 = vector.broadcast %cst_236 : f32 to vector<16x1xf32>
    %425 = arith.divf %423, %424 : vector<16x1xf32>
    %426 = vector.broadcast %425 : vector<16x1xf32> to vector<16x32xf32>
    %427 = arith.subf %419, %426 : vector<16x32xf32>
    %428 = arith.mulf %427, %427 : vector<16x32xf32>
    %cst_237 = arith.constant dense<0.000000e+00> : vector<16xf32>
    %429 = vector.multi_reduction <add>, %428, %cst_237 [1] : vector<16x32xf32> to vector<16xf32>
    %430 = vector.shape_cast %429 : vector<16xf32> to vector<16x1xf32>
    %cst_238 = arith.constant 3.200000e+01 : f32
    %431 = vector.broadcast %cst_238 : f32 to vector<16x1xf32>
    %432 = arith.divf %430, %431 : vector<16x1xf32>
    %cst_239 = arith.constant 9.99999974E-6 : f32
    %433 = vector.broadcast %cst_239 : f32 to vector<16x1xf32>
    %434 = arith.addf %432, %433 : vector<16x1xf32>
    %435 = math.rsqrt %434 : vector<16x1xf32>
    %436 = vector.broadcast %435 : vector<16x1xf32> to vector<16x32xf32>
    %437 = arith.mulf %427, %436 : vector<16x32xf32>
    %438 = vector.broadcast %420 : vector<1x32xf32> to vector<16x32xf32>
    %439 = arith.mulf %437, %438 : vector<16x32xf32>
    %440 = vector.broadcast %421 : vector<1x32xf32> to vector<16x32xf32>
    %441 = arith.addf %439, %440 : vector<16x32xf32>
    %442 = arith.mulf %405, %441 : vector<16x32xf32>
    %443 = arith.addf %442, %406 : vector<16x32xf32>
    %444 = vector.extract_strided_slice %30 {offsets = [0, 96], sizes = [16, 32], strides = [1, 1]} : vector<16x128xf32> to vector<16x32xf32>
    %445 = vector.extract_strided_slice %35 {offsets = [0, 96], sizes = [16, 32], strides = [1, 1]} : vector<16x128xf32> to vector<16x32xf32>
    %c496_240 = arith.constant 496 : index
    %c64_241 = arith.constant 64 : index
    %446 = vector.load %arg2[%c496_240, %c64_241] : memref<656x128xf32, #tpu.memory_space<vmem>>, vector<32x64xf32>
    %cst_242 = arith.constant dense<0.000000e+00> : vector<16x64xf32>
    %447 = tpu.matmul %443, %446, %cst_242 {dimension_numbers = #tpu.dot_dimension_numbers<[1], [0], [0], [1], [0, 0, 1, 1], [], []>} : vector<16x32xf32>, vector<32x64xf32>, vector<16x64xf32> -> vector<16x64xf32>
    %c592_243 = arith.constant 592 : index
    %c64_244 = arith.constant 64 : index
    %448 = vector.load %arg2[%c592_243, %c64_244] : memref<656x128xf32, #tpu.memory_space<vmem>>, vector<1x64xf32>
    %449 = vector.broadcast %448 : vector<1x64xf32> to vector<16x64xf32>
    %450 = arith.addf %447, %449 : vector<16x64xf32>
    %cst_245 = arith.constant 0.000000e+00 : f32
    %451 = vector.broadcast %cst_245 : f32 to vector<16x64xf32>
    %452 = arith.maximumf %450, %451 : vector<16x64xf32>
    %c528_246 = arith.constant 528 : index
    %c32_247 = arith.constant 32 : index
    %453 = vector.load %arg2[%c528_246, %c32_247] : memref<656x128xf32, #tpu.memory_space<vmem>>, vector<64x32xf32>
    %cst_248 = arith.constant dense<0.000000e+00> : vector<16x32xf32>
    %454 = tpu.matmul %452, %453, %cst_248 {dimension_numbers = #tpu.dot_dimension_numbers<[1], [0], [0], [1], [0, 0, 1, 1], [], []>} : vector<16x64xf32>, vector<64x32xf32>, vector<16x32xf32> -> vector<16x32xf32>
    %c600_249 = arith.constant 600 : index
    %c32_250 = arith.constant 32 : index
    %455 = vector.load %arg2[%c600_249, %c32_250] : memref<656x128xf32, #tpu.memory_space<vmem>>, vector<1x32xf32>
    %456 = vector.broadcast %455 : vector<1x32xf32> to vector<16x32xf32>
    %457 = arith.addf %454, %456 : vector<16x32xf32>
    %458 = arith.addf %443, %457 : vector<16x32xf32>
    %c600_251 = arith.constant 600 : index
    %c96_252 = arith.constant 96 : index
    %459 = vector.load %arg2[%c600_251, %c96_252] : memref<656x128xf32, #tpu.memory_space<vmem>>, vector<1x32xf32>
    %c608_253 = arith.constant 608 : index
    %c32_254 = arith.constant 32 : index
    %460 = vector.load %arg2[%c608_253, %c32_254] : memref<656x128xf32, #tpu.memory_space<vmem>>, vector<1x32xf32>
    %cst_255 = arith.constant dense<0.000000e+00> : vector<16xf32>
    %461 = vector.multi_reduction <add>, %458, %cst_255 [1] : vector<16x32xf32> to vector<16xf32>
    %462 = vector.shape_cast %461 : vector<16xf32> to vector<16x1xf32>
    %cst_256 = arith.constant 3.200000e+01 : f32
    %463 = vector.broadcast %cst_256 : f32 to vector<16x1xf32>
    %464 = arith.divf %462, %463 : vector<16x1xf32>
    %465 = vector.broadcast %464 : vector<16x1xf32> to vector<16x32xf32>
    %466 = arith.subf %458, %465 : vector<16x32xf32>
    %467 = arith.mulf %466, %466 : vector<16x32xf32>
    %cst_257 = arith.constant dense<0.000000e+00> : vector<16xf32>
    %468 = vector.multi_reduction <add>, %467, %cst_257 [1] : vector<16x32xf32> to vector<16xf32>
    %469 = vector.shape_cast %468 : vector<16xf32> to vector<16x1xf32>
    %cst_258 = arith.constant 3.200000e+01 : f32
    %470 = vector.broadcast %cst_258 : f32 to vector<16x1xf32>
    %471 = arith.divf %469, %470 : vector<16x1xf32>
    %cst_259 = arith.constant 9.99999974E-6 : f32
    %472 = vector.broadcast %cst_259 : f32 to vector<16x1xf32>
    %473 = arith.addf %471, %472 : vector<16x1xf32>
    %474 = math.rsqrt %473 : vector<16x1xf32>
    %475 = vector.broadcast %474 : vector<16x1xf32> to vector<16x32xf32>
    %476 = arith.mulf %466, %475 : vector<16x32xf32>
    %477 = vector.broadcast %459 : vector<1x32xf32> to vector<16x32xf32>
    %478 = arith.mulf %476, %477 : vector<16x32xf32>
    %479 = vector.broadcast %460 : vector<1x32xf32> to vector<16x32xf32>
    %480 = arith.addf %478, %479 : vector<16x32xf32>
    %481 = arith.mulf %444, %480 : vector<16x32xf32>
    %482 = arith.addf %481, %445 : vector<16x32xf32>
    %c616 = arith.constant 616 : index
    %c0_260 = arith.constant 0 : index
    %483 = vector.load %arg2[%c616, %c0_260] : memref<656x128xf32, #tpu.memory_space<vmem>>, vector<32x128xf32>
    %cst_261 = arith.constant dense<0.000000e+00> : vector<16x128xf32>
    %484 = tpu.matmul %482, %483, %cst_261 {dimension_numbers = #tpu.dot_dimension_numbers<[1], [0], [0], [1], [0, 0, 1, 1], [], []>} : vector<16x32xf32>, vector<32x128xf32>, vector<16x128xf32> -> vector<16x128xf32>
    %c648 = arith.constant 648 : index
    %c0_262 = arith.constant 0 : index
    %485 = vector.load %arg2[%c648, %c0_262] : memref<656x128xf32, #tpu.memory_space<vmem>>, vector<1x128xf32>
    %486 = vector.broadcast %485 : vector<1x128xf32> to vector<16x128xf32>
    %487 = arith.addf %484, %486 : vector<16x128xf32>
    %488 = arith.addf %487, %10 : vector<16x128xf32>
    %cst_263 = arith.constant dense<0xFF800000> : vector<16xf32>
    %489 = vector.multi_reduction <maximumf>, %488, %cst_263 [1] : vector<16x128xf32> to vector<16xf32>
    %490 = vector.shape_cast %489 : vector<16xf32> to vector<16x1xf32>
    %491 = vector.broadcast %490 : vector<16x1xf32> to vector<16x128xf32>
    %492 = arith.subf %488, %491 : vector<16x128xf32>
    %493 = math.exp %492 : vector<16x128xf32>
    %cst_264 = arith.constant dense<0.000000e+00> : vector<16xf32>
    %494 = vector.multi_reduction <add>, %493, %cst_264 [1] : vector<16x128xf32> to vector<16xf32>
    %495 = vector.shape_cast %494 : vector<16xf32> to vector<16x1xf32>
    %496 = vector.broadcast %495 : vector<16x1xf32> to vector<16x128xf32>
    %497 = arith.divf %493, %496 : vector<16x128xf32>
    %c0_265 = arith.constant 0 : index
    %c0_266 = arith.constant 0 : index
    %498 = vector.load %arg3[%c0_265, %c0_266] : memref<16x128xf32, #tpu.memory_space<vmem>>, vector<16x128xf32>
    tpu.vector_store %arg3[%c0_265, %c0_266], %497 {strides = array<i32>} : memref<16x128xf32, #tpu.memory_space<vmem>>, vector<16x128xf32>,
    return
  }
}

</mosaic_0001>

<bundles_post_ra>
// kernel: sequence_transformer_forward.1
= control target key start
LH: loop header
LB: loop body
LE: loop exit
PB: predicated region body
PF: predicated region fallthrough
CT: control target
= control target key end

     0   :  { %8 = vsyncpa [#allocation3], 0  ;;  %s3536_s15 = smov [#allocation2]   ;;  %s3537_s17 = smov 128   ;;  %s4405_s0 = inlined_call_operand.vmem [shape: s32[16,1], index: 0, kind: input, shape index: {}]   ;;  %s4406_s1 = inlined_call_operand.vmem [shape: f32[8,16], index: 1, kind: input, shape index: {}]   ;;  %s4407_s2 = inlined_call_operand.hbm [shape: f32[656,128], index: 2, kind: input, shape index: {}]   ;;  %s4408_s3 = inlined_call_operand.vmem [shape: f32[16,128], index: 3, kind: output, shape index: {}]  }
   0x1   :  { %s17_s14 = sshll.u32 %s4407_s2, 4  ;;  %s19_s16 = sshll.u32 %s3536_s15, 4  ;;  %s18_s14 = int_to_ptr.hbm [resolvable:$true] %s17_s14  ;;  %s20_s16 = int_to_ptr.vmem [resolvable:$true] %s19_s16 }
   0x2   :  { %s3538_s18 = smov 8  }
   0x3   :  { %25 = dma.hbm_to_vmem [thread:$0]  %s18_s14, 10496, %s20_s16, [#allocation3], %s3537_s17, %s3537_s17, %s3538_s18  }
   0x4   :  { %3534 = dma.done.wait [#allocation3], 10496  }
   0x5   :  { %3535 = vsyncadd [#allocation3], 4294956800  ;;  %v3539_v0 = vmov 0   ;;  %v48_v1 = vld [vmem:[#allocation2 + $0x8] sm:$0xff]  ;;  %v47_v2 = vld [vmem:[#allocation2] sm:$0xff]  ;;  %vm51_vm0 = vcmask 130048   ;;  %v32_v24 = vlaneseq }
   0x6   :  { %3102 = vset.pattern.permute.xlu0 %v3539_v0  ;;  %69 = vmatpush.msra.mxu0 %v48_v1  ;;  %v46_v3 = vld [vmem:[%s4406_s1] sm:$0xff]  ;;  %v3586_v5 = vld [vmem:[#allocation2 + $0x10] ss:$0 sm:$0xff]  ;;  %v82_v7 = vld [vmem:[#allocation2 + $0x48] sm:$0xff]  ;;  %s3540_s22 = smov 64   ;;  %s3541_s24 = smov 80  }
   0x7   :  { %v30_v4 = vld [vmem:[%s4405_s0] sm:$0xff]  ;;  %v83_v6 = vld [vmem:[#allocation2 + $0x50] sm:$0xff]  ;;  %85 = vrot.lane.b32.xlu1 %v3586_v5, %s3540_s22  ;;  %v31_v8 = vld [vmem:[%s4405_s0 + $0x8] sm:$0xff]  ;;  %s3542_s0 = smov 120   ;;  %s3543_s25 = smov 112   ;;  %v33_v26 = vand.u32 127, %v32_v24 }
   0x8   :  { %35 = vperm.xlu0 %3102, %v30_v4   ;;  %70 = vmatpush.msra.mxu0 %v47_v2  ;;  %v81_v9 = vld [vmem:[#allocation2 + $0x40] sm:$0xff]  ;;  %v220_v10 = vld [vmem:[#allocation2 + $0xe8] sm:$0xff]  ;;  %v3594_v11 = vld [vmem:[#allocation2 + $0xf0] sm:$0xff]  ;;  %s3544_s26 = smov 96   ;;  %s3545_s27 = smov 104   ;;  %vm120_vm1 = vcmask 64512  }
   0x9   :  { %100 = vmatpush.msra.mxu1 %v83_v6  ;;  %2950 = vmatmul.msk.f32.vlgmr.msra.gmra.mxu0 %vm51_vm0, %v46_v3  ;;  %v80_v12 = vld [vmem:[#allocation2 + $0x38] sm:$0xff]  ;;  %v250_v13 = vld [vmem:[#allocation2 + $0x100] sm:$0xff]  ;;  %v79_v14 = vld [vmem:[#allocation2 + $0x30] sm:$0xff]  ;;  %v3546_v28 = vmov 0.0   ;;  %vm88_vm4 = vcmask 523264   ;;  %vm256_vm5 = vcmask 261120  }
   0xa   :  { %242 = vmatpush.msrb.mxu0 %v220_v10  ;;  %v251_v15 = vld [vmem:[#allocation2 + $0x108] sm:$0xff]  ;;  %v252_v18 = vld [vmem:[#allocation2 + $0x110] sm:$0xff]  ;;  %v253_v19 = vld [vmem:[#allocation2 + $0x118] sm:$0xff]  ;;  %s3547_s28 = smov 88   ;;  %s3548_s29 = smov 72   ;;  %vm1087_vm6 = vcmask 195584  }
   0xb   :  { %101 = vmatpush.msra.mxu1 %v82_v7  ;;  %v3598_v16 = vpack.i.bf16 %v250_v13, %v251_v15  ;;  %v78_v17 = vld [vmem:[#allocation2 + $0x28] sm:$0xff]  ;;  %v77_v20 = vld [vmem:[#allocation2 + $0x20] sm:$0xff]  ;;  %v3602_v21 = vpack.i.bf16 %v252_v18, %v253_v19  ;;  %v76_v22 = vld [vmem:[#allocation2 + $0x18] sm:$0xff]  ;;  %s3549_s30 = smov 48   ;;  %s3550_s4 = smov 56  }
   0xc   :  { %v3606_v23 = vld [vmem:[#allocation2 + $0x120] ss:$0 sm:$0xff]  ;;  %v113_v25 = vld [vmem:[#allocation2 + $0xf8] sm:$0xff]  ;;  %v194_v59 = vld [vmem:[#allocation2 + $0xd0] sm:$0xff]  ;;  %s3551_s5 = smov 40   ;;  %s3552_s6 = smov 16  }
   0xd   :  { %102 = vmatpush.msra.mxu1 %v81_v9  ;;  %3104 = vrot.lane.b32.xlu2 %v3602_v21, %s3542_s0  ;;  %v155_v60 = vld [vmem:[#allocation2 + $0x90] sm:$0xff]  ;;  %v193_v61 = vld [vmem:[#allocation2 + $0xc8] sm:$0xff]  ;;  %v192_v63 = vld [vmem:[#allocation2 + $0xc0] sm:$0xff]  ;;  %s3553_s7 = smov 24   ;;  %s3555_s8 = smov 32  }
   0xe   :  { %172 = vmatpush.msra.mxu3 %v155_v60  ;;  %v154_v62 = vld [vmem:[#allocation2 + $0x88] sm:$0xff]  ;;  %v153_v0 = vld [vmem:[#allocation2 + $0x80] sm:$0xff]  ;;  %v191_v1 = vld [vmem:[#allocation2 + $0xb8] sm:$0xff] }
   0xf   :  { %116 = vrot.lane.b32.xlu1 %v3594_v11, %s3541_s24  ;;  %103 = vmatpush.msra.mxu1 %v80_v12  ;;  %v152_v2 = vld [vmem:[#allocation2 + $0x78] sm:$0xff]  ;;  %v190_v3 = vld [vmem:[#allocation2 + $0xb0] sm:$0xff]  ;;  %v150_v6 = vld [vmem:[#allocation2 + $0x68] sm:$0xff] }
  0x10   :  { %38 = vperm.xlu0 %3102, %v31_v8   ;;  %173 = vmatpush.msra.mxu3 %v154_v62  ;;  %v151_v4 = vld [vmem:[#allocation2 + $0x70] sm:$0xff]  ;;  %v188_v7 = vld [vmem:[#allocation2 + $0xa0] sm:$0xff]  ;;  %v187_v10 = vld [vmem:[#allocation2 + $0x98] sm:$0xff] }
  0x11   :  { %104 = vmatpush.msra.mxu1 %v79_v14  ;;  %v149_v9 = vld [vmem:[#allocation2 + $0x60] sm:$0xff]  ;;  %v148_v12 = vld [vmem:[#allocation2 + $0x58] sm:$0xff] }
  0x12   :  { %174 = vmatpush.msra.mxu3 %v153_v0 }
  0x13   :  { %105 = vmatpush.msra.mxu1 %v78_v17 }
  0x14   :  { %175 = vmatpush.msra.mxu3 %v152_v2 }
  0x15   :  { %106 = vmatpush.msra.mxu1 %v77_v20  ;;  %118 = vrot.lane.b32.xlu2 %v113_v25, %s3541_s24 }
  0x16   :  { %176 = vmatpush.msra.mxu3 %v151_v4 }
  0x17   :  { %3114 = vrot.lane.b32.xlu1 %v3602_v21, %s3543_s25  ;;  %107 = vmatpush.msra.mxu1 %v76_v22 }
  0x18   :  { %3109 = vrot.lane.b32.xlu0 %v3598_v16, %s3542_s0  ;;  %177 = vmatpush.msra.mxu3 %v150_v6 }
  0x19   :  { %275 = vmatpush.msrb.mxu1 %v253_v19 }
  0x1a   :  { %178 = vmatpush.msra.mxu3 %v149_v9 }
  0x1b   :  { %276 = vmatpush.msrb.mxu1 %v252_v18 }
  0x1c   :  { %179 = vmatpush.msra.mxu3 %v148_v12 }
  0x1d   :  { %277 = vmatpush.msrb.mxu1 %v251_v15  ;;  %3119 = vrot.lane.b32.xlu2 %v3598_v16, %s3543_s25 }
  0x1f   :  { %3124 = vrot.lane.b32.xlu1 %v3602_v21, %s3544_s26  ;;  %278 = vmatpush.msrb.mxu1 %v250_v13 }
  0x20   :  { %303 = vrot.lane.b32.xlu0 %v3606_v23, %s3542_s0 }
  0x25   :  { %3129 = vrot.lane.b32.xlu2 %v3598_v16, %s3544_s26 }
  0x27   :  { %3139 = vrot.lane.b32.xlu1 %v3598_v16, %s3545_s27 }
  0x28   :  { %3134 = vrot.lane.b32.xlu0 %v3602_v21, %s3545_s27 }
  0x2d   :  { %367 = vrot.lane.b32.xlu2 %v3594_v11, %s3544_s26 }
  0x30   :  { %369 = vrot.lane.b32.xlu0 %v113_v25, %s3544_s26 }
  0x67   :  { %v3105_v36 = vpop.permute.xlu2 %3104 }
  0x68   :  { %v3107_v37 = vunpack.i.h.bf16 %v3105_v36  ;;  %v3106_v38 = vunpack.i.l.bf16 %v3105_v36 }
  0x6a   :  { %318 = vmatpush.msra.mxu0 %v3106_v38 }
  0x6c   :  { %319 = vmatpush.msra.mxu0 %v3107_v37 }
  0x6f   :  { %v119_v58 = vpop.permute.xlu2 %118 }
  0x77   :  { %v3120_v13 = vpop.permute.xlu2 %3119 }
  0x78   :  { %v3121_v14 = vunpack.i.l.bf16 %v3120_v13  ;;  %v3122_v15 = vunpack.i.h.bf16 %v3120_v13 }
  0x79   :  { %v86_v35 = vpop.permute.xlu1 %85 }
  0x7a   :  { %v36_v27 = vpop.permute.xlu0 %35 }
  0x7b   :  { %vm40_vm2 = vcmp.eq.s32.totalorder %v33_v26, %v36_v27 }
  0x7c   :  { %v3619_v29 = vsel %vm40_vm2, 1.0, %v3546_v28 }
  0x7d   :  { %2958 = vmatmul.msk.f32.vlgmr.msrb.gmra.mxu0 %vm120_vm1, %v3619_v29 }
  0x7f   :  { %v3130_v22 = vpop.permute.xlu2 %3129 }
  0x80   :  { %v3131_v27 = vunpack.i.l.bf16 %v3130_v22 }
  0x81   :  { %v117_v39 = vpop.permute.xlu1 %116 }
  0x82   :  { %v39_v30 = vpop.permute.xlu0 %38 }
  0x83   :  { %vm41_vm3 = vcmp.eq.s32.totalorder %v33_v26, %v39_v30 }
  0x84   :  { %v3624_v31 = vsel %vm41_vm3, 1.0, %v3546_v28  ;;  %v3132_v28 = vunpack.i.h.bf16 %v3130_v22 }
  0x85   :  { %2959 = vmatmul.msk.f32.gmra.mxu0 %vm120_vm1, %v3624_v31 }
  0x86   :  { %v72_v32 = vpop.f32.mrf.mxu0 }
  0x87   :  { %v73_v33 = vadd.f32 %v3586_v5, %v72_v32  ;;  %v189_v5 = vld [vmem:[#allocation2 + $0xa8] sm:$0xff] }
  0x89   :  { %v75_v34 = vmax.f32 %v73_v33, 0.0  ;;  %v3630_v43 = vpop.permute.xlu1 %3114 }
  0x8a   :  { %v3110_v40 = vpop.permute.xlu0 %3109  ;;  %v3116_v8 = vunpack.i.l.bf16 %v3630_v43 }
  0x8b   :  { %2951 = vmatmul.msk.f32.vlgmr.msra.gmra.mxu1 %vm88_vm4, %v75_v34  ;;  %v3112_v41 = vunpack.i.h.bf16 %v3110_v40  ;;  %v3111_v42 = vunpack.i.l.bf16 %v3110_v40 }
  0x8c   :  { %3078 = vmatpush.msrb.mxu3 %v3116_v8 }
  0x8d   :  { %320 = vmatpush.msra.mxu0 %v3111_v42 }
  0x8f   :  { %321 = vmatpush.msra.mxu0 %v3112_v41 }
  0x91   :  { %v3634_v45 = vpop.permute.xlu1 %3124 }
  0x92   :  { %v3632_v44 = vpop.permute.xlu0 %303  ;;  %v3126_v19 = vunpack.i.l.bf16 %v3634_v45  ;;  %v3127_v24 = vunpack.i.h.bf16 %v3634_v45 }
  0x99   :  { %v3140_v49 = vpop.permute.xlu1 %3139 }
  0x9a   :  { %v3135_v46 = vpop.permute.xlu0 %3134  ;;  %v3142_v50 = vunpack.i.h.bf16 %v3140_v49  ;;  %v3141_v51 = vunpack.i.l.bf16 %v3140_v49 }
  0x9b   :  { %v3137_v47 = vunpack.i.h.bf16 %v3135_v46  ;;  %v3136_v48 = vunpack.i.l.bf16 %v3135_v46 }
  0x9d   :  { %486 = vmatpush.msrb.mxu0 %v3136_v48 }
  0x9f   :  { %487 = vmatpush.msrb.mxu0 %v3137_v47 }
  0xa1   :  { %488 = vmatpush.msrb.mxu0 %v3141_v51 }
  0xa3   :  { %489 = vmatpush.msrb.mxu0 %v3142_v50 }
  0xfa   :  { %v244_v52 = vpop.f32.mrf.mxu0 }
  0xfb   :  { %v3639_v53 = vadd.f32 %v244_v52, %v3594_v11  ;;  %v3117_v11 = vunpack.i.h.bf16 %v3630_v43  ;;  %v3693_v43 = vpop.permute.xlu0 %369 }
  0xfd   :  { %2962 = vmatmul.msk.f32.vlgmr.msra.gmra.mxu0 %vm256_vm5, %v3639_v53  ;;  %2960 = vmatmul.msk.f32.vlgmr.msrb.gmra.mxu1 %vm256_vm5, %v3639_v53 }
  0xfe   :  { %3079 = vmatpush.msrb.mxu3 %v3117_v11 }
 0x100   :  { %3080 = vmatpush.msrb.mxu3 %v3121_v14 }
 0x102   :  { %v247_v54 = vpop.f32.mrf.mxu0  ;;  %3081 = vmatpush.msrb.mxu3 %v3122_v15 }
 0x103   :  { %v3647_v55 = vadd.f32 %v247_v54, %v113_v25 }
 0x105   :  { %2963 = vmatmul.msk.f32.gmra.mxu0 %vm256_vm5, %v3647_v55  ;;  %2961 = vmatmul.msk.f32.gmra.mxu1 %vm256_vm5, %v3647_v55 }
 0x108   :  { %v109_v56 = vpop.f32.mrf.mxu1 }
 0x109   :  { %v110_v57 = vadd.f32 %v109_v56, %v86_v35 }
 0x10b   :  { %140 = vmatpush.msra.mxu2 %v110_v57 }
 0x10c   :  { %2952 = vmatmul.msk.f32.vlgmr.msra.gmra.mxu2 %vm120_vm1, %v117_v39  ;;  %v3689_v39 = vpop.permute.xlu2 %367 }
 0x10d   :  { %2972 = vmatmul.msk.f32.vlgmr.msrb.gmra.mxu0 %vm256_vm5, %v3639_v53  ;;  %205 = vmatpush.msrb.mxu2 %v194_v59 }
 0x10f   :  { %206 = vmatpush.msrb.mxu2 %v193_v61 }
 0x111   :  { %207 = vmatpush.msrb.mxu2 %v192_v63 }
 0x113   :  { %208 = vmatpush.msrb.mxu2 %v191_v1 }
 0x114   :  { %2953 = vmatmul.msk.f32.gmra.mxu2 %vm120_vm1, %v119_v58 }
 0x115   :  { %2973 = vmatmul.msk.f32.gmra.mxu0 %vm256_vm5, %v3647_v55  ;;  %209 = vmatpush.msrb.mxu2 %v190_v3 }
 0x117   :  { %210 = vmatpush.msrb.mxu2 %v189_v5 }
 0x119   :  { %211 = vmatpush.msrb.mxu2 %v188_v7 }
 0x11b   :  { %212 = vmatpush.msrb.mxu2 %v187_v10 }
 0x11d   :  { %356 = vmatpush.msra.mxu2 %v3116_v8 }
 0x11f   :  { %357 = vmatpush.msra.mxu2 %v3117_v11 }
 0x121   :  { %358 = vmatpush.msra.mxu2 %v3121_v14 }
 0x123   :  { %359 = vmatpush.msra.mxu2 %v3122_v15 }
 0x17a   :  { %v323_v17 = vpop.f32.mrf.mxu0  ;;  %v280_v32 = vpop.f32.mrf.mxu1 }
 0x17b   :  { %v324_v26 = vadd.f32 %v323_v17, %v3632_v44  ;;  %v281_v33 = vadd.f32 %v3606_v23, %v280_v32 }
 0x182   :  { %v326_v18 = vpop.f32.mrf.mxu0  ;;  %v283_v34 = vpop.f32.mrf.mxu1 }
 0x183   :  { %v327_v20 = vadd.f32 %v326_v18, %v3632_v44  ;;  %v284_v35 = vadd.f32 %v3606_v23, %v283_v34 }
 0x18f   :  { %v142_v25 = vpop.f32.mrf.mxu2 }
 0x190   :  { %2954 = vmatmul.msk.f32.vlgmr.msra.gmra.mxu3 %vm88_vm4, %v142_v25  ;;  %2956 = vmatmul.msk.f32.vlgmr.msrb.gmra.mxu2 %vm88_vm4, %v142_v25 }
 0x191   :  { %2966 = vmatpush.xpose.msk.msrb.mxu2 %vm120_vm1, %v327_v20  ;;  %524 = vmatpush.msra.mxu3 %v3126_v19  ;;  %v491_v20 = vpop.f32.mrf.mxu0 }
 0x193   :  { %525 = vmatpush.msra.mxu3 %v3127_v24 }
 0x195   :  { %2967 = vmatpush.xpose.msk.msrb.mxu2 %vm120_vm1, %v324_v26  ;;  %526 = vmatpush.msra.mxu3 %v3131_v27 }
 0x197   :  { %v145_v30 = vpop.f32.mrf.mxu2  ;;  %527 = vmatpush.msra.mxu3 %v3132_v28 }
 0x198   :  { %2955 = vmatmul.msk.f32.gmra.mxu3 %vm88_vm4, %v145_v30  ;;  %2957 = vmatmul.msk.f32.gmra.mxu2 %vm88_vm4, %v145_v30 }
 0x199   :  { %v494_v34 = vpop.f32.mrf.mxu0 }
 0x1a0   :  { %2964 = vmatmul.msk.f32.vlgmr.msra.gmra.mxu2 %vm256_vm5, %v3639_v53  ;;  %2965 = vmatmul.msk.f32.vlgmr.msrb.gmra.mxu3 %vm256_vm5, %v3647_v55 }
 0x1a8   :  { %2968 = vmatmul.msk.f32.vlgmr.msrb.gmra.mxu2 %vm120_vm1, %v281_v33  ;;  %2974 = vmatmul.msk.f32.vlgmr.msra.gmra.mxu3 %vm256_vm5, %v3639_v53 }
 0x1b0   :  { %2969 = vmatmul.msk.f32.gmra.mxu2 %vm120_vm1, %v284_v35  ;;  %2975 = vmatmul.msk.f32.gmra.mxu3 %vm256_vm5, %v3647_v55 }
 0x213   :  { %v3685_v36 = vpop.f32.mrf.mxu2  ;;  %v3699_v47 = vpop.f32.mrf.mxu3 }
 0x21b   :  { %v3687_v37 = vpop.f32.mrf.mxu2  ;;  %v3701_v51 = vpop.f32.mrf.mxu3 }
 0x223   :  { %v361_v38 = vpop.f32.mrf.mxu2  ;;  %v364_v59 = vpop.f32.mrf.mxu3 }
 0x22b   :  { %v402_v40 = vpop.f32.mrf.mxu2  ;;  %v529_v8 = vpop.f32.mrf.mxu3 }
 0x22c   :  { %v403_v41 = vadd.f32 %v402_v40, %v3689_v39 }
 0x22e   :  { %v408_v42 = vsel %vm51_vm0, %v403_v41, -inf }
 0x22f   :  { %409 = vmax.xlane.f32.xlu1 %v408_v42 }
 0x233   :  { %v405_v44 = vpop.f32.mrf.mxu2  ;;  %v532_v11 = vpop.f32.mrf.mxu3 }
 0x234   :  { %v406_v45 = vadd.f32 %v405_v44, %v3693_v43 }
 0x236   :  { %v411_v46 = vsel %vm51_vm0, %v406_v45, -inf }
 0x237   :  { %412 = vmax.xlane.f32.xlu2 %v411_v46 }
 0x24f   :  { %341 = vrot.lane.b32.xlu2 %v3606_v23, %s3543_s25 }
 0x257   :  { %3144 = vrot.lane.b32.xlu2 %v3602_v21, %s3547_s28 }
 0x25f   :  { %3154 = vrot.lane.b32.xlu2 %v3602_v21, %s3548_s29 }
 0x267   :  { %3169 = vrot.lane.b32.xlu2 %v3598_v16, %s3541_s24 }
 0x2a2   :  { %v410_v48 = vpop.xlane.xlu1 %409 }
 0x2a3   :  { %v414_v49 = vsub.f32 %v403_v41, %v410_v48 }
 0x2a5   :  { %v416_v50 = vmul.f32 1.442695, %v414_v49 }
 0x2a7   :  { %3406 = vpow2.f32 %v416_v50 }
 0x2aa   :  { %v413_v52 = vpop.xlane.xlu2 %412 }
 0x2ab   :  { %v415_v54 = vsub.f32 %v406_v45, %v413_v52 }
 0x2ad   :  { %v3407_v56 = vpop.eup %3406  ;;  %v418_v57 = vmul.f32 1.442695, %v415_v54 }
 0x2ae   :  { %v420_v58 = vsel %vm51_vm0, %v3407_v56, 0.0 }
 0x2af   :  { %3408 = vpow2.f32 %v418_v57  ;;  %421 = vadd.xlane.f32.xlu0 %v420_v58 }
 0x2b2   :  { %v342_v60 = vpop.permute.xlu2 %341 }
 0x2b3   :  { %v365_v61 = vadd.f32 %v364_v59, %v342_v60  ;;  %v362_v63 = vadd.f32 %v361_v38, %v342_v60 }
 0x2b5   :  { %v3409_v62 = vpop.eup %3408  ;;  %450 = vmatpush.msra.mxu1 %v365_v61 }
 0x2b6   :  { %v423_v0 = vsel %vm51_vm0, %v3409_v62, 0.0 }
 0x2b7   :  { %451 = vmatpush.msra.mxu1 %v362_v63  ;;  %424 = vadd.xlane.f32.xlu1 %v423_v0 }
 0x2ba   :  { %v3145_v1 = vpop.permute.xlu2 %3144 }
 0x2bb   :  { %v3147_v2 = vunpack.i.h.bf16 %v3145_v1  ;;  %v3146_v3 = vunpack.i.l.bf16 %v3145_v1 }
 0x2bd   :  { %562 = vmatpush.msra.mxu2 %v3146_v3 }
 0x2bf   :  { %563 = vmatpush.msra.mxu2 %v3147_v2 }
 0x2c2   :  { %v3155_v15 = vpop.permute.xlu2 %3154 }
 0x2c3   :  { %509 = vrot.lane.b32.xlu0 %v3606_v23, %s3544_s26  ;;  %v3156_v22 = vunpack.i.l.bf16 %v3155_v15  ;;  %v3157_v24 = vunpack.i.h.bf16 %v3155_v15 }
 0x2ca   :  { %v3170_v28 = vpop.permute.xlu2 %3169 }
 0x2cb   :  { %3149 = vrot.lane.b32.xlu0 %v3598_v16, %s3547_s28  ;;  %v3171_v33 = vunpack.i.l.bf16 %v3170_v28  ;;  %v3172_v35 = vunpack.i.h.bf16 %v3170_v28 }
 0x2d0   :  { %471 = vrot.lane.b32.xlu1 %v3606_v23, %s3545_s27 }
 0x2d3   :  { %3164 = vrot.lane.b32.xlu0 %v3602_v21, %s3541_s24 }
 0x2d8   :  { %3159 = vrot.lane.b32.xlu1 %v3598_v16, %s3548_s29 }
 0x322   :  { %v422_v4 = vpop.xlane.xlu0 %421 }
 0x323   :  { %3410 = vrcp.f32 %v422_v4 }
 0x329   :  { %v3411_v5 = vpop.eup %3410 }
 0x32a   :  { %v428_v6 = vmul.f32 %v3411_v5, %v3407_v56  ;;  %v425_v7 = vpop.xlane.xlu1 %424 }
 0x32b   :  { %3412 = vrcp.f32 %v425_v7 }
 0x32c   :  { %2970 = vmatmul.msk.f32.vlgmr.msra.gmra.mxu1 %vm51_vm0, %v428_v6 }
 0x331   :  { %v3413_v9 = vpop.eup %3412 }
 0x332   :  { %v429_v10 = vmul.f32 %v3413_v9, %v3409_v62 }
 0x334   :  { %2971 = vmatmul.msk.f32.gmra.mxu1 %vm51_vm0, %v429_v10 }
 0x335   :  { %v510_v12 = vpop.permute.xlu0 %509 }
 0x336   :  { %v533_v13 = vadd.f32 %v532_v11, %v510_v12  ;;  %v530_v14 = vadd.f32 %v529_v8, %v510_v12 }
 0x338   :  { %2978 = vmatpush.xpose.msk.msrb.mxu1 %vm120_vm1, %v533_v13 }
 0x33c   :  { %2979 = vmatpush.xpose.msk.msrb.mxu1 %vm120_vm1, %v530_v14 }
 0x33d   :  { %v3150_v17 = vpop.permute.xlu0 %3149 }
 0x33e   :  { %v3152_v18 = vunpack.i.h.bf16 %v3150_v17  ;;  %v3151_v19 = vunpack.i.l.bf16 %v3150_v17 }
 0x340   :  { %564 = vmatpush.msra.mxu2 %v3151_v19 }
 0x342   :  { %565 = vmatpush.msra.mxu2 %v3152_v18  ;;  %v472_v25 = vpop.permute.xlu1 %471 }
 0x343   :  { %v492_v26 = vadd.f32 %v491_v20, %v472_v25  ;;  %2976 = vmatmul.msk.f32.vlgmr.msra.gmra.mxu2 %vm256_vm5, %v3639_v53  ;;  %v495_v40 = vadd.f32 %v494_v34, %v472_v25 }
 0x344   :  { %724 = vmatpush.msrb.mxu2 %v3156_v22 }
 0x345   :  { %v3165_v27 = vpop.permute.xlu0 %3164  ;;  %2980 = vmatmul.msk.f32.vlgmr.msrb.gmra.mxu1 %vm120_vm1, %v492_v26 }
 0x346   :  { %v3167_v30 = vunpack.i.h.bf16 %v3165_v27  ;;  %v3166_v32 = vunpack.i.l.bf16 %v3165_v27  ;;  %725 = vmatpush.msrb.mxu2 %v3157_v24 }
 0x348   :  { %686 = vmatpush.msrb.mxu3 %v3166_v32 }
 0x34a   :  { %687 = vmatpush.msrb.mxu3 %v3167_v30  ;;  %v3160_v38 = vpop.permute.xlu1 %3159 }
 0x34b   :  { %2977 = vmatmul.msk.f32.gmra.mxu2 %vm256_vm5, %v3647_v55  ;;  %v3162_v41 = vunpack.i.h.bf16 %v3160_v38  ;;  %v3161_v42 = vunpack.i.l.bf16 %v3160_v38 }
 0x34c   :  { %688 = vmatpush.msrb.mxu3 %v3171_v33 }
 0x34d   :  { %2981 = vmatmul.msk.f32.gmra.mxu1 %vm120_vm1, %v495_v40  ;;  %726 = vmatpush.msrb.mxu2 %v3161_v42 }
 0x34e   :  { %689 = vmatpush.msrb.mxu3 %v3172_v35 }
 0x34f   :  { %2984 = vmatmul.msk.f32.vlgmr.msrb.gmra.mxu3 %vm256_vm5, %v3639_v53  ;;  %727 = vmatpush.msrb.mxu2 %v3162_v41 }
 0x353   :  { %2986 = vmatmul.msk.f32.vlgmr.msrb.gmra.mxu2 %vm256_vm5, %v3639_v53 }
 0x357   :  { %2985 = vmatmul.msk.f32.gmra.mxu3 %vm256_vm5, %v3647_v55 }
 0x35b   :  { %2987 = vmatmul.msk.f32.gmra.mxu2 %vm256_vm5, %v3647_v55 }
 0x3a9   :  { %v3739_v44 = vpop.f32.mrf.mxu1 }
 0x3b1   :  { %v3741_v45 = vpop.f32.mrf.mxu1 }
 0x3c2   :  { %v602_v46 = vpop.f32.mrf.mxu1 }
 0x3c3   :  { %v603_v48 = vadd.f32 %v602_v46, %v3689_v39 }
 0x3c5   :  { %v608_v49 = vsel %vm51_vm0, %v603_v48, -inf }
 0x3c6   :  { %609 = vmax.xlane.f32.xlu1 %v608_v49  ;;  %v567_v0 = vpop.f32.mrf.mxu2 }
 0x3ca   :  { %v605_v50 = vpop.f32.mrf.mxu1 }
 0x3cb   :  { %v606_v52 = vadd.f32 %v605_v50, %v3693_v43 }
 0x3cd   :  { %v611_v54 = vsel %vm51_vm0, %v606_v52, -inf }
 0x3ce   :  { %612 = vmax.xlane.f32.xlu0 %v611_v54  ;;  %v570_v3 = vpop.f32.mrf.mxu2 }
 0x3d2   :  { %v691_v27 = vpop.f32.mrf.mxu3 }
 0x3d6   :  { %v729_v10 = vpop.f32.mrf.mxu2 }
 0x3da   :  { %v694_v35 = vpop.f32.mrf.mxu3 }
 0x3de   :  { %v732_v13 = vpop.f32.mrf.mxu2 }
 0x3df   :  { %547 = vrot.lane.b32.xlu1 %v3606_v23, %s3547_s28 }
 0x3e7   :  { %3174 = vrot.lane.b32.xlu1 %v3602_v21, %s3540_s22 }
 0x3ef   :  { %3189 = vrot.lane.b32.xlu1 %v3598_v16, %s3549_s30 }
 0x439   :  { %v610_v56 = vpop.xlane.xlu1 %609 }
 0x43a   :  { %v614_v57 = vsub.f32 %v603_v48, %v610_v56 }
 0x43c   :  { %v616_v58 = vmul.f32 1.442695, %v614_v57 }
 0x43e   :  { %3414 = vpow2.f32 %v616_v58 }
 0x441   :  { %v613_v59 = vpop.xlane.xlu0 %612 }
 0x442   :  { %v615_v60 = vsub.f32 %v606_v52, %v613_v59 }
 0x444   :  { %v3415_v61 = vpop.eup %3414  ;;  %v618_v62 = vmul.f32 1.442695, %v615_v60 }
 0x445   :  { %v620_v63 = vsel %vm51_vm0, %v3415_v61, 0.0 }
 0x446   :  { %3416 = vpow2.f32 %v618_v62  ;;  %621 = vadd.xlane.f32.xlu2 %v620_v63 }
 0x44c   :  { %v3417_v1 = vpop.eup %3416 }
 0x44d   :  { %v623_v2 = vsel %vm51_vm0, %v3417_v1, 0.0 }
 0x44e   :  { %624 = vadd.xlane.f32.xlu0 %v623_v2 }
 0x451   :  { %v548_v4 = vpop.permute.xlu1 %547 }
 0x452   :  { %v571_v5 = vadd.f32 %v570_v3, %v548_v4  ;;  %v568_v6 = vadd.f32 %v567_v0, %v548_v4 }
 0x454   :  { %650 = vmatpush.msra.mxu0 %v571_v5 }
 0x456   :  { %651 = vmatpush.msra.mxu0 %v568_v6 }
 0x459   :  { %v3175_v7 = vpop.permute.xlu1 %3174 }
 0x45a   :  { %v3177_v8 = vunpack.i.h.bf16 %v3175_v7  ;;  %v3176_v9 = vunpack.i.l.bf16 %v3175_v7 }
 0x45c   :  { %762 = vmatpush.msra.mxu1 %v3176_v9 }
 0x45e   :  { %709 = vrot.lane.b32.xlu2 %v3606_v23, %s3548_s29  ;;  %763 = vmatpush.msra.mxu1 %v3177_v8 }
 0x461   :  { %v3190_v40 = vpop.permute.xlu1 %3189 }
 0x462   :  { %671 = vrot.lane.b32.xlu0 %v3606_v23, %s3541_s24  ;;  %v3191_v48 = vunpack.i.l.bf16 %v3190_v40  ;;  %v3192_v49 = vunpack.i.h.bf16 %v3190_v40 }
 0x466   :  { %3179 = vrot.lane.b32.xlu2 %v3598_v16, %s3540_s22 }
 0x46a   :  { %3184 = vrot.lane.b32.xlu0 %v3602_v21, %s3549_s30 }
 0x46e   :  { %3194 = vrot.lane.b32.xlu2 %v3602_v21, %s3550_s4 }
 0x472   :  { %3199 = vrot.lane.b32.xlu0 %v3598_v16, %s3550_s4 }
 0x4b9   :  { %v622_v11 = vpop.xlane.xlu2 %621 }
 0x4ba   :  { %3418 = vrcp.f32 %v622_v11 }
 0x4c0   :  { %v3419_v12 = vpop.eup %3418 }
 0x4c1   :  { %v628_v14 = vmul.f32 %v3419_v12, %v3415_v61  ;;  %v625_v15 = vpop.xlane.xlu0 %624  ;;  %v710_v17 = vpop.permute.xlu2 %709 }
 0x4c2   :  { %3420 = vrcp.f32 %v625_v15  ;;  %v733_v18 = vadd.f32 %v732_v13, %v710_v17  ;;  %v730_v19 = vadd.f32 %v729_v10, %v710_v17 }
 0x4c3   :  { %2982 = vmatmul.msk.f32.vlgmr.msra.gmra.mxu0 %vm51_vm0, %v628_v14 }
 0x4c4   :  { %2990 = vmatpush.xpose.msk.msrb.mxu0 %vm120_vm1, %v733_v18 }
 0x4c8   :  { %v3421_v20 = vpop.eup %3420  ;;  %2991 = vmatpush.xpose.msk.msrb.mxu0 %vm120_vm1, %v730_v19 }
 0x4c9   :  { %v3180_v22 = vpop.permute.xlu2 %3179  ;;  %v629_v24 = vmul.f32 %v3421_v20, %v3417_v1 }
 0x4ca   :  { %v3182_v25 = vunpack.i.h.bf16 %v3180_v22  ;;  %v3181_v26 = vunpack.i.l.bf16 %v3180_v22 }
 0x4cb   :  { %2983 = vmatmul.msk.f32.gmra.mxu0 %vm51_vm0, %v629_v24 }
 0x4cc   :  { %764 = vmatpush.msra.mxu1 %v3181_v26 }
 0x4ce   :  { %765 = vmatpush.msra.mxu1 %v3182_v25 }
 0x4cf   :  { %2988 = vmatmul.msk.f32.vlgmr.msra.gmra.mxu1 %vm256_vm5, %v3639_v53 }
 0x4d1   :  { %v3195_v28 = vpop.permute.xlu2 %3194 }
 0x4d2   :  { %v3197_v30 = vunpack.i.h.bf16 %v3195_v28  ;;  %v3196_v32 = vunpack.i.l.bf16 %v3195_v28 }
 0x4d4   :  { %v672_v33 = vpop.permute.xlu0 %671  ;;  %886 = vmatpush.msra.mxu2 %v3196_v32 }
 0x4d5   :  { %v692_v34 = vadd.f32 %v691_v27, %v672_v33  ;;  %v695_v41 = vadd.f32 %v694_v35, %v672_v33 }
 0x4d6   :  { %887 = vmatpush.msra.mxu2 %v3197_v30 }
 0x4d7   :  { %2989 = vmatmul.msk.f32.gmra.mxu1 %vm256_vm5, %v3647_v55  ;;  %2992 = vmatmul.msk.f32.vlgmr.msrb.gmra.mxu0 %vm120_vm1, %v692_v34 }
 0x4dc   :  { %v3185_v38 = vpop.permute.xlu0 %3184 }
 0x4dd   :  { %v3187_v42 = vunpack.i.h.bf16 %v3185_v38  ;;  %v3186_v46 = vunpack.i.l.bf16 %v3185_v38 }
 0x4df   :  { %2993 = vmatmul.msk.f32.gmra.mxu0 %vm120_vm1, %v695_v41  ;;  %924 = vmatpush.msrb.mxu1 %v3186_v46 }
 0x4e1   :  { %925 = vmatpush.msrb.mxu1 %v3187_v42 }
 0x4e3   :  { %926 = vmatpush.msrb.mxu1 %v3191_v48 }
 0x4e4   :  { %v3200_v50 = vpop.permute.xlu0 %3199 }
 0x4e5   :  { %v3202_v52 = vunpack.i.h.bf16 %v3200_v50  ;;  %v3201_v54 = vunpack.i.l.bf16 %v3200_v50  ;;  %927 = vmatpush.msrb.mxu1 %v3192_v49 }
 0x4e6   :  { %2998 = vmatmul.msk.f32.vlgmr.msrb.gmra.mxu1 %vm256_vm5, %v3639_v53 }
 0x4e7   :  { %888 = vmatpush.msra.mxu2 %v3201_v54 }
 0x4e9   :  { %889 = vmatpush.msra.mxu2 %v3202_v52 }
 0x4ea   :  { %2996 = vmatmul.msk.f32.vlgmr.msra.gmra.mxu2 %vm256_vm5, %v3639_v53 }
 0x4ee   :  { %2999 = vmatmul.msk.f32.gmra.mxu1 %vm256_vm5, %v3647_v55 }
 0x4f2   :  { %2997 = vmatmul.msk.f32.gmra.mxu2 %vm256_vm5, %v3647_v55 }
 0x540   :  { %v3785_v56 = vpop.f32.mrf.mxu0 }
 0x548   :  { %v3787_v57 = vpop.f32.mrf.mxu0 }
 0x54c   :  { %v767_v8 = vpop.f32.mrf.mxu1 }
 0x554   :  { %v802_v58 = vpop.f32.mrf.mxu0  ;;  %v770_v11 = vpop.f32.mrf.mxu1 }
 0x555   :  { %v803_v59 = vadd.f32 %v802_v58, %v3689_v39 }
 0x557   :  { %v808_v60 = vsel %vm51_vm0, %v803_v59, -inf }
 0x558   :  { %809 = vmax.xlane.f32.xlu1 %v808_v60 }
 0x55c   :  { %v805_v61 = vpop.f32.mrf.mxu0 }
 0x55d   :  { %v806_v62 = vadd.f32 %v805_v61, %v3693_v43 }
 0x55f   :  { %v811_v63 = vsel %vm51_vm0, %v806_v62, -inf }
 0x560   :  { %812 = vmax.xlane.f32.xlu2 %v811_v63 }
 0x563   :  { %v929_v24 = vpop.f32.mrf.mxu1 }
 0x56d   :  { %v891_v30 = vpop.f32.mrf.mxu2 }
 0x571   :  { %747 = vrot.lane.b32.xlu1 %v3606_v23, %s3540_s22 }
 0x575   :  { %v894_v41 = vpop.f32.mrf.mxu2 }
 0x579   :  { %3204 = vrot.lane.b32.xlu1 %v3602_v21, %s3551_s5 }
 0x5cb   :  { %v810_v0 = vpop.xlane.xlu1 %809 }
 0x5cc   :  { %v814_v1 = vsub.f32 %v803_v59, %v810_v0 }
 0x5ce   :  { %v816_v2 = vmul.f32 1.442695, %v814_v1 }
 0x5d0   :  { %3422 = vpow2.f32 %v816_v2 }
 0x5d3   :  { %v813_v3 = vpop.xlane.xlu2 %812 }
 0x5d4   :  { %v815_v4 = vsub.f32 %v806_v62, %v813_v3 }
 0x5d6   :  { %v3423_v5 = vpop.eup %3422  ;;  %v818_v6 = vmul.f32 1.442695, %v815_v4 }
 0x5d7   :  { %v820_v7 = vsel %vm51_vm0, %v3423_v5, 0.0 }
 0x5d8   :  { %3424 = vpow2.f32 %v818_v6  ;;  %821 = vadd.xlane.f32.xlu0 %v820_v7 }
 0x5de   :  { %v3425_v9 = vpop.eup %3424 }
 0x5df   :  { %v823_v10 = vsel %vm51_vm0, %v3425_v9, 0.0 }
 0x5e0   :  { %824 = vadd.xlane.f32.xlu2 %v823_v10 }
 0x5e3   :  { %v748_v12 = vpop.permute.xlu1 %747 }
 0x5e4   :  { %v771_v13 = vadd.f32 %v770_v11, %v748_v12  ;;  %v768_v14 = vadd.f32 %v767_v8, %v748_v12 }
 0x5e6   :  { %850 = vmatpush.msra.mxu3 %v771_v13 }
 0x5e8   :  { %851 = vmatpush.msra.mxu3 %v768_v14 }
 0x5eb   :  { %v3205_v21 = vpop.permute.xlu1 %3204 }
 0x5ec   :  { %909 = vrot.lane.b32.xlu0 %v3606_v23, %s3549_s30  ;;  %v3207_v15 = vunpack.i.h.bf16 %v3205_v21  ;;  %v3206_v17 = vunpack.i.l.bf16 %v3205_v21 }
 0x5ee   :  { %962 = vmatpush.msra.mxu0 %v3206_v17  ;;  %v1091_v17 = vld [vmem:[#allocation2 + $0x158] sm:$0xff] }
 0x5f0   :  { %963 = vmatpush.msra.mxu0 %v3207_v15  ;;  %v3833_v15 = vld [vmem:[#allocation2 + $0x160] sm:$0xff] }
 0x5f4   :  { %3209 = vrot.lane.b32.xlu0 %v3598_v16, %s3551_s5  ;;  %v932_v16 = vpop.f32.mrf.mxu1 }
 0x5f8   :  { %871 = vrot.lane.b32.xlu2 %v3606_v23, %s3550_s4 }
 0x64b   :  { %v822_v18 = vpop.xlane.xlu0 %821 }
 0x64c   :  { %3426 = vrcp.f32 %v822_v18 }
 0x652   :  { %v3427_v19 = vpop.eup %3426 }
 0x653   :  { %v828_v20 = vmul.f32 %v3427_v19, %v3423_v5  ;;  %v825_v22 = vpop.xlane.xlu2 %824 }
 0x654   :  { %3428 = vrcp.f32 %v825_v22 }
 0x655   :  { %2994 = vmatmul.msk.f32.vlgmr.msra.gmra.mxu3 %vm51_vm0, %v828_v20  ;;  %v1090_v20 = vld [vmem:[#allocation2 + $0x150] sm:$0xff] }
 0x65a   :  { %v3429_v25 = vpop.eup %3428 }
 0x65b   :  { %v829_v26 = vmul.f32 %v3429_v25, %v3425_v9  ;;  %v872_v32 = vpop.permute.xlu2 %871 }
 0x65c   :  { %v892_v34 = vadd.f32 %v891_v30, %v872_v32  ;;  %v895_v42 = vadd.f32 %v894_v41, %v872_v32 }
 0x65d   :  { %2995 = vmatmul.msk.f32.gmra.mxu3 %vm51_vm0, %v829_v26 }
 0x65e   :  { %v910_v27 = vpop.permute.xlu0 %909 }
 0x65f   :  { %v933_v28 = vadd.f32 %v932_v16, %v910_v27  ;;  %v930_v33 = vadd.f32 %v929_v24, %v910_v27 }
 0x661   :  { %3002 = vmatpush.xpose.msk.msrb.mxu3 %vm120_vm1, %v933_v28 }
 0x665   :  { %3003 = vmatpush.xpose.msk.msrb.mxu3 %vm120_vm1, %v930_v33 }
 0x666   :  { %v3210_v35 = vpop.permute.xlu0 %3209 }
 0x667   :  { %v3212_v38 = vunpack.i.h.bf16 %v3210_v35  ;;  %v3211_v40 = vunpack.i.l.bf16 %v3210_v35 }
 0x668   :  { %3004 = vmatmul.msk.f32.vlgmr.msrb.gmra.mxu3 %vm120_vm1, %v892_v34 }
 0x669   :  { %964 = vmatpush.msra.mxu0 %v3211_v40 }
 0x66b   :  { %965 = vmatpush.msra.mxu0 %v3212_v38 }
 0x66c   :  { %3000 = vmatmul.msk.f32.vlgmr.msra.gmra.mxu0 %vm256_vm5, %v3639_v53 }
 0x670   :  { %3005 = vmatmul.msk.f32.gmra.mxu3 %vm120_vm1, %v895_v42 }
 0x674   :  { %3001 = vmatmul.msk.f32.gmra.mxu0 %vm256_vm5, %v3647_v55 }
 0x6d8   :  { %v853_v46 = vpop.f32.mrf.mxu3 }
 0x6e0   :  { %v856_v48 = vpop.f32.mrf.mxu3 }
 0x6e9   :  { %v967_v4 = vpop.f32.mrf.mxu0 }
 0x6eb   :  { %v1002_v49 = vpop.f32.mrf.mxu3 }
 0x6ec   :  { %v1003_v50 = vadd.f32 %v1002_v49, %v3689_v39 }
 0x6ee   :  { %v1008_v52 = vsel %vm51_vm0, %v1003_v50, -inf }
 0x6ef   :  { %1009 = vmax.xlane.f32.xlu1 %v1008_v52 }
 0x6f1   :  { %v970_v7 = vpop.f32.mrf.mxu0 }
 0x6f3   :  { %v1005_v54 = vpop.f32.mrf.mxu3 }
 0x6f4   :  { %v1006_v58 = vadd.f32 %v1005_v54, %v3693_v43 }
 0x6f6   :  { %v1011_v59 = vsel %vm51_vm0, %v1006_v58, -inf }
 0x6f7   :  { %1012 = vmax.xlane.f32.xlu0 %v1011_v59 }
 0x708   :  { %947 = vrot.lane.b32.xlu1 %v3606_v23, %s3551_s5 }
 0x762   :  { %v1010_v60 = vpop.xlane.xlu1 %1009 }
 0x763   :  { %v1014_v61 = vsub.f32 %v1003_v50, %v1010_v60  ;;  %v3554_v50 = vmov 32.0  }
 0x765   :  { %v1016_v62 = vmul.f32 1.442695, %v1014_v61 }
 0x767   :  { %3430 = vpow2.f32 %v1016_v62 }
 0x76a   :  { %v1013_v63 = vpop.xlane.xlu0 %1012 }
 0x76b   :  { %v1015_v0 = vsub.f32 %v1006_v58, %v1013_v63  ;;  %v3855_v58 = vld [vmem:[#allocation2 + $0x180] ss:$0 sm:$0xff] }
 0x76d   :  { %v3431_v1 = vpop.eup %3430  ;;  %v1018_v2 = vmul.f32 1.442695, %v1015_v0 }
 0x76e   :  { %v1020_v3 = vsel %vm51_vm0, %v3431_v1, 0.0 }
 0x76f   :  { %3432 = vpow2.f32 %v1018_v2  ;;  %1021 = vadd.xlane.f32.xlu2 %v1020_v3 }
 0x775   :  { %v3433_v5 = vpop.eup %3432 }
 0x776   :  { %v1023_v6 = vsel %vm51_vm0, %v3433_v5, 0.0 }
 0x777   :  { %1024 = vadd.xlane.f32.xlu0 %v1023_v6 }
 0x77a   :  { %v948_v8 = vpop.permute.xlu1 %947 }
 0x77b   :  { %v971_v23 = vadd.f32 %v970_v7, %v948_v8  ;;  %v968_v9 = vadd.f32 %v967_v4, %v948_v8  ;;  %v3872_v7 = vld [vmem:[#allocation2 + $0x1a8] sm:$0xff]  ;;  %v3875_v8 = vld [vmem:[#allocation2 + $0x1a0] sm:$0xff] }
 0x77c   :  { %1216 = vmatpush.msrb.mxu0 %v3872_v7 }
 0x77d   :  { %1050 = vmatpush.msrb.mxu2 %v971_v23  ;;  %v3878_v23 = vld [vmem:[#allocation2 + $0x198] sm:$0xff] }
 0x77e   :  { %1217 = vmatpush.msrb.mxu0 %v3875_v8 }
 0x77f   :  { %1051 = vmatpush.msrb.mxu2 %v968_v9  ;;  %v3881_v9 = vld [vmem:[#allocation2 + $0x190] sm:$0xff] }
 0x780   :  { %1218 = vmatpush.msrb.mxu0 %v3878_v23 }
 0x782   :  { %1219 = vmatpush.msrb.mxu0 %v3881_v9 }
 0x787   :  { %1061 = vrot.lane.b32.xlu2 %v3785_v56, %s3538_s18  ;;  %v3831_v56 = vld [vmem:[#allocation2 + $0x168] sm:$0xff] }
 0x788   :  { %1114 = vmatpush.msra.mxu1 %v3831_v56 }
 0x78a   :  { %1115 = vmatpush.msra.mxu1 %v3833_v15 }
 0x78b   :  { %1069 = vrot.lane.b32.xlu0 %v853_v46, %s3552_s6 }
 0x78c   :  { %1116 = vmatpush.msra.mxu1 %v1091_v17 }
 0x78e   :  { %1117 = vmatpush.msra.mxu1 %v1090_v20 }
 0x78f   :  { %1063 = vrot.lane.b32.xlu2 %v3787_v57, %s3538_s18  ;;  %v3323_v57 = vpack.i.bf16 %v3833_v15, %v3831_v56 }
 0x793   :  { %1071 = vrot.lane.b32.xlu0 %v856_v48, %s3552_s6 }
 0x7e2   :  { %v1022_v10 = vpop.xlane.xlu2 %1021 }
 0x7e3   :  { %3434 = vrcp.f32 %v1022_v10 }
 0x7e9   :  { %v3435_v11 = vpop.eup %3434 }
 0x7ea   :  { %v1028_v12 = vmul.f32 %v3435_v11, %v3431_v1  ;;  %v1025_v13 = vpop.xlane.xlu0 %1024  ;;  %v1062_v22 = vpop.permute.xlu2 %1061 }
 0x7eb   :  { %3436 = vrcp.f32 %v1025_v13  ;;  %v1083_v25 = vsel %vm120_vm1, %v3739_v44, %v1062_v22  ;;  %v3397_v44 = vld [vmem:[#allocation2 + $0x170] ss:$0 sm:$0xff]  ;;  %v3333_v13 = vpack.i.bf16 %v3875_v8, %v3872_v7  ;;  %v3897_v22 = vld [vmem:[#allocation2 + $0x1d8] sm:$0xff] }
 0x7ec   :  { %3006 = vmatmul.msk.f32.vlgmr.msrb.gmra.mxu2 %vm51_vm0, %v1028_v12  ;;  %3438 = vrcp.f32 %v3554_v50 }
 0x7f1   :  { %v3437_v14 = vpop.eup %3436 }
 0x7f2   :  { %v1029_v21 = vmul.f32 %v3437_v14, %v3433_v5  ;;  %v1064_v28 = vpop.permute.xlu2 %1063  ;;  %v3439_v52 = vpop.eup %3438  ;;  %v3338_v14 = vpack.i.bf16 %v3881_v9, %v3878_v23  ;;  %v3507_v23 = vld [vmem:[#allocation2 + $0x178] ss:$0 sm:$0xff] }
 0x7f3   :  { %v1084_v32 = vsel %vm120_vm1, %v3741_v45, %v1064_v28  ;;  %v1135_v54 = vmul.f32 32.0, %v3439_v52  ;;  %vm1139_vm7 = vweird.f32 %v3439_v52 }
 0x7f4   :  { %3007 = vmatmul.msk.f32.gmra.mxu2 %vm51_vm0, %v1029_v21 }
 0x7f5   :  { %v1136_v59 = vsub.f32 1.0, %v1135_v54 }
 0x7fd   :  { %v1070_v24 = vpop.permute.xlu0 %1069 }
 0x7fe   :  { %v1085_v26 = vsel %vm51_vm0, %v1083_v25, %v1070_v24  ;;  %v3899_v24 = vld [vmem:[#allocation2 + $0x1d0] sm:$0xff] }
 0x805   :  { %v1072_v30 = vpop.permute.xlu0 %1071 }
 0x806   :  { %v1086_v33 = vsel %vm51_vm0, %v1084_v32, %v1072_v30  ;;  %v1232_v30 = vld [vmem:[#allocation2 + $0x1c8] sm:$0xff] }
 0x86f   :  { %v1053_v18 = vpop.f32.mrf.mxu2 }
 0x870   :  { %1077 = vrot.lane.b32.xlu1 %v1053_v18, %s3553_s7  ;;  %v3890_v18 = vld [vmem:[#allocation2 + $0x1e8] sm:$0xff] }
 0x871   :  { %1255 = vmatpush.msra.mxu3 %v3890_v18 }
 0x877   :  { %v1056_v19 = vpop.f32.mrf.mxu2 }
 0x878   :  { %1079 = vrot.lane.b32.xlu1 %v1056_v19, %s3553_s7  ;;  %v3892_v19 = vld [vmem:[#allocation2 + $0x1e0] sm:$0xff] }
 0x879   :  { %v3343_v20 = vpack.i.bf16 %v3892_v19, %v3890_v18  ;;  %1256 = vmatpush.msra.mxu3 %v3892_v19 }
 0x87b   :  { %1257 = vmatpush.msra.mxu3 %v3897_v22 }
 0x87d   :  { %1258 = vmatpush.msra.mxu3 %v3899_v24 }
 0x87f   :  { %1259 = vmatpush.msra.mxu3 %v1232_v30 }
 0x8e2   :  { %v1078_v16 = vpop.permute.xlu1 %1077 }
 0x8e3   :  { %v1088_v27 = vsel %vm1087_vm6, %v1085_v26, %v1078_v16  ;;  %v3348_v16 = vpack.i.bf16 %v3899_v24, %v3897_v22 }
 0x8e4   :  { %3008 = vmatmul.msk.f32.vlgmr.msra.gmra.mxu1 %vm256_vm5, %v1088_v27 }
 0x8ea   :  { %v1080_v34 = vpop.permute.xlu1 %1079 }
 0x8eb   :  { %v1089_v35 = vsel %vm1087_vm6, %v1086_v33, %v1080_v34 }
 0x8ec   :  { %3009 = vmatmul.msk.f32.gmra.mxu1 %vm256_vm5, %v1089_v35 }
 0x961   :  { %v1119_v38 = vpop.f32.mrf.mxu1 }
 0x962   :  { %v1120_v40 = vadd.f32 %v3397_v44, %v1119_v38 }
 0x964   :  { %v1125_v41 = vadd.f32 %v1120_v40, %v3639_v53  ;;  %v1137_v53 = vmul.f32 %v3439_v52, %v1136_v59 }
 0x966   :  { %v1128_v42 = vsel %vm256_vm5, %v1125_v41, 0.0  ;;  %v1138_v60 = vadd.f32 %v3439_v52, %v1137_v53 }
 0x967   :  { %1129 = vadd.xlane.f32.xlu2 %v1128_v42 }
 0x968   :  { %v3859_v61 = vsel %vm1139_vm7, %v3439_v52, %v1138_v60 }
 0x969   :  { %v1122_v46 = vpop.f32.mrf.mxu1 }
 0x96a   :  { %v1123_v48 = vadd.f32 %v3397_v44, %v1122_v46 }
 0x96c   :  { %v1126_v49 = vadd.f32 %v1123_v48, %v3647_v55 }
 0x96e   :  { %v1131_v45 = vsel %vm256_vm5, %v1126_v49, 0.0 }
 0x96f   :  { %1132 = vadd.xlane.f32.xlu0 %v1131_v45 }
 0x983   :  { %1183 = vrot.lane.b32.xlu0 %v3855_v58, %s3544_s26 }
 0x9da   :  { %v1130_v62 = vpop.xlane.xlu2 %1129 }
 0x9db   :  { %v1141_v55 = vmul.f32 %v3859_v61, %v1130_v62 }
 0x9dd   :  { %v1143_v63 = vsub.f32 %v1125_v41, %v1141_v55  ;;  %v3395_v41 = vld [vmem:[#allocation2 + $0xd8] ss:$0 sm:$0xff] }
 0x9de   :  { %v3908_v52 = vadd.f32 %v3395_v41, %v3699_v47  ;;  %v3919_v47 = vadd.f32 %v3395_v41, %v3701_v51 }
 0x9df   :  { %v1145_v0 = vmul.f32 %v1143_v63, %v1143_v63 }
 0x9e1   :  { %v1147_v1 = vsel %vm256_vm5, %v1145_v0, 0.0 }
 0x9e2   :  { %1148 = vadd.xlane.f32.xlu1 %v1147_v1  ;;  %v1133_v2 = vpop.xlane.xlu0 %1132 }
 0x9e3   :  { %v1142_v3 = vmul.f32 %v3859_v61, %v1133_v2 }
 0x9e5   :  { %v3864_v4 = vsub.f32 %v1126_v49, %v1142_v3  ;;  %v3396_v49 = vld [vmem:[#allocation2 + $0xe0] ss:$0 sm:$0xff] }
 0x9e6   :  { %v3911_v53 = vadd.f32 %v3396_v49, %v3685_v36  ;;  %v3922_v2 = vadd.f32 %v3396_v49, %v3687_v37  ;;  %v3399_v37 = vld [vmem:[#allocation2 + $0x178] ss:$0 sm:$0xff] }
 0x9e7   :  { %v1146_v5 = vmul.f32 %v3864_v4, %v3864_v4 }
 0x9e9   :  { %v1150_v6 = vsel %vm256_vm5, %v1146_v5, 0.0  ;;  %v3927_v5 = vld [vmem:[#allocation2 + $0x1b8] sm:$0xff] }
 0x9ea   :  { %1151 = vadd.xlane.f32.xlu2 %v1150_v6  ;;  %v3930_v6 = vld [vmem:[#allocation2 + $0x1b0] sm:$0xff] }
 0x9eb   :  { %v3358_v51 = vpack.i.bf16 %v3930_v6, %v3927_v5 }
 0x9f5   :  { %v1184_v48 = vpop.permute.xlu0 %1183 }
 0xa02   :  { %1238 = vrot.lane.b32.xlu2 %v3397_v44, %s3540_s22 }
 0xa0a   :  { %1316 = vrot.lane.b32.xlu2 %v3855_v58, %s3540_s22 }
 0xa12   :  { %1321 = vrot.lane.b32.xlu2 %v3855_v58, %s3555_s8 }
 0xa55   :  { %v1149_v10 = vpop.xlane.xlu1 %1148 }
 0xa56   :  { %v1153_v11 = vmul.f32 %v1149_v10, %v3859_v61 }
 0xa58   :  { %v1155_v12 = vadd.f32 1e-05, %v1153_v11 }
 0xa5a   :  { %3440 = vrsqrt.f32 %v1155_v12  ;;  %vm1163_vm9 = vweird.f32 %v1155_v12 }
 0xa5d   :  { %v1152_v21 = vpop.xlane.xlu2 %1151 }
 0xa5e   :  { %v1154_v17 = vmul.f32 %v1152_v21, %v3859_v61 }
 0xa60   :  { %v3441_v25 = vpop.eup %3440  ;;  %v1156_v26 = vadd.f32 1e-05, %v1154_v17 }
 0xa61   :  { %v1158_v27 = vmul.f32 %v3441_v25, %v1155_v12  ;;  %vm1164_vm8 = vweird.f32 %v3441_v25 }
 0xa62   :  { %3442 = vrsqrt.f32 %v1156_v26  ;;  %vm1165_vm10 = vmor %vm1163_vm9, %vm1164_vm8  ;;  %vm1173_vm12 = vweird.f32 %v1156_v26 }
 0xa63   :  { %v1159_v28 = vmul.f32 %v3441_v25, %v1158_v27 }
 0xa65   :  { %v1160_v32 = vmul.f32 0.5, %v1159_v28 }
 0xa67   :  { %v1161_v33 = vsub.f32 1.5, %v1160_v32 }
 0xa68   :  { %v3443_v34 = vpop.eup %3442 }
 0xa69   :  { %v1162_v35 = vmul.f32 %v3441_v25, %v1161_v33  ;;  %v1168_v44 = vmul.f32 %v3443_v34, %v1156_v26  ;;  %vm1174_vm11 = vweird.f32 %v3443_v34  ;;  %v1239_v26 = vpop.permute.xlu2 %1238 }
 0xa6a   :  { %vm1175_vm13 = vmor %vm1173_vm12, %vm1174_vm11 }
 0xa6b   :  { %v1169_v38 = vmul.f32 %v3443_v34, %v1168_v44  ;;  %v1166_v40 = vsel %vm1165_vm10, %v3441_v25, %v1162_v35 }
 0xa6c   :  { %v1177_v42 = vmul.f32 %v1166_v40, %v1143_v63  ;;  %v1332_v40 = vld [vmem:[#allocation2 + $0x138] sm:$0xff] }
 0xa6d   :  { %v1170_v46 = vmul.f32 0.5, %v1169_v38  ;;  %v1333_v38 = vld [vmem:[#allocation2 + $0x140] sm:$0xff] }
 0xa6e   :  { %v1180_v45 = vmul.f32 %v3855_v58, %v1177_v42  ;;  %1354 = vmatpush.msra.mxu2 %v1333_v38 }
 0xa6f   :  { %v1171_v50 = vsub.f32 1.5, %v1170_v46 }
 0xa70   :  { %v1186_v54 = vadd.f32 %v1184_v48, %v1180_v45  ;;  %1355 = vmatpush.msra.mxu2 %v1332_v40 }
 0xa71   :  { %v1172_v59 = vmul.f32 %v3443_v34, %v1171_v50 }
 0xa72   :  { %v1188_v60 = vmul.f32 %v1186_v54, %v3908_v52 }
 0xa73   :  { %v1176_v62 = vsel %vm1175_vm13, %v3443_v34, %v1172_v59 }
 0xa74   :  { %v1178_v55 = vmul.f32 %v1176_v62, %v3864_v4  ;;  %v1190_v63 = vadd.f32 %v1188_v60, %v3911_v53  ;;  %v1231_v4 = vld [vmem:[#allocation2 + $0x1c0] sm:$0xff]  ;;  %v1331_v62 = vld [vmem:[#allocation2 + $0x130] sm:$0xff] }
 0xa75   :  { %1260 = vmatpush.msra.mxu3 %v1231_v4  ;;  %1356 = vmatpush.msra.mxu2 %v1331_v62 }
 0xa76   :  { %v1181_v0 = vmul.f32 %v3855_v58, %v1178_v55  ;;  %3010 = vmatmul.msk.f32.vlgmr.msrb.gmra.mxu0 %vm256_vm5, %v1190_v63  ;;  %v1330_v58 = vld [vmem:[#allocation2 + $0x128] sm:$0xff] }
 0xa77   :  { %1261 = vmatpush.msra.mxu3 %v3927_v5  ;;  %v3945_v55 = vpack.i.bf16 %v1330_v58, %v1331_v62  ;;  %1357 = vmatpush.msra.mxu2 %v1330_v58 }
 0xa78   :  { %v1187_v1 = vadd.f32 %v1184_v48, %v1181_v0  ;;  %v3955_v0 = vpack.i.bf16 %v1332_v40, %v1333_v38 }
 0xa79   :  { %1262 = vmatpush.msra.mxu3 %v3930_v6  ;;  %3219 = vrot.lane.b32.xlu2 %v3945_v55, %s3542_s0 }
 0xa7a   :  { %v1189_v36 = vmul.f32 %v1187_v1, %v3919_v47  ;;  %v1317_v1 = vpop.permute.xlu2 %1316 }
 0xa7c   :  { %v1191_v3 = vadd.f32 %v1189_v36, %v3922_v2 }
 0xa7e   :  { %3011 = vmatmul.msk.f32.gmra.mxu0 %vm256_vm5, %v1191_v3 }
 0xa82   :  { %v1322_v36 = vpop.permute.xlu2 %1321 }
 0xaf3   :  { %v1221_v10 = vpop.f32.mrf.mxu0 }
 0xaf4   :  { %v1222_v11 = vadd.f32 %v3399_v37, %v1221_v10  ;;  %v3220_v10 = vpop.permute.xlu2 %3219 }
 0xaf6   :  { %v1227_v12 = vmax.f32 %v1222_v11, 0.0 }
 0xaf8   :  { %3012 = vmatmul.msk.f32.vlgmr.msra.gmra.mxu3 %vm88_vm4, %v1227_v12 }
 0xafb   :  { %v1224_v21 = vpop.f32.mrf.mxu0 }
 0xafc   :  { %v1225_v17 = vadd.f32 %v3399_v37, %v1224_v21 }
 0xafe   :  { %v1228_v25 = vmax.f32 %v1225_v17, 0.0 }
 0xb00   :  { %3013 = vmatmul.msk.f32.gmra.mxu3 %vm88_vm4, %v1228_v25 }
 0xb7b   :  { %v1264_v27 = vpop.f32.mrf.mxu3 }
 0xb7c   :  { %v1265_v28 = vadd.f32 %v1264_v27, %v1239_v26 }
 0xb7e   :  { %v1270_v30 = vadd.f32 %v1265_v28, %v1190_v63  ;;  %v3949_v63 = vld [vmem:[#allocation2 + $0x148] ss:$0 sm:$0xff] }
 0xb7f   :  { %1382 = vrot.lane.b32.xlu2 %v3949_v63, %s3542_s0 }
 0xb80   :  { %v1272_v32 = vsel %vm256_vm5, %v1270_v30, 0.0 }
 0xb81   :  { %1273 = vadd.xlane.f32.xlu1 %v1272_v32 }
 0xb83   :  { %v1267_v33 = vpop.f32.mrf.mxu3 }
 0xb84   :  { %v1268_v34 = vadd.f32 %v1267_v33, %v1239_v26 }
 0xb86   :  { %v1271_v35 = vadd.f32 %v1268_v34, %v1191_v3 }
 0xb87   :  { %3229 = vrot.lane.b32.xlu2 %v3945_v55, %s3543_s25 }
 0xb88   :  { %v1275_v44 = vsel %vm256_vm5, %v1271_v35, 0.0 }
 0xb89   :  { %1276 = vadd.xlane.f32.xlu1 %v1275_v44 }
 0xb8f   :  { %3244 = vrot.lane.b32.xlu2 %v3955_v0, %s3545_s27 }
 0xbd9   :  { %v3971_v28 = vpop.permute.xlu2 %1382 }
 0xbf4   :  { %v1274_v41 = vpop.xlane.xlu1 %1273 }
 0xbf5   :  { %v1278_v42 = vmul.f32 %v1274_v41, %v3859_v61 }
 0xbf7   :  { %v1280_v46 = vsub.f32 %v1270_v30, %v1278_v42 }
 0xbf9   :  { %v1282_v48 = vmul.f32 %v1280_v46, %v1280_v46 }
 0xbfb   :  { %v1284_v49 = vsel %vm256_vm5, %v1282_v48, 0.0  ;;  %v3230_v48 = vpop.permute.xlu2 %3229 }
 0xbfc   :  { %1285 = vadd.xlane.f32.xlu0 %v1284_v49  ;;  %v1277_v45 = vpop.xlane.xlu1 %1276 }
 0xbfd   :  { %v1279_v50 = vmul.f32 %v1277_v45, %v3859_v61 }
 0xbff   :  { %v1281_v54 = vsub.f32 %v1271_v35, %v1279_v50 }
 0xc01   :  { %v1283_v59 = vmul.f32 %v1281_v54, %v1281_v54 }
 0xc03   :  { %v1287_v60 = vsel %vm256_vm5, %v1283_v59, 0.0 }
 0xc04   :  { %1288 = vadd.xlane.f32.xlu1 %v1287_v60 }
 0xc10   :  { %3239 = vrot.lane.b32.xlu0 %v3945_v55, %s3544_s26 }
 0xc1d   :  { %3214 = vrot.lane.b32.xlu1 %v3955_v0, %s3542_s0 }
 0xc25   :  { %3224 = vrot.lane.b32.xlu1 %v3955_v0, %s3543_s25 }
 0xc2d   :  { %3234 = vrot.lane.b32.xlu1 %v3955_v0, %s3544_s26 }
 0xc35   :  { %3249 = vrot.lane.b32.xlu1 %v3945_v55, %s3545_s27 }
 0xc6f   :  { %v1286_v3 = vpop.xlane.xlu0 %1285 }
 0xc70   :  { %v1290_v4 = vmul.f32 %v1286_v3, %v3859_v61 }
 0xc72   :  { %v1292_v37 = vadd.f32 1e-05, %v1290_v4 }
 0xc74   :  { %3444 = vrsqrt.f32 %v1292_v37  ;;  %vm1300_vm15 = vweird.f32 %v1292_v37 }
 0xc77   :  { %v1289_v11 = vpop.xlane.xlu1 %1288 }
 0xc78   :  { %v1291_v12 = vmul.f32 %v1289_v11, %v3859_v61 }
 0xc7a   :  { %v3445_v21 = vpop.eup %3444  ;;  %v1293_v17 = vadd.f32 1e-05, %v1291_v12  ;;  %v3245_v12 = vpop.permute.xlu2 %3244 }
 0xc7b   :  { %v1295_v25 = vmul.f32 %v3445_v21, %v1292_v37  ;;  %vm1301_vm14 = vweird.f32 %v3445_v21  ;;  %v3221_v37 = vunpack.i.l.bf16 %v3220_v10 }
 0xc7c   :  { %3446 = vrsqrt.f32 %v1293_v17  ;;  %vm1302_vm2 = vmor %vm1300_vm15, %vm1301_vm14  ;;  %vm1310_vm7 = vweird.f32 %v1293_v17 }
 0xc7d   :  { %v1296_v26 = vmul.f32 %v3445_v21, %v1295_v25  ;;  %v3246_v25 = vunpack.i.l.bf16 %v3245_v12 }
 0xc7f   :  { %v1297_v27 = vmul.f32 0.5, %v1296_v26 }
 0xc81   :  { %v1298_v30 = vsub.f32 1.5, %v1297_v27 }
 0xc82   :  { %v3447_v32 = vpop.eup %3446 }
 0xc83   :  { %v1305_v33 = vmul.f32 %v3447_v32, %v1293_v17  ;;  %v1299_v34 = vmul.f32 %v3445_v21, %v1298_v30  ;;  %vm1311_vm3 = vweird.f32 %v3447_v32  ;;  %v3231_v30 = vunpack.i.l.bf16 %v3230_v48 }
 0xc84   :  { %vm1312_vm8 = vmor %vm1310_vm7, %vm1311_vm3 }
 0xc85   :  { %v1306_v35 = vmul.f32 %v3447_v32, %v1305_v33  ;;  %v1303_v44 = vsel %vm1302_vm2, %v3445_v21, %v1299_v34  ;;  %v3240_v33 = vpop.permute.xlu0 %3239 }
 0xc86   :  { %v1314_v38 = vmul.f32 %v1303_v44, %v1280_v46  ;;  %v3241_v44 = vunpack.i.l.bf16 %v3240_v33 }
 0xc87   :  { %v1307_v40 = vmul.f32 0.5, %v1306_v35 }
 0xc88   :  { %v1319_v41 = vmul.f32 %v1317_v1, %v1314_v38  ;;  %v3242_v38 = vunpack.i.h.bf16 %v3240_v33 }
 0xc89   :  { %v1308_v42 = vsub.f32 1.5, %v1307_v40 }
 0xc8a   :  { %v1324_v49 = vadd.f32 %v1322_v36, %v1319_v41 }
 0xc8b   :  { %v1309_v45 = vmul.f32 %v3447_v32, %v1308_v42 }
 0xc8c   :  { %v1326_v50 = vmul.f32 %v1324_v49, %v3908_v52 }
 0xc8d   :  { %v1313_v59 = vsel %vm1312_vm8, %v3447_v32, %v1309_v45  ;;  %v3232_v32 = vunpack.i.h.bf16 %v3230_v48 }
 0xc8e   :  { %v1315_v60 = vmul.f32 %v1313_v59, %v1281_v54  ;;  %v3975_v58 = vadd.f32 %v1326_v50, %v3911_v53  ;;  %v3222_v54 = vunpack.i.h.bf16 %v3220_v10 }
 0xc8f   :  { %v3215_v62 = vpop.permute.xlu1 %3214 }
 0xc90   :  { %v1320_v3 = vmul.f32 %v1317_v1, %v1315_v60  ;;  %v3216_v4 = vunpack.i.l.bf16 %v3215_v62  ;;  %3014 = vmatmul.msk.f32.vlgmr.msra.gmra.mxu2 %vm256_vm5, %v3975_v58  ;;  %v3217_v11 = vunpack.i.h.bf16 %v3215_v62 }
 0xc92   :  { %v1325_v46 = vadd.f32 %v1322_v36, %v1320_v3  ;;  %1397 = vmatpush.msrb.mxu1 %v3216_v4  ;;  %v3247_v36 = vunpack.i.h.bf16 %v3245_v12 }
 0xc94   :  { %v1327_v21 = vmul.f32 %v1325_v46, %v3919_v47  ;;  %1398 = vmatpush.msrb.mxu1 %v3217_v11 }
 0xc96   :  { %v3981_v17 = vadd.f32 %v1327_v21, %v3922_v2  ;;  %1399 = vmatpush.msrb.mxu1 %v3221_v37 }
 0xc97   :  { %v3225_v26 = vpop.permute.xlu1 %3224 }
 0xc98   :  { %v3227_v1 = vunpack.i.h.bf16 %v3225_v26  ;;  %v3226_v27 = vunpack.i.l.bf16 %v3225_v26  ;;  %3015 = vmatmul.msk.f32.gmra.mxu2 %vm256_vm5, %v3981_v17  ;;  %1400 = vmatpush.msrb.mxu1 %v3222_v54 }
 0xc99   :  { %3016 = vmatmul.msk.f32.vlgmr.msrb.gmra.mxu1 %vm256_vm5, %v3975_v58 }
 0xc9a   :  { %1435 = vmatpush.msra.mxu0 %v3226_v27  ;;  %1559 = vmatpush.msra.mxu1 %v3246_v25 }
 0xc9c   :  { %1436 = vmatpush.msra.mxu0 %v3227_v1  ;;  %1560 = vmatpush.msra.mxu1 %v3247_v36 }
 0xc9e   :  { %1437 = vmatpush.msra.mxu0 %v3231_v30 }
 0xc9f   :  { %v3235_v10 = vpop.permute.xlu1 %3234 }
 0xca0   :  { %v3237_v34 = vunpack.i.h.bf16 %v3235_v10  ;;  %v3236_v35 = vunpack.i.l.bf16 %v3235_v10  ;;  %1438 = vmatpush.msra.mxu0 %v3232_v32 }
 0xca1   :  { %3017 = vmatmul.msk.f32.gmra.mxu1 %vm256_vm5, %v3981_v17  ;;  %3018 = vmatmul.msk.f32.vlgmr.msra.gmra.mxu0 %vm256_vm5, %v3975_v58 }
 0xca2   :  { %1597 = vmatpush.msrb.mxu0 %v3236_v35 }
 0xca4   :  { %1598 = vmatpush.msrb.mxu0 %v3237_v34 }
 0xca6   :  { %1599 = vmatpush.msrb.mxu0 %v3241_v44 }
 0xca7   :  { %v3250_v40 = vpop.permute.xlu1 %3249 }
 0xca8   :  { %v3252_v41 = vunpack.i.h.bf16 %v3250_v40  ;;  %v3251_v42 = vunpack.i.l.bf16 %v3250_v40  ;;  %1600 = vmatpush.msrb.mxu0 %v3242_v38 }
 0xca9   :  { %3019 = vmatmul.msk.f32.gmra.mxu0 %vm256_vm5, %v3981_v17 }
 0xcaa   :  { %1561 = vmatpush.msra.mxu1 %v3251_v42 }
 0xcac   :  { %1562 = vmatpush.msra.mxu1 %v3252_v41 }
 0xcad   :  { %3026 = vmatmul.msk.f32.vlgmr.msra.gmra.mxu1 %vm256_vm5, %v3975_v58 }
 0xcb1   :  { %3028 = vmatmul.msk.f32.vlgmr.msrb.gmra.mxu0 %vm256_vm5, %v3975_v58 }
 0xcb5   :  { %3027 = vmatmul.msk.f32.gmra.mxu1 %vm256_vm5, %v3981_v17 }
 0xcb9   :  { %3029 = vmatmul.msk.f32.gmra.mxu0 %vm256_vm5, %v3981_v17 }
 0xd13   :  { %v1359_v50 = vpop.f32.mrf.mxu2 }
 0xd14   :  { %v1360_v60 = vadd.f32 %v3949_v63, %v1359_v50 }
 0xd16   :  { %v1402_v48 = vpop.f32.mrf.mxu1 }
 0xd17   :  { %v1403_v59 = vadd.f32 %v1402_v48, %v3971_v28 }
 0xd1b   :  { %v1362_v62 = vpop.f32.mrf.mxu2 }
 0xd1c   :  { %v1363_v3 = vadd.f32 %v3949_v63, %v1362_v62 }
 0xd1e   :  { %v1405_v49 = vpop.f32.mrf.mxu1  ;;  %v1440_v21 = vpop.f32.mrf.mxu0 }
 0xd1f   :  { %v1406_v45 = vadd.f32 %v1405_v49, %v3971_v28 }
 0xd21   :  { %3020 = vmatpush.xpose.msk.msrb.mxu3 %vm120_vm1, %v1406_v45 }
 0xd25   :  { %3021 = vmatpush.xpose.msk.msrb.mxu3 %vm120_vm1, %v1403_v59 }
 0xd26   :  { %v1443_v1 = vpop.f32.mrf.mxu0 }
 0xd28   :  { %3022 = vmatmul.msk.f32.vlgmr.msrb.gmra.mxu3 %vm120_vm1, %v1360_v60 }
 0xd2e   :  { %v1602_v59 = vpop.f32.mrf.mxu0 }
 0xd30   :  { %3023 = vmatmul.msk.f32.gmra.mxu3 %vm120_vm1, %v1363_v3 }
 0xd36   :  { %v1605_v3 = vpop.f32.mrf.mxu0 }
 0xdab   :  { %v1475_v4 = vpop.f32.mrf.mxu3 }
 0xdac   :  { %v1476_v46 = vadd.f32 %v1475_v4, %v3689_v39 }
 0xdae   :  { %v1481_v37 = vsel %vm51_vm0, %v1476_v46, -inf }
 0xdaf   :  { %1482 = vmax.xlane.f32.xlu2 %v1481_v37 }
 0xdb3   :  { %v1478_v11 = vpop.f32.mrf.mxu3 }
 0xdb4   :  { %v1479_v28 = vadd.f32 %v1478_v11, %v3693_v43 }
 0xdb6   :  { %v1484_v12 = vsel %vm51_vm0, %v1479_v28, -inf }
 0xdb7   :  { %1485 = vmax.xlane.f32.xlu1 %v1484_v12 }
 0xdc7   :  { %1420 = vrot.lane.b32.xlu2 %v3949_v63, %s3543_s25 }
 0xdcf   :  { %3254 = vrot.lane.b32.xlu2 %v3955_v0, %s3547_s28 }
 0xdd7   :  { %3264 = vrot.lane.b32.xlu2 %v3955_v0, %s3548_s29 }
 0xddf   :  { %3279 = vrot.lane.b32.xlu2 %v3945_v55, %s3541_s24 }
 0xe22   :  { %v1483_v54 = vpop.xlane.xlu2 %1482 }
 0xe23   :  { %v1487_v25 = vsub.f32 %v1476_v46, %v1483_v54 }
 0xe25   :  { %v1489_v26 = vmul.f32 1.442695, %v1487_v25 }
 0xe27   :  { %3448 = vpow2.f32 %v1489_v26 }
 0xe2a   :  { %v1486_v27 = vpop.xlane.xlu1 %1485  ;;  %v1421_v36 = vpop.permute.xlu2 %1420 }
 0xe2b   :  { %v1488_v30 = vsub.f32 %v1479_v28, %v1486_v27  ;;  %v1444_v32 = vadd.f32 %v1443_v1, %v1421_v36  ;;  %v1441_v34 = vadd.f32 %v1440_v21, %v1421_v36  ;;  %v1564_v21 = vpop.f32.mrf.mxu1 }
 0xe2d   :  { %v3449_v10 = vpop.eup %3448  ;;  %v1491_v33 = vmul.f32 1.442695, %v1488_v30  ;;  %1523 = vmatpush.msrb.mxu2 %v1444_v32 }
 0xe2e   :  { %v1493_v35 = vsel %vm51_vm0, %v3449_v10, 0.0 }
 0xe2f   :  { %3450 = vpow2.f32 %v1491_v33  ;;  %1494 = vadd.xlane.f32.xlu0 %v1493_v35  ;;  %1524 = vmatpush.msrb.mxu2 %v1441_v34 }
 0xe32   :  { %v3255_v40 = vpop.permute.xlu2 %3254 }
 0xe33   :  { %v3257_v41 = vunpack.i.h.bf16 %v3255_v40  ;;  %v3256_v42 = vunpack.i.l.bf16 %v3255_v40 }
 0xe35   :  { %v3451_v44 = vpop.eup %3450  ;;  %1635 = vmatpush.msra.mxu3 %v3256_v42 }
 0xe36   :  { %v1496_v38 = vsel %vm51_vm0, %v3451_v44, 0.0 }
 0xe37   :  { %1497 = vadd.xlane.f32.xlu1 %v1496_v38  ;;  %1636 = vmatpush.msra.mxu3 %v3257_v41 }
 0xe3a   :  { %v3265_v54 = vpop.permute.xlu2 %3264 }
 0xe3b   :  { %v3266_v25 = vunpack.i.l.bf16 %v3265_v54  ;;  %v3267_v1 = vunpack.i.h.bf16 %v3265_v54 }
 0xe42   :  { %v3280_v34 = vpop.permute.xlu2 %3279 }
 0xe43   :  { %1582 = vrot.lane.b32.xlu0 %v3949_v63, %s3544_s26  ;;  %v3281_v40 = vunpack.i.l.bf16 %v3280_v34  ;;  %v3282_v41 = vunpack.i.h.bf16 %v3280_v34 }
 0xe4b   :  { %3259 = vrot.lane.b32.xlu0 %v3945_v55, %s3547_s28 }
 0xe50   :  { %1544 = vrot.lane.b32.xlu1 %v3949_v63, %s3545_s27 }
 0xe53   :  { %3269 = vrot.lane.b32.xlu0 %v3945_v55, %s3548_s29 }
 0xe58   :  { %3274 = vrot.lane.b32.xlu1 %v3955_v0, %s3541_s24 }
 0xea2   :  { %v1495_v48 = vpop.xlane.xlu0 %1494 }
 0xea3   :  { %3452 = vrcp.f32 %v1495_v48 }
 0xea9   :  { %v3453_v49 = vpop.eup %3452 }
 0xeaa   :  { %v1501_v45 = vmul.f32 %v3453_v49, %v3449_v10  ;;  %v1498_v50 = vpop.xlane.xlu1 %1497  ;;  %v1567_v10 = vpop.f32.mrf.mxu1 }
 0xeab   :  { %3454 = vrcp.f32 %v1498_v50 }
 0xeac   :  { %3024 = vmatmul.msk.f32.vlgmr.msrb.gmra.mxu2 %vm51_vm0, %v1501_v45 }
 0xeb1   :  { %v3455_v60 = vpop.eup %3454 }
 0xeb2   :  { %v1502_v62 = vmul.f32 %v3455_v60, %v3451_v44 }
 0xeb4   :  { %3025 = vmatmul.msk.f32.gmra.mxu2 %vm51_vm0, %v1502_v62 }
 0xeb5   :  { %v1583_v4 = vpop.permute.xlu0 %1582 }
 0xeb6   :  { %v1606_v46 = vadd.f32 %v1605_v3, %v1583_v4  ;;  %v1603_v37 = vadd.f32 %v1602_v59, %v1583_v4 }
 0xeb8   :  { %3032 = vmatpush.xpose.msk.msra.mxu2 %vm120_vm1, %v1606_v46 }
 0xebc   :  { %3033 = vmatpush.xpose.msk.msra.mxu2 %vm120_vm1, %v1603_v37 }
 0xebd   :  { %v3260_v11 = vpop.permute.xlu0 %3259 }
 0xebe   :  { %v3262_v28 = vunpack.i.h.bf16 %v3260_v11  ;;  %v3261_v12 = vunpack.i.l.bf16 %v3260_v11 }
 0xec0   :  { %1637 = vmatpush.msra.mxu3 %v3261_v12 }
 0xec2   :  { %v1545_v26 = vpop.permute.xlu1 %1544  ;;  %1638 = vmatpush.msra.mxu3 %v3262_v28 }
 0xec3   :  { %v1565_v27 = vadd.f32 %v1564_v21, %v1545_v26  ;;  %3030 = vmatmul.msk.f32.vlgmr.msra.gmra.mxu3 %vm256_vm5, %v3975_v58  ;;  %v1568_v35 = vadd.f32 %v1567_v10, %v1545_v26 }
 0xec4   :  { %1797 = vmatpush.msrb.mxu3 %v3266_v25 }
 0xec5   :  { %3034 = vmatmul.msk.f32.vlgmr.msra.gmra.mxu2 %vm120_vm1, %v1565_v27  ;;  %v3270_v36 = vpop.permute.xlu0 %3269 }
 0xec6   :  { %v3272_v30 = vunpack.i.h.bf16 %v3270_v36  ;;  %v3271_v32 = vunpack.i.l.bf16 %v3270_v36  ;;  %1798 = vmatpush.msrb.mxu3 %v3267_v1 }
 0xec8   :  { %1799 = vmatpush.msrb.mxu3 %v3271_v32 }
 0xeca   :  { %v3275_v33 = vpop.permute.xlu1 %3274  ;;  %1800 = vmatpush.msrb.mxu3 %v3272_v30 }
 0xecb   :  { %v3277_v44 = vunpack.i.h.bf16 %v3275_v33  ;;  %v3276_v38 = vunpack.i.l.bf16 %v3275_v33  ;;  %3031 = vmatmul.msk.f32.gmra.mxu3 %vm256_vm5, %v3981_v17 }
 0xecd   :  { %1759 = vmatpush.msra.mxu0 %v3276_v38  ;;  %3035 = vmatmul.msk.f32.gmra.mxu2 %vm120_vm1, %v1568_v35 }
 0xecf   :  { %1760 = vmatpush.msra.mxu0 %v3277_v44 }
 0xed1   :  { %1761 = vmatpush.msra.mxu0 %v3281_v40 }
 0xed3   :  { %1762 = vmatpush.msra.mxu0 %v3282_v41  ;;  %3040 = vmatmul.msk.f32.vlgmr.msrb.gmra.mxu3 %vm256_vm5, %v3975_v58 }
 0xed4   :  { %3038 = vmatmul.msk.f32.vlgmr.msra.gmra.mxu0 %vm256_vm5, %v3975_v58 }
 0xedb   :  { %3041 = vmatmul.msk.f32.gmra.mxu3 %vm256_vm5, %v3981_v17 }
 0xedc   :  { %3039 = vmatmul.msk.f32.gmra.mxu0 %vm256_vm5, %v3981_v17 }
 0xf2f   :  { %v4051_v42 = vpop.f32.mrf.mxu2 }
 0xf37   :  { %v4053_v48 = vpop.f32.mrf.mxu2 }
 0xf46   :  { %v1640_v11 = vpop.f32.mrf.mxu3 }
 0xf48   :  { %v1675_v49 = vpop.f32.mrf.mxu2 }
 0xf49   :  { %v1676_v45 = vadd.f32 %v1675_v49, %v3689_v39 }
 0xf4b   :  { %v1681_v50 = vsel %vm51_vm0, %v1676_v45, -inf }
 0xf4c   :  { %1682 = vmax.xlane.f32.xlu0 %v1681_v50 }
 0xf4e   :  { %v1643_v26 = vpop.f32.mrf.mxu3 }
 0xf50   :  { %v1678_v59 = vpop.f32.mrf.mxu2 }
 0xf51   :  { %v1679_v60 = vadd.f32 %v1678_v59, %v3693_v43 }
 0xf53   :  { %v1684_v62 = vsel %vm51_vm0, %v1679_v60, -inf }
 0xf54   :  { %1685 = vmax.xlane.f32.xlu1 %v1684_v62 }
 0xf56   :  { %v1802_v34 = vpop.f32.mrf.mxu3 }
 0xf5e   :  { %v1805_v38 = vpop.f32.mrf.mxu3 }
 0xf60   :  { %1620 = vrot.lane.b32.xlu0 %v3949_v63, %s3547_s28 }
 0xf68   :  { %3284 = vrot.lane.b32.xlu0 %v3955_v0, %s3540_s22 }
 0xf70   :  { %3294 = vrot.lane.b32.xlu0 %v3955_v0, %s3549_s30 }
 0xf78   :  { %3309 = vrot.lane.b32.xlu0 %v3945_v55, %s3550_s4 }
 0xfbf   :  { %v1683_v3 = vpop.xlane.xlu0 %1682 }
 0xfc0   :  { %v1687_v4 = vsub.f32 %v1676_v45, %v1683_v3 }
 0xfc2   :  { %v1689_v46 = vmul.f32 1.442695, %v1687_v4 }
 0xfc4   :  { %3456 = vpow2.f32 %v1689_v46 }
 0xfc7   :  { %v1686_v37 = vpop.xlane.xlu1 %1685 }
 0xfc8   :  { %v1688_v28 = vsub.f32 %v1679_v60, %v1686_v37 }
 0xfca   :  { %v3457_v12 = vpop.eup %3456  ;;  %v1691_v21 = vmul.f32 1.442695, %v1688_v28 }
 0xfcb   :  { %v1693_v54 = vsel %vm51_vm0, %v3457_v12, 0.0 }
 0xfcc   :  { %3458 = vpow2.f32 %v1691_v21  ;;  %1694 = vadd.xlane.f32.xlu2 %v1693_v54 }
 0xfd2   :  { %v3459_v25 = vpop.eup %3458  ;;  %v1621_v1 = vpop.permute.xlu0 %1620 }
 0xfd3   :  { %v1644_v27 = vadd.f32 %v1643_v26, %v1621_v1  ;;  %v1696_v36 = vsel %vm51_vm0, %v3459_v25, 0.0  ;;  %v1641_v30 = vadd.f32 %v1640_v11, %v1621_v1  ;;  %v1764_v1 = vpop.f32.mrf.mxu0 }
 0xfd4   :  { %1697 = vadd.xlane.f32.xlu1 %v1696_v36 }
 0xfd5   :  { %1723 = vmatpush.msrb.mxu1 %v1644_v27 }
 0xfd7   :  { %1724 = vmatpush.msrb.mxu1 %v1641_v30 }
 0xfda   :  { %v3285_v32 = vpop.permute.xlu0 %3284 }
 0xfdb   :  { %v3287_v10 = vunpack.i.h.bf16 %v3285_v32  ;;  %v3286_v33 = vunpack.i.l.bf16 %v3285_v32  ;;  %v1767_v30 = vpop.f32.mrf.mxu0 }
 0xfdd   :  { %1835 = vmatpush.msrb.mxu2 %v3286_v33 }
 0xfdf   :  { %1836 = vmatpush.msrb.mxu2 %v3287_v10 }
 0xfe2   :  { %v3295_v59 = vpop.permute.xlu0 %3294 }
 0xfe3   :  { %v3296_v37 = vunpack.i.l.bf16 %v3295_v59  ;;  %v3297_v11 = vunpack.i.h.bf16 %v3295_v59 }
 0xfe4   :  { %1782 = vrot.lane.b32.xlu2 %v3949_v63, %s3548_s29 }
 0xfec   :  { %3289 = vrot.lane.b32.xlu2 %v3945_v55, %s3540_s22 }
 0xfed   :  { %1744 = vrot.lane.b32.xlu1 %v3949_v63, %s3541_s24 }
 0xff4   :  { %3304 = vrot.lane.b32.xlu2 %v3955_v0, %s3550_s4 }
 0xff5   :  { %3299 = vrot.lane.b32.xlu1 %v3945_v55, %s3549_s30 }
0x103f   :  { %v1695_v35 = vpop.xlane.xlu2 %1694 }
0x1040   :  { %3460 = vrcp.f32 %v1695_v35 }
0x1046   :  { %v3461_v44 = vpop.eup %3460 }
0x1047   :  { %v1701_v40 = vmul.f32 %v3461_v44, %v3457_v12  ;;  %v1698_v41 = vpop.xlane.xlu1 %1697  ;;  %v1783_v49 = vpop.permute.xlu2 %1782 }
0x1048   :  { %3462 = vrcp.f32 %v1698_v41  ;;  %v1806_v45 = vadd.f32 %v1805_v38, %v1783_v49  ;;  %v1803_v50 = vadd.f32 %v1802_v34, %v1783_v49  ;;  %v3310_v12 = vpop.permute.xlu0 %3309 }
0x1049   :  { %3036 = vmatmul.msk.f32.vlgmr.msrb.gmra.mxu1 %vm51_vm0, %v1701_v40  ;;  %v3311_v26 = vunpack.i.l.bf16 %v3310_v12 }
0x104a   :  { %3044 = vmatpush.xpose.msk.msra.mxu1 %vm120_vm1, %v1806_v45 }
0x104e   :  { %v3463_v60 = vpop.eup %3462  ;;  %3045 = vmatpush.xpose.msk.msra.mxu1 %vm120_vm1, %v1803_v50 }
0x104f   :  { %v3290_v62 = vpop.permute.xlu2 %3289  ;;  %v1702_v3 = vmul.f32 %v3463_v60, %v3459_v25  ;;  %v3312_v25 = vunpack.i.h.bf16 %v3310_v12 }
0x1050   :  { %v3292_v4 = vunpack.i.h.bf16 %v3290_v62  ;;  %v3291_v46 = vunpack.i.l.bf16 %v3290_v62 }
0x1051   :  { %3037 = vmatmul.msk.f32.gmra.mxu1 %vm51_vm0, %v1702_v3 }
0x1052   :  { %1837 = vmatpush.msrb.mxu2 %v3291_v46 }
0x1054   :  { %1838 = vmatpush.msrb.mxu2 %v3292_v4 }
0x1055   :  { %3042 = vmatmul.msk.f32.vlgmr.msrb.gmra.mxu2 %vm256_vm5, %v3975_v58 }
0x1056   :  { %1997 = vmatpush.msra.mxu2 %v3296_v37 }
0x1057   :  { %v3305_v28 = vpop.permute.xlu2 %3304 }
0x1058   :  { %v3307_v21 = vunpack.i.h.bf16 %v3305_v28  ;;  %v3306_v54 = vunpack.i.l.bf16 %v3305_v28  ;;  %1998 = vmatpush.msra.mxu2 %v3297_v11 }
0x105a   :  { %1959 = vmatpush.msra.mxu3 %v3306_v54 }
0x105c   :  { %1960 = vmatpush.msra.mxu3 %v3307_v21 }
0x105d   :  { %3043 = vmatmul.msk.f32.gmra.mxu2 %vm256_vm5, %v3981_v17 }
0x105e   :  { %1961 = vmatpush.msra.mxu3 %v3311_v26 }
0x105f   :  { %v1745_v27 = vpop.permute.xlu1 %1744 }
0x1060   :  { %v1765_v36 = vadd.f32 %v1764_v1, %v1745_v27  ;;  %1962 = vmatpush.msra.mxu3 %v3312_v25  ;;  %v1768_v10 = vadd.f32 %v1767_v30, %v1745_v27 }
0x1061   :  { %3050 = vmatmul.msk.f32.vlgmr.msra.gmra.mxu3 %vm256_vm5, %v3975_v58 }
0x1062   :  { %3046 = vmatmul.msk.f32.vlgmr.msra.gmra.mxu1 %vm120_vm1, %v1765_v36 }
0x1067   :  { %v3300_v32 = vpop.permute.xlu1 %3299 }
0x1068   :  { %v3302_v33 = vunpack.i.h.bf16 %v3300_v32  ;;  %v3301_v34 = vunpack.i.l.bf16 %v3300_v32 }
0x1069   :  { %3051 = vmatmul.msk.f32.gmra.mxu3 %vm256_vm5, %v3981_v17 }
0x106a   :  { %3047 = vmatmul.msk.f32.gmra.mxu1 %vm120_vm1, %v1768_v10  ;;  %1999 = vmatpush.msra.mxu2 %v3301_v34 }
0x106c   :  { %2000 = vmatpush.msra.mxu2 %v3302_v33 }
0x106d   :  { %3052 = vmatmul.msk.f32.vlgmr.msra.gmra.mxu2 %vm256_vm5, %v3975_v58 }
0x1075   :  { %3053 = vmatmul.msk.f32.gmra.mxu2 %vm256_vm5, %v3981_v17 }
0x10c6   :  { %v4097_v35 = vpop.f32.mrf.mxu1 }
0x10ce   :  { %v4099_v44 = vpop.f32.mrf.mxu1 }
0x10d8   :  { %v1840_v28 = vpop.f32.mrf.mxu2 }
0x10df   :  { %v1875_v38 = vpop.f32.mrf.mxu1 }
0x10e0   :  { %v1876_v40 = vadd.f32 %v1875_v38, %v3689_v39  ;;  %v1843_v54 = vpop.f32.mrf.mxu2 }
0x10e2   :  { %v1881_v41 = vsel %vm51_vm0, %v1876_v40, -inf }
0x10e3   :  { %1882 = vmax.xlane.f32.xlu1 %v1881_v41 }
0x10e7   :  { %v1878_v49 = vpop.f32.mrf.mxu1 }
0x10e8   :  { %v1879_v45 = vadd.f32 %v1878_v49, %v3693_v43 }
0x10ea   :  { %v1884_v50 = vsel %vm51_vm0, %v1879_v45, -inf }
0x10eb   :  { %1885 = vmax.xlane.f32.xlu2 %v1884_v50 }
0x10f0   :  { %v2002_v32 = vpop.f32.mrf.mxu2 }
0x10f8   :  { %v2005_v34 = vpop.f32.mrf.mxu2 }
0x10fc   :  { %1820 = vrot.lane.b32.xlu1 %v3949_v63, %s3540_s22 }
0x1104   :  { %3319 = vrot.lane.b32.xlu1 %v3945_v55, %s3551_s5 }
0x1156   :  { %v1883_v59 = vpop.xlane.xlu1 %1882 }
0x1157   :  { %v1887_v60 = vsub.f32 %v1876_v40, %v1883_v59 }
0x1159   :  { %v1889_v62 = vmul.f32 1.442695, %v1887_v60 }
0x115b   :  { %3464 = vpow2.f32 %v1889_v62 }
0x115e   :  { %v1886_v3 = vpop.xlane.xlu2 %1885 }
0x115f   :  { %v1888_v4 = vsub.f32 %v1879_v45, %v1886_v3 }
0x1161   :  { %v3465_v46 = vpop.eup %3464  ;;  %v1891_v37 = vmul.f32 1.442695, %v1888_v4 }
0x1162   :  { %v1893_v11 = vsel %vm51_vm0, %v3465_v46, 0.0 }
0x1163   :  { %3466 = vpow2.f32 %v1891_v37  ;;  %1894 = vadd.xlane.f32.xlu0 %v1893_v11 }
0x1169   :  { %v3467_v12 = vpop.eup %3466 }
0x116a   :  { %v1896_v21 = vsel %vm51_vm0, %v3467_v12, 0.0 }
0x116b   :  { %1897 = vadd.xlane.f32.xlu2 %v1896_v21 }
0x116e   :  { %v1821_v26 = vpop.permute.xlu1 %1820 }
0x116f   :  { %v1844_v25 = vadd.f32 %v1843_v54, %v1821_v26  ;;  %v1841_v1 = vadd.f32 %v1840_v28, %v1821_v26 }
0x1171   :  { %1923 = vmatpush.msrb.mxu0 %v1844_v25 }
0x1173   :  { %1924 = vmatpush.msrb.mxu0 %v1841_v1 }
0x1176   :  { %v3320_v59 = vpop.permute.xlu1 %3319 }
0x1177   :  { %1982 = vrot.lane.b32.xlu0 %v3949_v63, %s3549_s30  ;;  %v3321_v3 = vunpack.i.l.bf16 %v3320_v59  ;;  %v3322_v4 = vunpack.i.h.bf16 %v3320_v59  ;;  %v4146_v59 = vld [vmem:[#allocation2 + $0x170] ss:$0 sm:$0xff] }
0x117f   :  { %3314 = vrot.lane.b32.xlu0 %v3955_v0, %s3551_s5  ;;  %v1964_v0 = vpop.f32.mrf.mxu3 }
0x1183   :  { %1944 = vrot.lane.b32.xlu2 %v3949_v63, %s3550_s4 }
0x11d6   :  { %v1895_v55 = vpop.xlane.xlu0 %1894 }
0x11d7   :  { %3468 = vrcp.f32 %v1895_v55  ;;  %v3504_v55 = vld [vmem:[#allocation2 + $0x158] sm:$0xff] }
0x11dd   :  { %v3469_v27 = vpop.eup %3468 }
0x11de   :  { %v1901_v36 = vmul.f32 %v3469_v27, %v3465_v46  ;;  %v1898_v30 = vpop.xlane.xlu2 %1897  ;;  %v1967_v46 = vpop.f32.mrf.mxu3  ;;  %v3505_v27 = vld [vmem:[#allocation2 + $0x150] sm:$0xff] }
0x11df   :  { %3470 = vrcp.f32 %v1898_v30 }
0x11e0   :  { %3048 = vmatmul.msk.f32.vlgmr.msrb.gmra.mxu0 %vm51_vm0, %v1901_v36  ;;  %v3328_v36 = vpack.i.bf16 %v3505_v27, %v3504_v55 }
0x11e5   :  { %v3471_v10 = vpop.eup %3470 }
0x11e6   :  { %v1902_v33 = vmul.f32 %v3471_v10, %v3467_v12  ;;  %v1945_v41 = vpop.permute.xlu2 %1944 }
0x11e7   :  { %v1965_v45 = vadd.f32 %v1964_v0, %v1945_v41  ;;  %v1968_v37 = vadd.f32 %v1967_v46, %v1945_v41 }
0x11e8   :  { %3049 = vmatmul.msk.f32.gmra.mxu0 %vm51_vm0, %v1902_v33 }
0x11e9   :  { %v1983_v38 = vpop.permute.xlu0 %1982 }
0x11ea   :  { %v2006_v40 = vadd.f32 %v2005_v34, %v1983_v38  ;;  %v2003_v49 = vadd.f32 %v2002_v32, %v1983_v38 }
0x11ec   :  { %3056 = vmatpush.xpose.msk.msra.mxu0 %vm120_vm1, %v2006_v40 }
0x11f0   :  { %3057 = vmatpush.xpose.msk.msra.mxu0 %vm120_vm1, %v2003_v49 }
0x11f1   :  { %v3315_v50 = vpop.permute.xlu0 %3314 }
0x11f2   :  { %v3317_v60 = vunpack.i.h.bf16 %v3315_v50  ;;  %v3316_v62 = vunpack.i.l.bf16 %v3315_v50 }
0x11f3   :  { %3058 = vmatmul.msk.f32.vlgmr.msra.gmra.mxu0 %vm120_vm1, %v1965_v45 }
0x11f4   :  { %2035 = vmatpush.msrb.mxu1 %v3316_v62 }
0x11f6   :  { %2036 = vmatpush.msrb.mxu1 %v3317_v60 }
0x11f8   :  { %2037 = vmatpush.msrb.mxu1 %v3321_v3 }
0x11fa   :  { %2038 = vmatpush.msrb.mxu1 %v3322_v4 }
0x11fb   :  { %3054 = vmatmul.msk.f32.vlgmr.msrb.gmra.mxu1 %vm256_vm5, %v3975_v58  ;;  %3059 = vmatmul.msk.f32.gmra.mxu0 %vm120_vm1, %v1968_v37 }
0x1203   :  { %3055 = vmatmul.msk.f32.gmra.mxu1 %vm256_vm5, %v3981_v17 }
0x125d   :  { %v1926_v11 = vpop.f32.mrf.mxu0 }
0x1265   :  { %v1929_v28 = vpop.f32.mrf.mxu0 }
0x1270   :  { %v2075_v12 = vpop.f32.mrf.mxu0 }
0x1271   :  { %v2076_v21 = vadd.f32 %v2075_v12, %v3689_v39 }
0x1273   :  { %v2081_v54 = vsel %vm51_vm0, %v2076_v21, -inf }
0x1274   :  { %2082 = vmax.xlane.f32.xlu0 %v2081_v54 }
0x1278   :  { %v2078_v26 = vpop.f32.mrf.mxu0 }
0x1279   :  { %v2079_v25 = vadd.f32 %v2078_v26, %v3693_v43 }
0x127b   :  { %v2084_v1 = vsel %vm51_vm0, %v2079_v25, -inf }
0x127c   :  { %2085 = vmax.xlane.f32.xlu1 %v2084_v1 }
0x1288   :  { %2020 = vrot.lane.b32.xlu0 %v3949_v63, %s3551_s5  ;;  %v2040_v63 = vpop.f32.mrf.mxu1 }
0x1290   :  { %3329 = vrot.lane.b32.xlu0 %v3328_v36, %s3544_s26  ;;  %v2043_v56 = vpop.f32.mrf.mxu1 }
0x1295   :  { %3324 = vrot.lane.b32.xlu1 %v3323_v57, %s3544_s26 }
0x129d   :  { %2142 = vrot.lane.b32.xlu1 %v1926_v11, %s3552_s6 }
0x12a5   :  { %2144 = vrot.lane.b32.xlu1 %v1929_v28, %s3552_s6 }
0x12e7   :  { %v2083_v39 = vpop.xlane.xlu0 %2082 }
0x12e8   :  { %v2087_v43 = vsub.f32 %v2076_v21, %v2083_v39 }
0x12ea   :  { %v2089_v30 = vmul.f32 1.442695, %v2087_v43 }
0x12ec   :  { %3472 = vpow2.f32 %v2089_v30 }
0x12ef   :  { %v2086_v32 = vpop.xlane.xlu1 %2085 }
0x12f0   :  { %v2088_v10 = vsub.f32 %v2079_v25, %v2086_v32 }
0x12f2   :  { %v3473_v33 = vpop.eup %3472  ;;  %v2091_v34 = vmul.f32 1.442695, %v2088_v10 }
0x12f3   :  { %v2093_v38 = vsel %vm51_vm0, %v3473_v33, 0.0 }
0x12f4   :  { %3474 = vpow2.f32 %v2091_v34  ;;  %2094 = vadd.xlane.f32.xlu2 %v2093_v38 }
0x12fa   :  { %v3475_v40 = vpop.eup %3474  ;;  %v2021_v15 = vpop.permute.xlu0 %2020 }
0x12fb   :  { %v2044_v57 = vadd.f32 %v2043_v56, %v2021_v15  ;;  %v2096_v0 = vsel %vm51_vm0, %v3475_v40, 0.0  ;;  %v2041_v41 = vadd.f32 %v2040_v63, %v2021_v15  ;;  %v4168_v15 = vld [vmem:[#allocation2 + $0x188] ss:$0 sm:$0xff] }
0x12fc   :  { %2097 = vadd.xlane.f32.xlu2 %v2096_v0 }
0x12fd   :  { %2123 = vmatpush.msrb.mxu3 %v2044_v57 }
0x12ff   :  { %2124 = vmatpush.msrb.mxu3 %v2041_v41 }
0x1307   :  { %v3325_v49 = vpop.permute.xlu1 %3324 }
0x1308   :  { %v3327_v45 = vunpack.i.h.bf16 %v3325_v49  ;;  %v3326_v50 = vunpack.i.l.bf16 %v3325_v49 }
0x130a   :  { %2199 = vmatpush.msrb.mxu2 %v3326_v50 }
0x130c   :  { %2200 = vmatpush.msrb.mxu2 %v3327_v45 }
0x130f   :  { %v2143_v54 = vpop.permute.xlu1 %2142 }
0x1314   :  { %2134 = vrot.lane.b32.xlu2 %v4097_v35, %s3538_s18  ;;  %v3330_v35 = vpop.permute.xlu0 %3329 }
0x1315   :  { %v3332_v11 = vunpack.i.h.bf16 %v3330_v35 }
0x1317   :  { %v2145_v39 = vpop.permute.xlu1 %2144 }
0x131c   :  { %2136 = vrot.lane.b32.xlu2 %v4099_v44, %s3538_s18  ;;  %v3331_v44 = vunpack.i.l.bf16 %v3330_v35 }
0x131e   :  { %2201 = vmatpush.msrb.mxu2 %v3331_v44 }
0x1320   :  { %2202 = vmatpush.msrb.mxu2 %v3332_v11 }
0x1324   :  { %2178 = vrot.lane.b32.xlu2 %v4146_v59, %s3544_s26 }
0x1367   :  { %v2095_v60 = vpop.xlane.xlu2 %2094 }
0x1368   :  { %3476 = vrcp.f32 %v2095_v60 }
0x136e   :  { %v3477_v62 = vpop.eup %3476 }
0x136f   :  { %v2101_v3 = vmul.f32 %v3477_v62, %v3473_v33  ;;  %v2098_v4 = vpop.xlane.xlu2 %2097 }
0x1370   :  { %3478 = vrcp.f32 %v2098_v4 }
0x1371   :  { %3060 = vmatmul.msk.f32.vlgmr.msrb.gmra.mxu3 %vm51_vm0, %v2101_v3 }
0x1376   :  { %v3479_v46 = vpop.eup %3478 }
0x1377   :  { %v2102_v37 = vmul.f32 %v3479_v46, %v3475_v40  ;;  %v2135_v21 = vpop.permute.xlu2 %2134 }
0x1378   :  { %v2156_v26 = vsel %vm120_vm1, %v4051_v42, %v2135_v21 }
0x1379   :  { %3061 = vmatmul.msk.f32.gmra.mxu3 %vm51_vm0, %v2102_v37  ;;  %v2158_v25 = vsel %vm51_vm0, %v2156_v26, %v2143_v54 }
0x137f   :  { %v2137_v27 = vpop.permute.xlu2 %2136 }
0x1380   :  { %v2157_v36 = vsel %vm120_vm1, %v4053_v48, %v2137_v27 }
0x1381   :  { %v2159_v43 = vsel %vm51_vm0, %v2157_v36, %v2145_v39 }
0x1387   :  { %v2179_v42 = vpop.permute.xlu2 %2178 }
0x13f4   :  { %v2126_v28 = vpop.f32.mrf.mxu3 }
0x13f5   :  { %2150 = vrot.lane.b32.xlu0 %v2126_v28, %s3553_s7 }
0x13fc   :  { %v2129_v12 = vpop.f32.mrf.mxu3 }
0x13fd   :  { %2152 = vrot.lane.b32.xlu0 %v2129_v12, %s3553_s7 }
0x1467   :  { %v2151_v1 = vpop.permute.xlu0 %2150 }
0x1468   :  { %v2160_v55 = vsel %vm1087_vm6, %v2158_v25, %v2151_v1 }
0x1469   :  { %3062 = vmatmul.msk.f32.vlgmr.msrb.gmra.mxu2 %vm256_vm5, %v2160_v55 }
0x146f   :  { %v2153_v30 = vpop.permute.xlu0 %2152 }
0x1470   :  { %v2161_v32 = vsel %vm1087_vm6, %v2159_v43, %v2153_v30 }
0x1471   :  { %3063 = vmatmul.msk.f32.gmra.mxu2 %vm256_vm5, %v2161_v32 }
0x14ec   :  { %v2204_v63 = vpop.f32.mrf.mxu2 }
0x14ed   :  { %v2205_v10 = vadd.f32 %v2204_v63, %v2179_v42 }
0x14ef   :  { %v2210_v33 = vadd.f32 %v2205_v10, %v3975_v58 }
0x14f1   :  { %v2213_v34 = vsel %vm256_vm5, %v2210_v33, 0.0 }
0x14f2   :  { %2214 = vadd.xlane.f32.xlu1 %v2213_v34 }
0x14f4   :  { %v2207_v38 = vpop.f32.mrf.mxu2 }
0x14f5   :  { %v2208_v40 = vadd.f32 %v2207_v38, %v2179_v42 }
0x14f7   :  { %v2211_v48 = vadd.f32 %v2208_v40, %v3981_v17 }
0x14f9   :  { %v2216_v56 = vsel %vm256_vm5, %v2211_v48, 0.0 }
0x14fa   :  { %2217 = vadd.xlane.f32.xlu0 %v2216_v56 }
0x150e   :  { %2261 = vrot.lane.b32.xlu0 %v4168_v15, %s3544_s26 }
0x1516   :  { %3334 = vrot.lane.b32.xlu0 %v3333_v13, %s3540_s22 }
0x151e   :  { %3339 = vrot.lane.b32.xlu0 %v3338_v14, %s3540_s22 }
0x1526   :  { %3344 = vrot.lane.b32.xlu0 %v3343_v20, %s3544_s26 }
0x152e   :  { %2301 = vrot.lane.b32.xlu0 %v3507_v23, %s3540_s22 }
0x1565   :  { %v2215_v58 = vpop.xlane.xlu1 %2214 }
0x1566   :  { %v2219_v57 = vmul.f32 %v2215_v58, %v3859_v61 }
0x1568   :  { %v2221_v17 = vsub.f32 %v2210_v33, %v2219_v57  ;;  %v3508_v57 = vld [vmem:[#allocation2 + $0x1c8] sm:$0xff] }
0x156a   :  { %v2223_v0 = vmul.f32 %v2221_v17, %v2221_v17 }
0x156c   :  { %v2225_v41 = vsel %vm256_vm5, %v2223_v0, 0.0 }
0x156d   :  { %2226 = vadd.xlane.f32.xlu2 %v2225_v41  ;;  %v2218_v49 = vpop.xlane.xlu0 %2217 }
0x156e   :  { %v2220_v45 = vmul.f32 %v2218_v49, %v3859_v61 }
0x1570   :  { %v2222_v7 = vsub.f32 %v2211_v48, %v2220_v45 }
0x1572   :  { %v2224_v8 = vmul.f32 %v2222_v7, %v2222_v7 }
0x1574   :  { %v2228_v13 = vsel %vm256_vm5, %v2224_v8, 0.0 }
0x1575   :  { %2229 = vadd.xlane.f32.xlu1 %v2228_v13 }
0x1580   :  { %v4191_v54 = vpop.permute.xlu0 %2261 }
0x1588   :  { %v3335_v63 = vpop.permute.xlu0 %3334 }
0x1589   :  { %v3337_v10 = vunpack.i.h.bf16 %v3335_v63  ;;  %v3336_v33 = vunpack.i.l.bf16 %v3335_v63 }
0x158b   :  { %2320 = vmatpush.msra.mxu1 %v3336_v33 }
0x158d   :  { %2321 = vmatpush.msra.mxu1 %v3337_v10 }
0x1590   :  { %v3340_v34 = vpop.permute.xlu0 %3339 }
0x1591   :  { %v3342_v38 = vunpack.i.h.bf16 %v3340_v34  ;;  %v3341_v40 = vunpack.i.l.bf16 %v3340_v34 }
0x1593   :  { %2322 = vmatpush.msra.mxu1 %v3341_v40 }
0x1595   :  { %2323 = vmatpush.msra.mxu1 %v3342_v38 }
0x15e0   :  { %v2227_v9 = vpop.xlane.xlu2 %2226 }
0x15e1   :  { %v2231_v14 = vmul.f32 %v2227_v9, %v3859_v61 }
0x15e3   :  { %v2233_v50 = vadd.f32 1e-05, %v2231_v14 }
0x15e5   :  { %3480 = vrsqrt.f32 %v2233_v50  ;;  %vm2241_vm1 = vweird.f32 %v2233_v50 }
0x15e8   :  { %v2230_v60 = vpop.xlane.xlu1 %2229 }
0x15e9   :  { %v2232_v62 = vmul.f32 %v2230_v60, %v3859_v61 }
0x15eb   :  { %v3481_v3 = vpop.eup %3480  ;;  %v2234_v4 = vadd.f32 1e-05, %v2232_v62 }
0x15ec   :  { %v2236_v18 = vmul.f32 %v3481_v3, %v2233_v50  ;;  %vm2242_vm0 = vweird.f32 %v3481_v3 }
0x15ed   :  { %3482 = vrsqrt.f32 %v2234_v4  ;;  %vm2243_vm6 = vmor %vm2241_vm1, %vm2242_vm0  ;;  %vm2251_vm10 = vweird.f32 %v2234_v4 }
0x15ee   :  { %v2237_v19 = vmul.f32 %v3481_v3, %v2236_v18 }
0x15f0   :  { %v2238_v20 = vmul.f32 0.5, %v2237_v19 }
0x15f2   :  { %v2239_v46 = vsub.f32 1.5, %v2238_v20 }
0x15f3   :  { %v3483_v37 = vpop.eup %3482 }
0x15f4   :  { %v2240_v35 = vmul.f32 %v3481_v3, %v2239_v46  ;;  %v2246_v11 = vmul.f32 %v3483_v37, %v2234_v4  ;;  %vm2252_vm9 = vweird.f32 %v3483_v37 }
0x15f5   :  { %vm2253_vm11 = vmor %vm2251_vm10, %vm2252_vm9 }
0x15f6   :  { %v2244_v44 = vsel %vm2243_vm6, %v3481_v3, %v2240_v35  ;;  %v2247_v28 = vmul.f32 %v3483_v37, %v2246_v11 }
0x15f7   :  { %v2255_v12 = vmul.f32 %v2244_v44, %v2221_v17  ;;  %v3509_v17 = vld [vmem:[#allocation2 + $0x1c0] sm:$0xff] }
0x15f8   :  { %v2248_v21 = vmul.f32 0.5, %v2247_v28  ;;  %v3353_v22 = vpack.i.bf16 %v3509_v17, %v3508_v57 }
0x15f9   :  { %v2258_v26 = vmul.f32 %v4168_v15, %v2255_v12 }
0x15fa   :  { %v2249_v25 = vsub.f32 1.5, %v2248_v21 }
0x15fb   :  { %v2264_v1 = vadd.f32 %v4191_v54, %v2258_v26 }
0x15fc   :  { %v2250_v55 = vmul.f32 %v3483_v37, %v2249_v25 }
0x15fd   :  { %2268 = vrot.lane.b32.xlu2 %v2264_v1, %s3555_s8 }
0x15fe   :  { %v2254_v27 = vsel %vm2253_vm11, %v3483_v37, %v2250_v55 }
0x15ff   :  { %v2256_v36 = vmul.f32 %v2254_v27, %v2222_v7 }
0x1601   :  { %v2259_v39 = vmul.f32 %v4168_v15, %v2256_v36 }
0x1603   :  { %v2265_v43 = vadd.f32 %v4191_v54, %v2259_v39 }
0x1605   :  { %2270 = vrot.lane.b32.xlu1 %v2265_v43, %s3555_s8 }
0x1657   :  { %v2269_v30 = vpop.permute.xlu2 %2268 }
0x1658   :  { %v2274_v32 = vmul.f32 %v2269_v30, %v3908_v52 }
0x165a   :  { %v4201_v42 = vadd.f32 %v2274_v32, %v3911_v53 }
0x165c   :  { %2280 = vrot.lane.b32.xlu2 %v4201_v42, %s3544_s26 }
0x1664   :  { %3349 = vrot.lane.b32.xlu2 %v3348_v16, %s3544_s26  ;;  %v3345_v16 = vpop.permute.xlu0 %3344 }
0x1665   :  { %v3347_v6 = vunpack.i.h.bf16 %v3345_v16 }
0x166c   :  { %3359 = vrot.lane.b32.xlu2 %v3358_v51, %s3544_s26  ;;  %v3346_v51 = vunpack.i.l.bf16 %v3345_v16  ;;  %v2302_v9 = vpop.permute.xlu0 %2301 }
0x166e   :  { %2382 = vmatpush.msrb.mxu0 %v3346_v51 }
0x1670   :  { %2383 = vmatpush.msrb.mxu0 %v3347_v6 }
0x1677   :  { %v2271_v48 = vpop.permute.xlu1 %2270 }
0x1678   :  { %v2275_v56 = vmul.f32 %v2271_v48, %v3919_v47 }
0x167a   :  { %v2277_v58 = vadd.f32 %v2275_v56, %v3922_v2 }
0x167c   :  { %2282 = vrot.lane.b32.xlu1 %v2277_v58, %s3544_s26 }
0x1684   :  { %3354 = vrot.lane.b32.xlu1 %v3353_v22, %s3544_s26 }
0x168c   :  { %2365 = vrot.lane.b32.xlu1 %v4146_v59, %s3555_s8 }
0x16b6   :  { %v2281_v24 = vpop.permute.xlu2 %2280 }
0x16b7   :  { %3064 = vmatmul.msk.f32.vlgmr.msra.gmra.mxu1 %vm256_vm5, %v2281_v24 }
0x16be   :  { %v3350_v5 = vpop.permute.xlu2 %3349 }
0x16bf   :  { %v3351_v0 = vunpack.i.l.bf16 %v3350_v5  ;;  %v3352_v41 = vunpack.i.h.bf16 %v3350_v5 }
0x16c1   :  { %2384 = vmatpush.msrb.mxu0 %v3351_v0 }
0x16c3   :  { %2385 = vmatpush.msrb.mxu0 %v3352_v41 }
0x16c6   :  { %v3360_v7 = vpop.permute.xlu2 %3359 }
0x16c7   :  { %v3361_v13 = vunpack.i.l.bf16 %v3360_v7  ;;  %v3362_v23 = vunpack.i.h.bf16 %v3360_v7  ;;  %v4249_v7 = vld [vmem:[#allocation2 + $0x200] sm:$0xff] }
0x16ee   :  { %v2283_v49 = vpop.permute.xlu1 %2282 }
0x16ef   :  { %3065 = vmatmul.msk.f32.gmra.mxu1 %vm256_vm5, %v2283_v49 }
0x16f6   :  { %v3355_v45 = vpop.permute.xlu1 %3354 }
0x16f7   :  { %v3357_v8 = vunpack.i.h.bf16 %v3355_v45  ;;  %v3356_v59 = vunpack.i.l.bf16 %v3355_v45  ;;  %v4247_v45 = vld [vmem:[#allocation2 + $0x208] sm:$0xff] }
0x16f8   :  { %2506 = vmatpush.msra.mxu3 %v4247_v45 }
0x16f9   :  { %2386 = vmatpush.msrb.mxu0 %v3356_v59  ;;  %v4254_v59 = vld [vmem:[#allocation2 + $0x1f8] sm:$0xff] }
0x16fa   :  { %2507 = vmatpush.msra.mxu3 %v4249_v7 }
0x16fb   :  { %2387 = vmatpush.msrb.mxu0 %v3357_v8  ;;  %v3363_v8 = vpack.i.bf16 %v4249_v7, %v4247_v45 }
0x16fc   :  { %2508 = vmatpush.msra.mxu3 %v4254_v59 }
0x16fd   :  { %2388 = vmatpush.msrb.mxu0 %v3361_v13  ;;  %v4256_v13 = vld [vmem:[#allocation2 + $0x1f0] sm:$0xff] }
0x16fe   :  { %v2366_v18 = vpop.permute.xlu1 %2365  ;;  %2509 = vmatpush.msra.mxu3 %v4256_v13 }
0x16ff   :  { %2389 = vmatpush.msrb.mxu0 %v3362_v23 }
0x1734   :  { %v2325_v14 = vpop.f32.mrf.mxu1 }
0x1735   :  { %v2326_v50 = vadd.f32 %v2325_v14, %v2302_v9 }
0x1737   :  { %v2331_v60 = vmax.f32 %v2326_v50, 0.0 }
0x1739   :  { %3066 = vmatmul.msk.f32.vlgmr.msrb.gmra.mxu0 %vm88_vm4, %v2331_v60 }
0x176c   :  { %v2328_v62 = vpop.f32.mrf.mxu1 }
0x176d   :  { %v2329_v3 = vadd.f32 %v2328_v62, %v2302_v9  ;;  %v3368_v9 = vpack.i.bf16 %v4256_v13, %v4254_v59 }
0x176f   :  { %v2332_v4 = vmax.f32 %v2329_v3, 0.0 }
0x1771   :  { %3067 = vmatmul.msk.f32.gmra.mxu0 %vm88_vm4, %v2332_v4 }
0x17b6   :  { %v2391_v19 = vpop.f32.mrf.mxu0 }
0x17b7   :  { %v2392_v20 = vadd.f32 %v2391_v19, %v2366_v18 }
0x17b9   :  { %2399 = vrot.lane.b32.xlu0 %v2392_v20, %s3555_s8 }
0x17ee   :  { %v2394_v46 = vpop.f32.mrf.mxu0 }
0x17ef   :  { %v2395_v37 = vadd.f32 %v2394_v46, %v2366_v18 }
0x17f1   :  { %2401 = vrot.lane.b32.xlu2 %v2395_v37, %s3555_s8 }
0x182b   :  { %v2400_v35 = vpop.permute.xlu0 %2399 }
0x182c   :  { %v2405_v11 = vadd.f32 %v2400_v35, %v4201_v42 }
0x182e   :  { %2409 = vrot.lane.b32.xlu1 %v2405_v11, %s3544_s26 }
0x184b   :  { %v2402_v44 = vpop.permute.xlu2 %2401 }
0x184c   :  { %v2406_v28 = vadd.f32 %v2402_v44, %v2277_v58  ;;  %v4268_v44 = vld [vmem:[#allocation2 + $0x248] sm:$0xff] }
0x184d   :  { %2543 = vmatpush.msra.mxu2 %v4268_v44 }
0x184e   :  { %2411 = vrot.lane.b32.xlu0 %v2406_v28, %s3544_s26 }
0x18a0   :  { %v2410_v12 = vpop.permute.xlu1 %2409 }
0x18a1   :  { %v2415_v21 = vsel %vm256_vm5, %v2410_v12, 0.0 }
0x18a2   :  { %2416 = vadd.xlane.f32.xlu2 %v2415_v21  ;;  %v4277_v21 = vld [vmem:[#allocation2 + $0x230] sm:$0xff] }
0x18c0   :  { %v2412_v26 = vpop.permute.xlu0 %2411 }
0x18c1   :  { %v2418_v25 = vsel %vm256_vm5, %v2412_v26, 0.0 }
0x18c2   :  { %2419 = vadd.xlane.f32.xlu1 %v2418_v25  ;;  %v4283_v25 = vld [vmem:[#allocation2 + $0x228] sm:$0xff] }
0x18db   :  { %2469 = vrot.lane.b32.xlu1 %v4168_v15, %s3540_s22 }
0x1915   :  { %v2417_v1 = vpop.xlane.xlu2 %2416 }
0x1916   :  { %v2421_v55 = vmul.f32 %v2417_v1, %v3859_v61 }
0x1918   :  { %v2423_v27 = vsub.f32 %v2405_v11, %v2421_v55  ;;  %v4288_v55 = vld [vmem:[#allocation2 + $0x220] sm:$0xff] }
0x191a   :  { %v2425_v36 = vmul.f32 %v2423_v27, %v2423_v27 }
0x191c   :  { %2429 = vrot.lane.b32.xlu0 %v2425_v36, %s3544_s26  ;;  %v4294_v36 = vld [vmem:[#allocation2 + $0x210] sm:$0xff] }
0x1935   :  { %v2420_v39 = vpop.xlane.xlu1 %2419 }
0x1936   :  { %v2422_v43 = vmul.f32 %v2420_v39, %v3859_v61 }
0x1938   :  { %v2424_v30 = vsub.f32 %v2406_v28, %v2422_v43  ;;  %v4270_v28 = vld [vmem:[#allocation2 + $0x240] sm:$0xff]  ;;  %v4299_v43 = vld [vmem:[#allocation2 + $0x250] ss:$0 sm:$0xff] }
0x1939   :  { %v3373_v12 = vpack.i.bf16 %v4270_v28, %v4268_v44  ;;  %2544 = vmatpush.msra.mxu2 %v4270_v28  ;;  %v3383_v28 = vpack.i.bf16 %v4288_v55, %v4283_v25 }
0x193a   :  { %v2426_v32 = vmul.f32 %v2424_v30, %v2424_v30 }
0x193c   :  { %2431 = vrot.lane.b32.xlu0 %v2426_v32, %s3544_s26 }
0x194d   :  { %v2470_v16 = vpop.permute.xlu1 %2469 }
0x198e   :  { %v2430_v42 = vpop.permute.xlu0 %2429 }
0x198f   :  { %v2435_v63 = vsel %vm256_vm5, %v2430_v42, 0.0 }
0x1990   :  { %2436 = vadd.xlane.f32.xlu0 %v2435_v63 }
0x19ae   :  { %v2432_v10 = vpop.permute.xlu0 %2431 }
0x19af   :  { %v2438_v15 = vsel %vm256_vm5, %v2432_v10, 0.0 }
0x19b0   :  { %2439 = vadd.xlane.f32.xlu2 %v2438_v15 }
0x1a03   :  { %v2437_v33 = vpop.xlane.xlu0 %2436 }
0x1a04   :  { %v2441_v34 = vmul.f32 %v2437_v33, %v3859_v61  ;;  %v3403_v33 = vld [vmem:[#allocation2 + $0x258] ss:$0 sm:$0xff] }
0x1a06   :  { %v2443_v38 = vadd.f32 1e-05, %v2441_v34 }
0x1a08   :  { %3484 = vrsqrt.f32 %v2443_v38  ;;  %vm2451_vm13 = vweird.f32 %v2443_v38 }
0x1a0e   :  { %v3485_v40 = vpop.eup %3484 }
0x1a0f   :  { %v2446_v48 = vmul.f32 %v3485_v40, %v2443_v38  ;;  %vm2452_vm12 = vweird.f32 %v3485_v40 }
0x1a10   :  { %vm2453_vm14 = vmor %vm2451_vm13, %vm2452_vm12 }
0x1a11   :  { %v2447_v56 = vmul.f32 %v3485_v40, %v2446_v48 }
0x1a13   :  { %v2448_v58 = vmul.f32 0.5, %v2447_v56 }
0x1a15   :  { %v2449_v57 = vsub.f32 1.5, %v2448_v58 }
0x1a17   :  { %v2450_v17 = vmul.f32 %v3485_v40, %v2449_v57 }
0x1a19   :  { %v2454_v22 = vsel %vm2453_vm14, %v3485_v40, %v2450_v17 }
0x1a1a   :  { %v2465_v24 = vmul.f32 %v2454_v22, %v2423_v27  ;;  %v4291_v27 = vld [vmem:[#allocation2 + $0x218] sm:$0xff] }
0x1a1b   :  { %v3388_v39 = vpack.i.bf16 %v4294_v36, %v4291_v27 }
0x1a1c   :  { %v2467_v5 = vmul.f32 %v2465_v24, %v4191_v54 }
0x1a1e   :  { %v2472_v6 = vadd.f32 %v2470_v16, %v2467_v5 }
0x1a20   :  { %v2474_v51 = vmul.f32 %v2472_v6, %v3908_v52 }
0x1a22   :  { %v4242_v0 = vadd.f32 %v2474_v51, %v3911_v53 }
0x1a23   :  { %v2440_v41 = vpop.xlane.xlu2 %2439 }
0x1a24   :  { %v2442_v49 = vmul.f32 %v2440_v41, %v3859_v61  ;;  %2486 = vrot.lane.b32.xlu2 %v4242_v0, %s3544_s26 }
0x1a26   :  { %v2444_v23 = vadd.f32 1e-05, %v2442_v49 }
0x1a28   :  { %3486 = vrsqrt.f32 %v2444_v23  ;;  %vm2461_vm2 = vweird.f32 %v2444_v23 }
0x1a2e   :  { %v3487_v14 = vpop.eup %3486 }
0x1a2f   :  { %v2456_v50 = vmul.f32 %v3487_v14, %v2444_v23  ;;  %vm2462_vm15 = vweird.f32 %v3487_v14 }
0x1a30   :  { %vm2463_vm3 = vmor %vm2461_vm2, %vm2462_vm15 }
0x1a31   :  { %v2457_v60 = vmul.f32 %v3487_v14, %v2456_v50 }
0x1a33   :  { %v2458_v62 = vmul.f32 0.5, %v2457_v60 }
0x1a35   :  { %v2459_v3 = vsub.f32 1.5, %v2458_v62 }
0x1a37   :  { %v2460_v4 = vmul.f32 %v3487_v14, %v2459_v3 }
0x1a39   :  { %v2464_v18 = vsel %vm2463_vm3, %v3487_v14, %v2460_v4 }
0x1a3a   :  { %v2466_v19 = vmul.f32 %v2464_v18, %v2424_v30  ;;  %v3404_v18 = vld [vmem:[#allocation2 + $0x260] ss:$0 sm:$0xff] }
0x1a3c   :  { %v2468_v20 = vmul.f32 %v2466_v19, %v4191_v54  ;;  %v4275_v54 = vld [vmem:[#allocation2 + $0x238] sm:$0xff] }
0x1a3d   :  { %v3378_v26 = vpack.i.bf16 %v4277_v21, %v4275_v54  ;;  %2545 = vmatpush.msra.mxu2 %v4275_v54 }
0x1a3e   :  { %v2473_v46 = vadd.f32 %v2470_v16, %v2468_v20 }
0x1a3f   :  { %2546 = vmatpush.msra.mxu2 %v4277_v21 }
0x1a40   :  { %v2475_v37 = vmul.f32 %v2473_v46, %v3919_v47 }
0x1a41   :  { %2547 = vmatpush.msra.mxu2 %v4283_v25 }
0x1a42   :  { %v2477_v35 = vadd.f32 %v2475_v37, %v3922_v2 }
0x1a43   :  { %2548 = vmatpush.msra.mxu2 %v4288_v55 }
0x1a44   :  { %2488 = vrot.lane.b32.xlu0 %v2477_v35, %s3544_s26 }
0x1a45   :  { %2549 = vmatpush.msra.mxu2 %v4291_v27 }
0x1a47   :  { %2550 = vmatpush.msra.mxu2 %v4294_v36 }
0x1a7e   :  { %v2487_v11 = vpop.permute.xlu2 %2486 }
0x1a7f   :  { %3068 = vmatmul.msk.f32.vlgmr.msra.gmra.mxu3 %vm256_vm5, %v2487_v11 }
0x1ab6   :  { %v2489_v1 = vpop.permute.xlu0 %2488 }
0x1ab7   :  { %3069 = vmatmul.msk.f32.gmra.mxu3 %vm256_vm5, %v2489_v1 }
0x1b02   :  { %v2511_v30 = vpop.f32.mrf.mxu3 }
0x1b03   :  { %v2512_v32 = vadd.f32 %v4299_v43, %v2511_v30 }
0x1b05   :  { %v2517_v42 = vmax.f32 %v2512_v32, 0.0 }
0x1b07   :  { %3070 = vmatmul.msk.f32.vlgmr.msra.gmra.mxu2 %vm88_vm4, %v2517_v42 }
0x1b3a   :  { %v2514_v63 = vpop.f32.mrf.mxu3 }
0x1b3b   :  { %v2515_v10 = vadd.f32 %v4299_v43, %v2514_v63 }
0x1b3d   :  { %v2518_v15 = vmax.f32 %v2515_v10, 0.0 }
0x1b3f   :  { %3071 = vmatmul.msk.f32.gmra.mxu2 %vm88_vm4, %v2518_v15 }
0x1b8a   :  { %v2552_v34 = vpop.f32.mrf.mxu2 }
0x1b8b   :  { %v2553_v38 = vadd.f32 %v3403_v33, %v2552_v34 }
0x1b8d   :  { %2560 = vrot.lane.b32.xlu1 %v2553_v38, %s3555_s8 }
0x1bc2   :  { %v2555_v40 = vpop.f32.mrf.mxu2 }
0x1bc3   :  { %v2556_v48 = vadd.f32 %v3403_v33, %v2555_v40 }
0x1bc5   :  { %2562 = vrot.lane.b32.xlu2 %v2556_v48, %s3555_s8 }
0x1bff   :  { %v2561_v56 = vpop.permute.xlu1 %2560 }
0x1c00   :  { %v2566_v58 = vadd.f32 %v2561_v56, %v4242_v0 }
0x1c02   :  { %2571 = vrot.lane.b32.xlu1 %v2566_v58, %s3544_s26 }
0x1c1f   :  { %v2563_v57 = vpop.permute.xlu2 %2562 }
0x1c20   :  { %v2567_v17 = vadd.f32 %v2563_v57, %v2477_v35 }
0x1c22   :  { %2573 = vrot.lane.b32.xlu2 %v2567_v17, %s3544_s26 }
0x1c74   :  { %v2572_v22 = vpop.permute.xlu1 %2571 }
0x1c75   :  { %v2577_v24 = vsel %vm256_vm5, %v2572_v22, 0.0 }
0x1c76   :  { %2578 = vadd.xlane.f32.xlu0 %v2577_v24 }
0x1c7c   :  { %v2574_v16 = vpop.permute.xlu2 %2573 }
0x1c7d   :  { %v2580_v5 = vsel %vm256_vm5, %v2574_v16, 0.0 }
0x1c7e   :  { %2581 = vadd.xlane.f32.xlu1 %v2580_v5 }
0x1c97   :  { %2630 = vrot.lane.b32.xlu1 %v3403_v33, %s3544_s26 }
0x1ce9   :  { %v2579_v6 = vpop.xlane.xlu0 %2578 }
0x1cea   :  { %v2583_v51 = vmul.f32 %v2579_v6, %v3859_v61 }
0x1cec   :  { %v2585_v0 = vsub.f32 %v2566_v58, %v2583_v51 }
0x1cee   :  { %v2587_v41 = vmul.f32 %v2585_v0, %v2585_v0 }
0x1cf0   :  { %2591 = vrot.lane.b32.xlu2 %v2587_v41, %s3544_s26 }
0x1cf1   :  { %v2582_v49 = vpop.xlane.xlu1 %2581 }
0x1cf2   :  { %v2584_v23 = vmul.f32 %v2582_v49, %v3859_v61 }
0x1cf4   :  { %v2586_v14 = vsub.f32 %v2567_v17, %v2584_v23 }
0x1cf6   :  { %v2588_v50 = vmul.f32 %v2586_v14, %v2586_v14 }
0x1cf8   :  { %2593 = vrot.lane.b32.xlu2 %v2588_v50, %s3544_s26 }
0x1d09   :  { %v4326_v33 = vpop.permute.xlu1 %2630 }
0x1d4a   :  { %v2592_v60 = vpop.permute.xlu2 %2591 }
0x1d4b   :  { %v2597_v62 = vsel %vm256_vm5, %v2592_v60, 0.0 }
0x1d4c   :  { %2598 = vadd.xlane.f32.xlu2 %v2597_v62 }
0x1d52   :  { %v2594_v3 = vpop.permute.xlu2 %2593 }
0x1d53   :  { %v2600_v4 = vsel %vm256_vm5, %v2594_v3, 0.0 }
0x1d54   :  { %2601 = vadd.xlane.f32.xlu0 %v2600_v4 }
0x1d68   :  { %2637 = vrot.lane.b32.xlu0 %v3404_v18, %s3555_s8 }
0x1d70   :  { %3364 = vrot.lane.b32.xlu0 %v3363_v8, %s3540_s22 }
0x1dbf   :  { %v2599_v19 = vpop.xlane.xlu2 %2598 }
0x1dc0   :  { %v2603_v20 = vmul.f32 %v2599_v19, %v3859_v61 }
0x1dc2   :  { %v2605_v46 = vadd.f32 1e-05, %v2603_v20 }
0x1dc4   :  { %3488 = vrsqrt.f32 %v2605_v46  ;;  %vm2613_vm8 = vweird.f32 %v2605_v46 }
0x1dc7   :  { %v2602_v37 = vpop.xlane.xlu0 %2601 }
0x1dc8   :  { %v2604_v35 = vmul.f32 %v2602_v37, %v3859_v61 }
0x1dca   :  { %v3489_v11 = vpop.eup %3488  ;;  %v2606_v1 = vadd.f32 1e-05, %v2604_v35 }
0x1dcb   :  { %v2608_v30 = vmul.f32 %v3489_v11, %v2605_v46  ;;  %vm2614_vm7 = vweird.f32 %v3489_v11 }
0x1dcc   :  { %3490 = vrsqrt.f32 %v2606_v1  ;;  %vm2615_vm0 = vmor %vm2613_vm8, %vm2614_vm7  ;;  %vm2623_vm6 = vweird.f32 %v2606_v1 }
0x1dcd   :  { %v2609_v32 = vmul.f32 %v3489_v11, %v2608_v30 }
0x1dcf   :  { %v2610_v42 = vmul.f32 0.5, %v2609_v32 }
0x1dd1   :  { %v2611_v63 = vsub.f32 1.5, %v2610_v42 }
0x1dd2   :  { %v3491_v10 = vpop.eup %3490 }
0x1dd3   :  { %v2612_v15 = vmul.f32 %v3489_v11, %v2611_v63  ;;  %v2618_v45 = vmul.f32 %v3491_v10, %v2606_v1  ;;  %vm2624_vm1 = vweird.f32 %v3491_v10 }
0x1dd4   :  { %vm2625_vm9 = vmor %vm2623_vm6, %vm2624_vm1 }
0x1dd5   :  { %v2616_v7 = vsel %vm2615_vm0, %v3489_v11, %v2612_v15  ;;  %v2619_v8 = vmul.f32 %v3491_v10, %v2618_v45 }
0x1dd6   :  { %v2627_v34 = vmul.f32 %v2616_v7, %v2585_v0 }
0x1dd7   :  { %v2620_v38 = vmul.f32 0.5, %v2619_v8 }
0x1dd8   :  { %v2633_v40 = vmul.f32 %v4326_v33, %v2627_v34 }
0x1dd9   :  { %v2621_v48 = vsub.f32 1.5, %v2620_v38 }
0x1dda   :  { %v4329_v56 = vpop.permute.xlu0 %2637 }
0x1ddb   :  { %v2622_v58 = vmul.f32 %v3491_v10, %v2621_v48  ;;  %v2640_v57 = vadd.f32 %v4329_v56, %v2633_v40 }
0x1ddd   :  { %v2626_v17 = vsel %vm2625_vm9, %v3491_v10, %v2622_v58  ;;  %2644 = vrot.lane.b32.xlu2 %v2640_v57, %s3555_s8 }
0x1dde   :  { %v2628_v22 = vmul.f32 %v2626_v17, %v2586_v14 }
0x1de0   :  { %v2634_v24 = vmul.f32 %v4326_v33, %v2628_v22 }
0x1de2   :  { %v2641_v16 = vadd.f32 %v4329_v56, %v2634_v24  ;;  %v3365_v0 = vpop.permute.xlu0 %3364 }
0x1de3   :  { %v3367_v41 = vunpack.i.h.bf16 %v3365_v0  ;;  %v3366_v49 = vunpack.i.l.bf16 %v3365_v0 }
0x1de4   :  { %2646 = vrot.lane.b32.xlu1 %v2641_v16, %s3555_s8 }
0x1de5   :  { %3374 = vrot.lane.b32.xlu2 %v3373_v12, %s3544_s26  ;;  %2696 = vmatpush.msrb.mxu1 %v3366_v49 }
0x1de7   :  { %2697 = vmatpush.msrb.mxu1 %v3367_v41 }
0x1dec   :  { %3369 = vrot.lane.b32.xlu1 %v3368_v9, %s3540_s22 }
0x1ded   :  { %2677 = vrot.lane.b32.xlu2 %v4299_v43, %s3540_s22 }
0x1e37   :  { %v2645_v5 = vpop.permute.xlu2 %2644 }
0x1e38   :  { %v2650_v6 = vmul.f32 %v2645_v5, %v3908_v52 }
0x1e3a   :  { %v2652_v51 = vadd.f32 %v2650_v6, %v3911_v53 }
0x1e3c   :  { %2656 = vrot.lane.b32.xlu0 %v2652_v51, %s3540_s22 }
0x1e3f   :  { %v3375_v21 = vpop.permute.xlu2 %3374 }
0x1e40   :  { %v3376_v27 = vunpack.i.l.bf16 %v3375_v21 }
0x1e42   :  { %2755 = vmatpush.msra.mxu0 %v3376_v27 }
0x1e44   :  { %3379 = vrot.lane.b32.xlu0 %v3378_v26, %s3544_s26  ;;  %v3377_v26 = vunpack.i.h.bf16 %v3375_v21 }
0x1e46   :  { %2756 = vmatpush.msra.mxu0 %v3377_v26 }
0x1e47   :  { %v2678_v4 = vpop.permute.xlu2 %2677 }
0x1e4c   :  { %3389 = vrot.lane.b32.xlu0 %v3388_v39, %s3544_s26 }
0x1e56   :  { %v2647_v59 = vpop.permute.xlu1 %2646 }
0x1e57   :  { %v2651_v13 = vmul.f32 %v2647_v59, %v3919_v47 }
0x1e59   :  { %v2653_v9 = vadd.f32 %v2651_v13, %v3922_v2 }
0x1e5b   :  { %2658 = vrot.lane.b32.xlu1 %v2653_v9, %s3540_s22 }
0x1e5e   :  { %v3370_v44 = vpop.permute.xlu1 %3369 }
0x1e5f   :  { %v3372_v12 = vunpack.i.h.bf16 %v3370_v44  ;;  %v3371_v43 = vunpack.i.l.bf16 %v3370_v44 }
0x1e61   :  { %2698 = vmatpush.msrb.mxu1 %v3371_v43 }
0x1e63   :  { %2699 = vmatpush.msrb.mxu1 %v3372_v12  ;;  %3384 = vrot.lane.b32.xlu1 %v3383_v28, %s3544_s26 }
0x1eae   :  { %v2657_v54 = vpop.permute.xlu0 %2656 }
0x1eaf   :  { %3072 = vmatmul.msk.f32.vlgmr.msrb.gmra.mxu1 %vm256_vm5, %v2657_v54 }
0x1eb6   :  { %v3380_v36 = vpop.permute.xlu0 %3379 }
0x1eb7   :  { %v3382_v39 = vunpack.i.h.bf16 %v3380_v36  ;;  %v3381_v23 = vunpack.i.l.bf16 %v3380_v36 }
0x1eb9   :  { %2757 = vmatpush.msra.mxu0 %v3381_v23 }
0x1ebb   :  { %2758 = vmatpush.msra.mxu0 %v3382_v39 }
0x1ebe   :  { %v3390_v14 = vpop.permute.xlu0 %3389 }
0x1ebf   :  { %v3391_v62 = vunpack.i.l.bf16 %v3390_v14  ;;  %v3392_v3 = vunpack.i.h.bf16 %v3390_v14 }
0x1ecd   :  { %v2659_v25 = vpop.permute.xlu1 %2658 }
0x1ece   :  { %3073 = vmatmul.msk.f32.gmra.mxu1 %vm256_vm5, %v2659_v25 }
0x1ed5   :  { %v3385_v55 = vpop.permute.xlu1 %3384 }
0x1ed6   :  { %v3387_v50 = vunpack.i.h.bf16 %v3385_v55  ;;  %v3386_v60 = vunpack.i.l.bf16 %v3385_v55 }
0x1ed8   :  { %2759 = vmatpush.msra.mxu0 %v3386_v60 }
0x1eda   :  { %2760 = vmatpush.msra.mxu0 %v3387_v50 }
0x1edc   :  { %2761 = vmatpush.msra.mxu0 %v3391_v62 }
0x1ede   :  { %2762 = vmatpush.msra.mxu0 %v3392_v3 }
0x1f2c   :  { %v2701_v18 = vpop.f32.mrf.mxu1 }
0x1f2d   :  { %v2702_v19 = vadd.f32 %v2701_v18, %v2678_v4 }
0x1f2f   :  { %v2707_v20 = vmax.f32 %v2702_v19, 0.0 }
0x1f31   :  { %3074 = vmatmul.msk.f32.vlgmr.msra.gmra.mxu0 %vm88_vm4, %v2707_v20 }
0x1f4b   :  { %v2704_v46 = vpop.f32.mrf.mxu1 }
0x1f4c   :  { %v2705_v37 = vadd.f32 %v2704_v46, %v2678_v4 }
0x1f4e   :  { %v2708_v35 = vmax.f32 %v2705_v37, 0.0 }
0x1f50   :  { %3075 = vmatmul.msk.f32.gmra.mxu0 %vm88_vm4, %v2708_v35 }
0x1fae   :  { %v2764_v11 = vpop.f32.mrf.mxu0 }
0x1faf   :  { %v2765_v1 = vadd.f32 %v2764_v11, %v4326_v33  ;;  %v2859_v11 = vld [vmem:[#allocation2 + $0x280] sm:$0xff] }
0x1fb0   :  { %2884 = vmatpush.msrb.mxu3 %v2859_v11 }
0x1fb1   :  { %2772 = vrot.lane.b32.xlu1 %v2765_v1, %s3540_s22  ;;  %v2856_v1 = vld [vmem:[#allocation2 + $0x268] sm:$0xff] }
0x1fcd   :  { %v2767_v30 = vpop.f32.mrf.mxu0 }
0x1fce   :  { %v2768_v32 = vadd.f32 %v2767_v30, %v4326_v33  ;;  %v3405_v30 = vld [vmem:[#allocation2 + $0x288] ss:$0 sm:$0xff] }
0x1fd0   :  { %2774 = vrot.lane.b32.xlu2 %v2768_v32, %s3540_s22 }
0x2023   :  { %v2773_v42 = vpop.permute.xlu1 %2772 }
0x2024   :  { %v2778_v63 = vadd.f32 %v2773_v42, %v2652_v51 }
0x2026   :  { %2782 = vrot.lane.b32.xlu0 %v2778_v63, %s3540_s22 }
0x202a   :  { %v2775_v10 = vpop.permute.xlu2 %2774 }
0x202b   :  { %v2779_v15 = vadd.f32 %v2775_v10, %v2653_v9 }
0x202d   :  { %2784 = vrot.lane.b32.xlu1 %v2779_v15, %s3540_s22 }
0x2098   :  { %v2783_v45 = vpop.permute.xlu0 %2782 }
0x2099   :  { %v2788_v7 = vsel %vm256_vm5, %v2783_v45, 0.0 }
0x209a   :  { %2789 = vadd.xlane.f32.xlu2 %v2788_v7 }
0x209f   :  { %v2785_v8 = vpop.permute.xlu1 %2784 }
0x20a0   :  { %v2791_v34 = vsel %vm256_vm5, %v2785_v8, 0.0 }
0x20a1   :  { %2792 = vadd.xlane.f32.xlu0 %v2791_v34 }
0x210d   :  { %v2790_v38 = vpop.xlane.xlu2 %2789 }
0x210e   :  { %v2794_v40 = vmul.f32 %v2790_v38, %v3859_v61 }
0x2110   :  { %v2796_v48 = vsub.f32 %v2778_v63, %v2794_v40 }
0x2112   :  { %v2798_v58 = vmul.f32 %v2796_v48, %v2796_v48 }
0x2114   :  { %2802 = vrot.lane.b32.xlu1 %v2798_v58, %s3540_s22  ;;  %v2793_v57 = vpop.xlane.xlu0 %2792 }
0x2115   :  { %v2795_v17 = vmul.f32 %v2793_v57, %v3859_v61 }
0x2117   :  { %v2797_v22 = vsub.f32 %v2779_v15, %v2795_v17 }
0x2119   :  { %v2799_v24 = vmul.f32 %v2797_v22, %v2797_v22 }
0x211c   :  { %2804 = vrot.lane.b32.xlu1 %v2799_v24, %s3540_s22 }
0x2186   :  { %v2803_v16 = vpop.permute.xlu1 %2802 }
0x2187   :  { %v2808_v5 = vsel %vm256_vm5, %v2803_v16, 0.0 }
0x2188   :  { %2809 = vadd.xlane.f32.xlu1 %v2808_v5 }
0x218e   :  { %v2805_v6 = vpop.permute.xlu1 %2804 }
0x218f   :  { %v2811_v51 = vsel %vm256_vm5, %v2805_v6, 0.0 }
0x2190   :  { %2812 = vadd.xlane.f32.xlu2 %v2811_v51 }
0x21fb   :  { %v2810_v0 = vpop.xlane.xlu1 %2809 }
0x21fc   :  { %v2814_v41 = vmul.f32 %v2810_v0, %v3859_v61 }
0x21fe   :  { %v2816_v49 = vadd.f32 1e-05, %v2814_v41 }
0x2200   :  { %3492 = vrsqrt.f32 %v2816_v49  ;;  %vm2824_vm10 = vweird.f32 %v2816_v49 }
0x2203   :  { %v2813_v59 = vpop.xlane.xlu2 %2812 }
0x2204   :  { %v2815_v13 = vmul.f32 %v2813_v59, %v3859_v61 }
0x2206   :  { %v3493_v9 = vpop.eup %3492  ;;  %v2817_v44 = vadd.f32 1e-05, %v2815_v13 }
0x2207   :  { %v2819_v28 = vmul.f32 %v3493_v9, %v2816_v49  ;;  %vm2825_vm4 = vweird.f32 %v3493_v9 }
0x2208   :  { %3494 = vrsqrt.f32 %v2817_v44  ;;  %vm2826_vm11 = vmor %vm2824_vm10, %vm2825_vm4  ;;  %vm2834_vm13 = vweird.f32 %v2817_v44 }
0x2209   :  { %v2820_v12 = vmul.f32 %v3493_v9, %v2819_v28 }
0x220b   :  { %v2821_v43 = vmul.f32 0.5, %v2820_v12 }
0x220d   :  { %v2822_v54 = vsub.f32 1.5, %v2821_v43 }
0x220e   :  { %v3495_v21 = vpop.eup %3494 }
0x220f   :  { %v2823_v26 = vmul.f32 %v3493_v9, %v2822_v54  ;;  %v2829_v27 = vmul.f32 %v3495_v21, %v2817_v44  ;;  %vm2835_vm12 = vweird.f32 %v3495_v21 }
0x2210   :  { %vm2836_vm14 = vmor %vm2834_vm13, %vm2835_vm12 }
0x2211   :  { %v2827_v36 = vsel %vm2826_vm11, %v3493_v9, %v2823_v26  ;;  %v2830_v39 = vmul.f32 %v3495_v21, %v2829_v27 }
0x2212   :  { %v2838_v23 = vmul.f32 %v2827_v36, %v2796_v48 }
0x2213   :  { %v2831_v25 = vmul.f32 0.5, %v2830_v39 }
0x2214   :  { %v2840_v55 = vmul.f32 %v2838_v23, %v4326_v33 }
0x2215   :  { %v2832_v61 = vsub.f32 1.5, %v2831_v25 }
0x2216   :  { %v2842_v14 = vadd.f32 %v2840_v55, %v4329_v56 }
0x2217   :  { %v2833_v50 = vmul.f32 %v3495_v21, %v2832_v61 }
0x2218   :  { %2846 = vrot.lane.b32.xlu0 %v2842_v14, %s3555_s8 }
0x2219   :  { %v2837_v60 = vsel %vm2836_vm14, %v3495_v21, %v2833_v50 }
0x221a   :  { %v2839_v62 = vmul.f32 %v2837_v60, %v2797_v22 }
0x221c   :  { %v2841_v3 = vmul.f32 %v2839_v62, %v4326_v33  ;;  %v2858_v33 = vld [vmem:[#allocation2 + $0x278] sm:$0xff] }
0x221d   :  { %2885 = vmatpush.msrb.mxu3 %v2858_v33 }
0x221e   :  { %v2843_v4 = vadd.f32 %v2841_v3, %v4329_v56  ;;  %v2857_v56 = vld [vmem:[#allocation2 + $0x270] sm:$0xff] }
0x221f   :  { %2886 = vmatpush.msrb.mxu3 %v2857_v56 }
0x2220   :  { %2848 = vrot.lane.b32.xlu2 %v2843_v4, %s3555_s8 }
0x2221   :  { %2887 = vmatpush.msrb.mxu3 %v2856_v1 }
0x227a   :  { %v2849_v18 = vpop.permute.xlu2 %2848 }
0x227b   :  { %v2853_v19 = vmul.f32 %v2849_v18, %v3919_v47 }
0x227d   :  { %v2855_v20 = vadd.f32 %v2853_v19, %v3922_v2 }
0x227f   :  { %2866 = vrot.lane.b32.xlu1 %v2855_v20, %s3555_s8 }
0x228a   :  { %v2847_v46 = vpop.permute.xlu0 %2846 }
0x228b   :  { %v2852_v37 = vmul.f32 %v2847_v46, %v3908_v52 }
0x228d   :  { %v2854_v35 = vadd.f32 %v2852_v37, %v3911_v53 }
0x228f   :  { %2864 = vrot.lane.b32.xlu0 %v2854_v35, %s3555_s8 }
0x22f1   :  { %v2867_v2 = vpop.permute.xlu1 %2866 }
0x2301   :  { %v2865_v47 = vpop.permute.xlu0 %2864 }
0x2302   :  { %3076 = vmatmul.msk.f32.vlgmr.msrb.gmra.mxu3 %vm256_vm5, %v2865_v47 }
0x230a   :  { %3077 = vmatmul.msk.f32.gmra.mxu3 %vm256_vm5, %v2867_v2 }
0x2385   :  { %v2889_v52 = vpop.f32.mrf.mxu3 }
0x2386   :  { %v2890_v32 = vadd.f32 %v3405_v30, %v2889_v52 }
0x2388   :  { %v2895_v53 = vadd.f32 %v3619_v29, %v2890_v32 }
0x238a   :  { %2897 = vmax.xlane.f32.xlu0 %v2895_v53 }
0x238d   :  { %v2892_v42 = vpop.f32.mrf.mxu3 }
0x238e   :  { %v2893_v63 = vadd.f32 %v3405_v30, %v2892_v42 }
0x2390   :  { %v2896_v10 = vadd.f32 %v3624_v31, %v2893_v63 }
0x2392   :  { %2899 = vmax.xlane.f32.xlu2 %v2896_v10 }
0x23fd   :  { %v2898_v15 = vpop.xlane.xlu0 %2897 }
0x23fe   :  { %v2901_v45 = vsub.f32 %v2895_v53, %v2898_v15 }
0x2400   :  { %v2903_v7 = vmul.f32 1.442695, %v2901_v45 }
0x2402   :  { %3496 = vpow2.f32 %v2903_v7 }
0x2405   :  { %v2900_v8 = vpop.xlane.xlu2 %2899 }
0x2406   :  { %v2902_v34 = vsub.f32 %v2896_v10, %v2900_v8 }
0x2408   :  { %v3497_v38 = vpop.eup %3496  ;;  %v2905_v40 = vmul.f32 1.442695, %v2902_v34 }
0x2409   :  { %2907 = vadd.xlane.f32.xlu1 %v3497_v38 }
0x240a   :  { %3498 = vpow2.f32 %v2905_v40 }
0x2410   :  { %v3499_v48 = vpop.eup %3498 }
0x2411   :  { %2909 = vadd.xlane.f32.xlu0 %v3499_v48 }
0x247c   :  { %v2908_v58 = vpop.xlane.xlu1 %2907 }
0x247d   :  { %3500 = vrcp.f32 %v2908_v58  ;;  %v2922_v22 = vand.u32 2147483648, %v2908_v58  ;;  %v2920_v16 = vand.u32 2147483647, %v2908_v58  ;;  %vm2916_vm15 = vweird.f32 %v2908_v58 }
0x247f   :  { %v2923_v51 = vor.u32 1.1754944e-38, %v2922_v22  ;;  %vm2921_vm3 = vcmp.eq.f32.partialorder %v2920_v16, 8.507059e+37 }
0x2483   :  { %v3501_v29 = vpop.eup %3500 }
0x2484   :  { %v2912_v57 = vmul.f32 %v3501_v29, %v2908_v58  ;;  %v2910_v17 = vpop.xlane.xlu0 %2909  ;;  %vm2917_vm5 = vweird.f32 %v3501_v29 }
0x2485   :  { %3502 = vrcp.f32 %v2910_v17  ;;  %vm2918_vm2 = vmor %vm2916_vm15, %vm2917_vm5  ;;  %v2937_v9 = vand.u32 2147483648, %v2910_v17  ;;  %v2935_v28 = vand.u32 2147483647, %v2910_v17  ;;  %vm2931_vm8 = vweird.f32 %v2910_v17 }
0x2486   :  { %v2913_v31 = vsub.f32 1.0, %v2912_v57 }
0x2487   :  { %v2938_v43 = vor.u32 1.1754944e-38, %v2937_v9  ;;  %vm2936_vm1 = vcmp.eq.f32.partialorder %v2935_v28, 8.507059e+37 }
0x2488   :  { %v2914_v24 = vmul.f32 %v3501_v29, %v2913_v31 }
0x248a   :  { %v2915_v5 = vadd.f32 %v3501_v29, %v2914_v24 }
0x248b   :  { %v3503_v6 = vpop.eup %3502 }
0x248c   :  { %v2919_v0 = vsel %vm2918_vm2, %v3501_v29, %v2915_v5  ;;  %v2927_v41 = vmul.f32 %v3503_v6, %v2910_v17  ;;  %vm2932_vm7 = vweird.f32 %v3503_v6 }
0x248d   :  { %v2924_v49 = vsel %vm2921_vm3, %v2923_v51, %v2919_v0  ;;  %vm2933_vm0 = vmor %vm2931_vm8, %vm2932_vm7 }
0x248e   :  { %v2925_v59 = vmul.f32 %v3497_v38, %v2924_v49  ;;  %v2928_v13 = vsub.f32 1.0, %v2927_v41 }
0x2490   :  { %2941 = vst [vmem:[%s4408_s3] sm:$0xff] %v2925_v59  ;;  %v2929_v44 = vmul.f32 %v3503_v6, %v2928_v13 }
0x2492   :  { %v2930_v12 = vadd.f32 %v3503_v6, %v2929_v44 }
0x2494   :  { %v2934_v54 = vsel %vm2933_vm0, %v3503_v6, %v2930_v12 }
0x2495   :  { %v2939_v21 = vsel %vm2936_vm1, %v2938_v43, %v2934_v54 }
0x2496   :  { %v2940_v26 = vmul.f32 %v3499_v48, %v2939_v21 }
0x2498   :  { %2942 = vst [vmem:[%s4408_s3 + $0x8] sm:$0xff] %v2940_v26 }
0x2499   :  { %2947 = vsyncpa [#allocation3], 1 }

</bundles_post_ra>
